<compile_context>
chip_gen: v5e
topology: v5e:2x2
jax: 0.10.0
libtpu: 0.0.40
codegen_flags: <defaults>
</compile_context>

<pallas_src>
import math
from functools import partial

import jax
import jax.numpy as jnp
from jax.experimental import pallas as pl
from jax.experimental.pallas import tpu as pltpu

# MXU-native dtype on v5e/v6e/v7x; all elementwise math stays in f32.
MATMUL_DTYPE = jnp.bfloat16

# TODO(synk): flip on (pipeline_mode=pl.Buffered(1)) to single-buffer the
# grid-invariant weight blocks once validated on the target jax build.
SINGLE_BUFFER_WEIGHTS = False


# --------------------------------------------------------------------------
# hardware budget helpers
# --------------------------------------------------------------------------
def _device_kind():
    try:
        return jax.devices()[0].device_kind.lower()
    except Exception:
        return ""


def _hw_budget():
    """Return (vmem_limit_bytes or None, row-tile cap) per TPU generation."""
    kind = _device_kind()
    if "v7" in kind or "tpu7" in kind:
        return 48 * 1024 * 1024, 256        # 64 MiB physical VMEM: small tiles
    if "v4" in kind or "v5" in kind or "v6" in kind:
        return 96 * 1024 * 1024, 512        # 128 MiB physical VMEM
    return None, 256                        # unknown generation: stay conservative


def pick_batch_tile(B, S, cap_rows):
    bt = max(1, min(B, max(1, cap_rows // max(S, 1))))
    while B % bt:
        bt -= 1
    return max(bt, 1)


def pick_row_tile(M, cap_rows):
    if M <= cap_rows:
        return M
    return max(8, cap_rows - cap_rows % 8)   # cdiv grid handles a ragged tail


# --------------------------------------------------------------------------
# in-kernel helpers
# --------------------------------------------------------------------------
def _rmsnorm(xa, xb, gamma):
    ms = jnp.mean(xa * xa + xb * xb, axis=-1, keepdims=True)
    inv = jax.lax.rsqrt(ms + 1e-6)
    return xa * inv * gamma, xb * inv * gamma


# --------------------------------------------------------------------------
# Pallas kernels
# --------------------------------------------------------------------------
def _attn_block_kernel(j2_ref, j2h_ref, xa_ref, xb_ref, gamma_ref,
                       wqkv_ref, bqkv_ref, wo_ref, bo_ref,
                       cos_ref, sin_ref, mask_ref,
                       ya_ref, yb_ref, oa_scr, ob_scr, *, n_heads, head_dim):
    bt, S, E = xa_ref.shape
    rows = bt * S
    D = head_dim
    hd2 = D // 2

    xa = xa_ref[...].reshape(rows, E)
    xb = xb_ref[...].reshape(rows, E)
    gamma = gamma_ref[...]                       # (1, E)
    j2 = j2_ref[0]                               # scalar (SMEM)

    na, nb = _rmsnorm(xa, xb, gamma)

    # ---- fused QKV quantum-complex projection: two bf16 MXU dots -----------
    w = wqkv_ref[...]                            # (E, 6E) bf16
    r_a = jnp.dot(na.astype(MATMUL_DTYPE), w, preferred_element_type=jnp.float32)
    r_b = jnp.dot(nb.astype(MATMUL_DTYPE), w, preferred_element_type=jnp.float32)

    def qc(idx):
        lo = 2 * idx * E
        b_a = bqkv_ref[2 * idx:2 * idx + 1]                       # (1, E)
        b_b = bqkv_ref[2 * idx + 1:2 * idx + 2]
        out_a = r_a[:, lo:lo + E] + j2 * r_b[:, lo + E:lo + 2 * E] + b_a
        out_b = r_a[:, lo + E:lo + 2 * E] + r_b[:, lo:lo + E] + b_b
        return out_a, out_b

    qa, qb = qc(0)
    ka, kb = qc(1)
    va, vb = qc(2)

    # ---- RoPE in rotate-half (deinterleaved) layout ------------------------
    cos = cos_ref[...]                           # (S, D) = [cos | cos]
    sin = sin_ref[...]                           # (S, D) = [-sin | +sin]

    def rope(x):                                 # x: (bt, S, D)
        xr = jnp.concatenate([x[..., hd2:], x[..., :hd2]], axis=-1)
        return x * cos + xr * sin

    mask = mask_ref[...]                         # (bt, S, S)
    inv_sqrt_d = 1.0 / math.sqrt(D)

    # ---- per-head quantum-complex attention (fused 2D-contraction dots) ----
    for h in range(n_heads):
        lo = h * D
        qah = rope(qa[:, lo:lo + D].reshape(bt, S, D))
        qbh = rope(qb[:, lo:lo + D].reshape(bt, S, D))
        kah = rope(ka[:, lo:lo + D].reshape(bt, S, D))
        kbh = rope(kb[:, lo:lo + D].reshape(bt, S, D))
        vah = va[:, lo:lo + D].reshape(bt, S, D)
        vbh = vb[:, lo:lo + D].reshape(bt, S, D)
        j2h = j2h_ref[h]                          # per-head scalar (SMEM)

        q_cat = jnp.concatenate([qah, qbh], axis=-1).astype(MATMUL_DTYPE)
        k_sa = jnp.concatenate([kah, j2h * kbh], axis=-1).astype(MATMUL_DTYPE)
        k_sb = jnp.concatenate([kbh, kah], axis=-1).astype(MATMUL_DTYPE)

        sa = jnp.einsum('bqd,bkd->bqk', q_cat, k_sa,
                        preferred_element_type=jnp.float32)
        sb = jnp.einsum('bqd,bkd->bqk', q_cat, k_sb,
                        preferred_element_type=jnp.float32)

        mag = jnp.sqrt(sa * sa + sb * sb + 1e-8) * inv_sqrt_d
        mag = jnp.where(mask == 0.0, -1e9, mag)
        m = jnp.max(mag, axis=-1, keepdims=True)
        e = jnp.exp(mag - m)
        attn = e * pl.reciprocal(jnp.sum(e, axis=-1, keepdims=True), approx=True)

        v_cat = jnp.concatenate([vah, vbh], axis=-1).astype(MATMUL_DTYPE)
        o_cat = jnp.einsum('bqk,bkd->bqd', attn.astype(MATMUL_DTYPE), v_cat,
                           preferred_element_type=jnp.float32).reshape(rows, 2 * D)
        # write each head straight into VMEM scratch (no list + lane concat)
        oa_scr[:, lo:lo + D] = o_cat[:, :D]
        ob_scr[:, lo:lo + D] = o_cat[:, D:]

    # ---- fused output projection + residual (two dots, no sublane concat) --
    wo = wo_ref[...]                             # (E, 2E) bf16
    ro_a = jnp.dot(oa_scr[...].astype(MATMUL_DTYPE), wo,
                   preferred_element_type=jnp.float32)
    ro_b = jnp.dot(ob_scr[...].astype(MATMUL_DTYPE), wo,
                   preferred_element_type=jnp.float32)
    out_a = ro_a[:, :E] + j2 * ro_b[:, E:] + bo_ref[0:1]
    out_b = ro_a[:, E:] + ro_b[:, :E] + bo_ref[1:2]

    ya_ref[...] = (xa + out_a).reshape(bt, S, E)
    yb_ref[...] = (xb + out_b).reshape(bt, S, E)


def _ffn_block_kernel(j2_ref, xa_ref, xb_ref, gamma_ref,
                      wgu_ref, bgu_ref, wout_ref, bout_ref,
                      ya_ref, yb_ref, *, hidden):
    TM, E = xa_ref.shape
    Hd = hidden
    xa = xa_ref[...]
    xb = xb_ref[...]
    gamma = gamma_ref[...]
    j2 = j2_ref[0]

    na, nb = _rmsnorm(xa, xb, gamma)

    # fused gate/up quantum-complex projection: two bf16 MXU dots
    w = wgu_ref[...]                              # (E, 4*Hd) bf16
    r_a = jnp.dot(na.astype(MATMUL_DTYPE), w, preferred_element_type=jnp.float32)
    r_b = jnp.dot(nb.astype(MATMUL_DTYPE), w, preferred_element_type=jnp.float32)

    ga = r_a[:, 0:Hd] + j2 * r_b[:, Hd:2 * Hd] + bgu_ref[0:1]
    gb = r_a[:, Hd:2 * Hd] + r_b[:, 0:Hd] + bgu_ref[1:2]
    ua = r_a[:, 2 * Hd:3 * Hd] + j2 * r_b[:, 3 * Hd:4 * Hd] + bgu_ref[2:3]
    ub = r_a[:, 3 * Hd:4 * Hd] + r_b[:, 2 * Hd:3 * Hd] + bgu_ref[3:4]

    mag = jnp.sqrt(ga * ga + gb * gb)
    gated = mag * jax.nn.sigmoid(mag)             # silu(|gate|)
    fa = gated * ua
    fb = gated * ub

    # fused down projection + residual (two dots, no sublane concat)
    wo = wout_ref[...]                            # (Hd, 2E) bf16
    ro_a = jnp.dot(fa.astype(MATMUL_DTYPE), wo, preferred_element_type=jnp.float32)
    ro_b = jnp.dot(fb.astype(MATMUL_DTYPE), wo, preferred_element_type=jnp.float32)
    out_a = ro_a[:, :E] + j2 * ro_b[:, E:] + bout_ref[0:1]
    out_b = ro_a[:, E:] + ro_b[:, :E] + bout_ref[1:2]

    ya_ref[...] = xa + out_a
    yb_ref[...] = xb + out_b


def _pool_classify_kernel(x_ref, w_ref, b_ref, o_ref):
    # mean pooling over seq (matches reference: pooling ignores the mask)
    pooled = jnp.mean(x_ref[...], axis=1)         # (B, E)
    o_ref[...] = jnp.dot(pooled, w_ref[...],
                         preferred_element_type=jnp.float32) + b_ref[...]


# --------------------------------------------------------------------------
# kernel wrappers
# --------------------------------------------------------------------------
def _rep(shape):
    """Grid-invariant (weight / table) BlockSpec."""
    if SINGLE_BUFFER_WEIGHTS:
        return pl.BlockSpec(shape, lambda *_: (0,) * len(shape),
                            pipeline_mode=pl.Buffered(1))
    return pl.BlockSpec(shape, lambda *_: (0,) * len(shape))


def attn_block_apply(xa, xb, lp, cos_t, sin_t, mask, n_heads, bt, vmem_limit):
    B, S, E = xa.shape
    D = E // n_heads
    j2 = jnp.reshape(-1.0 + jnp.sin(2.0 * lp['layer_theta']), (1,)).astype(jnp.float32)
    j2h = (-1.0 + jnp.sin(2.0 * lp['thetas_head'])).astype(jnp.float32)

    smem = pl.BlockSpec(memory_space=pltpu.MemorySpace.SMEM)
    act = pl.BlockSpec((bt, S, E), lambda b: (b, 0, 0))
    msk = pl.BlockSpec((bt, S, S), lambda b: (b, 0, 0))

    cost = pl.CostEstimate(
        flops=int(32 * B * S * E * E + 12 * B * S * S * E),
        transcendentals=int(B * n_heads * S * S),
        bytes_accessed=int(16 * B * S * E + 4 * B * S * S + 16 * E * E))

    return pl.pallas_call(
        partial(_attn_block_kernel, n_heads=n_heads, head_dim=D),
        out_shape=(jax.ShapeDtypeStruct((B, S, E), jnp.float32),) * 2,
        grid=(B // bt,),
        in_specs=[smem, smem, act, act,
                  _rep((1, E)),
                  _rep((E, 6 * E)), _rep((6, E)),
                  _rep((E, 2 * E)), _rep((2, E)),
                  _rep((S, D)), _rep((S, D)),
                  msk],
        out_specs=(act, act),
        scratch_shapes=[pltpu.VMEM((bt * S, E), jnp.float32),
                        pltpu.VMEM((bt * S, E), jnp.float32)],
        compiler_params=pltpu.CompilerParams(
            dimension_semantics=("parallel",),
            vmem_limit_bytes=vmem_limit),
        cost_estimate=cost,
    )(j2, j2h, xa, xb, lp['gamma1'], lp['w_qkv'], lp['b_qkv'],
      lp['w_o'], lp['b_o'], cos_t, sin_t, mask)


def ffn_block_apply(xa, xb, lp, hidden, tm, vmem_limit):
    M, E = xa.shape
    j2 = jnp.reshape(-1.0 + jnp.sin(2.0 * lp['layer_theta']), (1,)).astype(jnp.float32)

    smem = pl.BlockSpec(memory_space=pltpu.MemorySpace.SMEM)
    row = pl.BlockSpec((tm, E), lambda i: (i, 0))

    cost = pl.CostEstimate(
        flops=int(24 * M * E * hidden),
        transcendentals=int(M * hidden),
        bytes_accessed=int(16 * M * E + 12 * E * hidden))

    return pl.pallas_call(
        partial(_ffn_block_kernel, hidden=hidden),
        out_shape=(jax.ShapeDtypeStruct((M, E), jnp.float32),) * 2,
        grid=(pl.cdiv(M, tm),),
        in_specs=[smem, row, row, _rep((1, E)),
                  _rep((E, 4 * hidden)), _rep((4, hidden)),
                  _rep((hidden, 2 * E)), _rep((2, E))],
        out_specs=(row, row),
        compiler_params=pltpu.CompilerParams(
            dimension_semantics=("parallel",),
            vmem_limit_bytes=vmem_limit),
        cost_estimate=cost,
    )(j2, xa, xb, lp['gamma2'], lp['w_gu'], lp['b_gu'], lp['w_out'], lp['b_out'])


# --------------------------------------------------------------------------
# parameter / table setup
# --------------------------------------------------------------------------
def make_rope_tables(head_dim, seq_len):
    inv_freq = 10000.0 ** (-2.0 * jnp.arange(0, head_dim, 2, dtype=jnp.float32) / head_dim)
    t = jnp.arange(seq_len, dtype=jnp.float32)
    freqs = jnp.outer(t, inv_freq)                                        # (S, D/2)
    cos = jnp.concatenate([jnp.cos(freqs), jnp.cos(freqs)], axis=-1)      # (S, D)
    sin = jnp.concatenate([-jnp.sin(freqs), jnp.sin(freqs)], axis=-1)     # (S, D)
    return cos, sin


def _deinterleave_perm(E, n_heads):
    # per head: even dims first, then odd dims  ->  rotate-half RoPE layout.
    D = E // n_heads
    per_head = jnp.concatenate([jnp.arange(0, D, 2), jnp.arange(1, D, 2)])
    return jnp.concatenate([per_head + h * D for h in range(n_heads)])


def init_params(key, cfg):
    E = cfg['embed_dim']
    H = cfg['n_heads']
    hidden = E * cfg['ffn_dim_multiplier']
    keys = iter(jax.random.split(key, 1024))
    perm = _deinterleave_perm(E, H)

    def xavier(out_dim, in_dim):
        bound = math.sqrt(6.0 / (in_dim + out_dim))
        return jax.random.uniform(next(keys), (out_dim, in_dim), jnp.float32, -bound, bound)

    def qc_pair(out_dim, in_dim, col_perm=None):
        # weight (in, 2*out) = [Wa^T | Wb^T], bias (2, out) = [ba; bb]
        wa_t = xavier(out_dim, in_dim).T
        wb_t = xavier(out_dim, in_dim).T
        b = jnp.zeros((2, out_dim), jnp.float32)
        if col_perm is not None:                 # bake the RoPE layout into Q/K
            wa_t, wb_t, b = wa_t[:, col_perm], wb_t[:, col_perm], b[:, col_perm]
        return jnp.concatenate([wa_t, wb_t], axis=1), b

    layers = []
    for _ in range(cfg['n_layers']):
        wq, bq = qc_pair(E, E, perm)
        wk, bk = qc_pair(E, E, perm)
        wv, bv = qc_pair(E, E)
        wo, bo = qc_pair(E, E)
        wg, bg = qc_pair(hidden, E)
        wu, bu = qc_pair(hidden, E)
        wout, bout = qc_pair(E, hidden)
        layers.append(dict(
            layer_theta=jnp.asarray(cfg['initial_theta'], jnp.float32),
            thetas_head=jnp.full((H,), cfg['initial_theta'], jnp.float32),
            gamma1=jnp.ones((1, E), jnp.float32),
            gamma2=jnp.ones((1, E), jnp.float32),
            w_qkv=jnp.concatenate([wq, wk, wv], axis=1).astype(MATMUL_DTYPE),  # (E, 6E)
            b_qkv=jnp.concatenate([bq, bk, bv], axis=0),                        # (6, E) f32
            w_o=wo.astype(MATMUL_DTYPE), b_o=bo,                                # (E, 2E)
            w_gu=jnp.concatenate([wg, wu], axis=1).astype(MATMUL_DTYPE),        # (E, 4*Hd)
            b_gu=jnp.concatenate([bg, bu], axis=0),                             # (4, Hd)
            w_out=wout.astype(MATMUL_DTYPE), b_out=bout,                        # (Hd, 2E)
        ))

    return dict(
        embedding=jax.random.normal(next(keys), (cfg['vocab_size'], E), jnp.float32),
        cls_w=xavier(2, E).T,                     # stored (E, 2)
        cls_b=jnp.zeros((1, 2), jnp.float32),
        layers=layers,
    )


def build_forward(cfg, cos_t, sin_t):
    E = cfg['embed_dim']
    H = cfg['n_heads']
    hidden = E * cfg['ffn_dim_multiplier']
    vmem_limit, cap_rows = _hw_budget()

    def forward(params, src, src_mask):
        B, S = src.shape
        M = B * S
        bt = pick_batch_tile(B, S, cap_rows)
        tm = pick_row_tile(M, cap_rows)
        # TODO(synk): embedding token lookup stays in XLA (data-dependent gather).
        xa = jnp.take(params['embedding'], src, axis=0).astype(jnp.float32)  # (B,S,E)
        xb = jnp.zeros_like(xa)                                              # imag part = 0
        mask = src_mask.astype(jnp.float32)                                  # (B,S,S)
        for lp in params['layers']:
            xa, xb = attn_block_apply(xa, xb, lp, cos_t, sin_t, mask, H, bt, vmem_limit)
            fa, fb = ffn_block_apply(xa.reshape(M, E), xb.reshape(M, E), lp,
                                     hidden, tm, vmem_limit)
            xa = fa.reshape(B, S, E)
            xb = fb.reshape(B, S, E)
        # TODO(synk): for very large B*S*E, give the pool/classify kernel a batch
        # grid instead of holding the full activation in VMEM in one shot.
        logits = pl.pallas_call(
            _pool_classify_kernel,
            out_shape=jax.ShapeDtypeStruct((B, 2), jnp.float32),
            in_specs=[pl.BlockSpec(memory_space=pltpu.MemorySpace.VMEM)] * 3,
            out_specs=pl.BlockSpec(memory_space=pltpu.MemorySpace.VMEM),
            compiler_params=pltpu.CompilerParams(vmem_limit_bytes=vmem_limit),
        )(xa, params['cls_w'], params['cls_b'])
        return logits

    return jax.jit(forward)


# --------------------------------------------------------------------------
if __name__ == "__main__":
    cfg = dict(vocab_size=50, embed_dim=32, n_heads=4, seq_len=8,
               n_layers=2, ffn_dim_multiplier=2, dropout_prob=0.1,
               initial_theta=0.5)

    key = jax.random.PRNGKey(0)
    pkey, skey = jax.random.split(key)
    params = init_params(pkey, cfg)
    cos_t, sin_t = make_rope_tables(cfg['embed_dim'] // cfg['n_heads'], cfg['seq_len'])

    B, S = 2, cfg['seq_len']
    src = jax.random.randint(skey, (B, S), 0, cfg['vocab_size'], dtype=jnp.int32)
    src_mask = jnp.ones((B, S, S), jnp.float32)   # all-valid attention mask

    fwd = build_forward(cfg, cos_t, sin_t)
    logits = fwd(params, src, src_mask)
    jax.block_until_ready(logits)
    assert logits.shape == (B, 2) and logits.dtype == jnp.float32
    print("KERNEL_OK")
</pallas_src>

<mosaic_0001>
module attributes {stable_mosaic.version = 11 : i64} {
  func.func @_ffn_block_kernel(%arg0: i32, %arg1: memref<1xf32, #tpu.memory_space<smem>>, %arg2: memref<16x32xf32, #tpu.memory_space<vmem>>, %arg3: memref<16x32xf32, #tpu.memory_space<vmem>>, %arg4: memref<1x32xf32, #tpu.memory_space<vmem>>, %arg5: memref<32x256xbf16, #tpu.memory_space<vmem>>, %arg6: memref<4x64xf32, #tpu.memory_space<vmem>>, %arg7: memref<64x64xbf16, #tpu.memory_space<vmem>>, %arg8: memref<2x32xf32, #tpu.memory_space<vmem>>, %arg9: memref<16x32xf32, #tpu.memory_space<vmem>>, %arg10: memref<16x32xf32, #tpu.memory_space<vmem>>) attributes {dimension_semantics = [#tpu.dimension_semantics<parallel>], iteration_bounds = array<i64: 1>, scalar_prefetch = 0 : i64, scratch_operands = 0 : i64, tpu.core_type = #tpu.core_type<tc>, window_params = [{transform_indices = @transform_0, window_bounds = array<i64: 1>}, {transform_indices = @transform_1, window_bounds = array<i64: 16, 32>}, {transform_indices = @transform_2, window_bounds = array<i64: 16, 32>}, {pipeline_mode = #tpu.pipeline_mode<synchronous>, transform_indices = @transform_3, window_bounds = array<i64: 1, 32>}, {pipeline_mode = #tpu.pipeline_mode<synchronous>, transform_indices = @transform_4, window_bounds = array<i64: 32, 256>}, {pipeline_mode = #tpu.pipeline_mode<synchronous>, transform_indices = @transform_5, window_bounds = array<i64: 4, 64>}, {pipeline_mode = #tpu.pipeline_mode<synchronous>, transform_indices = @transform_6, window_bounds = array<i64: 64, 64>}, {pipeline_mode = #tpu.pipeline_mode<synchronous>, transform_indices = @transform_7, window_bounds = array<i64: 2, 32>}, {transform_indices = @transform_8, window_bounds = array<i64: 16, 32>}, {transform_indices = @transform_9, window_bounds = array<i64: 16, 32>}]} {
    %c0 = arith.constant 0 : index
    %c0_0 = arith.constant 0 : index
    %0 = vector.load %arg2[%c0, %c0_0] : memref<16x32xf32, #tpu.memory_space<vmem>>, vector<16x32xf32>
    %c0_1 = arith.constant 0 : index
    %c0_2 = arith.constant 0 : index
    %1 = vector.load %arg3[%c0_1, %c0_2] : memref<16x32xf32, #tpu.memory_space<vmem>>, vector<16x32xf32>
    %c0_3 = arith.constant 0 : index
    %c0_4 = arith.constant 0 : index
    %2 = vector.load %arg4[%c0_3, %c0_4] : memref<1x32xf32, #tpu.memory_space<vmem>>, vector<1x32xf32>
    %c0_5 = arith.constant 0 : index
    %3 = memref.load %arg1[%c0_5] : memref<1xf32, #tpu.memory_space<smem>>
    %4 = arith.mulf %0, %0 : vector<16x32xf32>
    %5 = arith.mulf %1, %1 : vector<16x32xf32>
    %6 = arith.addf %4, %5 : vector<16x32xf32>
    %cst = arith.constant dense<0.000000e+00> : vector<16xf32>
    %7 = vector.multi_reduction <add>, %6, %cst [1] : vector<16x32xf32> to vector<16xf32>
    %8 = vector.shape_cast %7 : vector<16xf32> to vector<16x1xf32>
    %cst_6 = arith.constant 3.200000e+01 : f32
    %9 = vector.broadcast %cst_6 : f32 to vector<16x1xf32>
    %10 = arith.divf %8, %9 : vector<16x1xf32>
    %cst_7 = arith.constant 9.99999997E-7 : f32
    %11 = vector.broadcast %cst_7 : f32 to vector<16x1xf32>
    %12 = arith.addf %10, %11 : vector<16x1xf32>
    %13 = math.rsqrt %12 : vector<16x1xf32>
    %14 = vector.broadcast %13 : vector<16x1xf32> to vector<16x32xf32>
    %15 = arith.mulf %0, %14 : vector<16x32xf32>
    %16 = vector.broadcast %2 : vector<1x32xf32> to vector<16x32xf32>
    %17 = arith.mulf %15, %16 : vector<16x32xf32>
    %18 = vector.broadcast %13 : vector<16x1xf32> to vector<16x32xf32>
    %19 = arith.mulf %1, %18 : vector<16x32xf32>
    %20 = vector.broadcast %2 : vector<1x32xf32> to vector<16x32xf32>
    %21 = arith.mulf %19, %20 : vector<16x32xf32>
    %c0_8 = arith.constant 0 : index
    %c0_9 = arith.constant 0 : index
    %22 = vector.load %arg5[%c0_8, %c0_9] : memref<32x256xbf16, #tpu.memory_space<vmem>>, vector<32x256xbf16>
    %23 = arith.truncf %17 : vector<16x32xf32> to vector<16x32xbf16>
    %cst_10 = arith.constant dense<0.000000e+00> : vector<16x256xf32>
    %24 = tpu.matmul %23, %22, %cst_10 {dimension_numbers = #tpu.dot_dimension_numbers<[1], [0], [0], [1], [0, 0, 1, 1], [], []>} : vector<16x32xbf16>, vector<32x256xbf16>, vector<16x256xf32> -> vector<16x256xf32>
    %25 = arith.truncf %21 : vector<16x32xf32> to vector<16x32xbf16>
    %cst_11 = arith.constant dense<0.000000e+00> : vector<16x256xf32>
    %26 = tpu.matmul %25, %22, %cst_11 {dimension_numbers = #tpu.dot_dimension_numbers<[1], [0], [0], [1], [0, 0, 1, 1], [], []>} : vector<16x32xbf16>, vector<32x256xbf16>, vector<16x256xf32> -> vector<16x256xf32>
    %27 = vector.extract_strided_slice %24 {offsets = [0, 0], sizes = [16, 64], strides = [1, 1]} : vector<16x256xf32> to vector<16x64xf32>
    %28 = vector.extract_strided_slice %26 {offsets = [0, 64], sizes = [16, 64], strides = [1, 1]} : vector<16x256xf32> to vector<16x64xf32>
    %29 = vector.broadcast %3 : f32 to vector<16x64xf32>
    %30 = arith.mulf %29, %28 : vector<16x64xf32>
    %31 = arith.addf %27, %30 : vector<16x64xf32>
    %c0_12 = arith.constant 0 : index
    %c0_13 = arith.constant 0 : index
    %32 = vector.load %arg6[%c0_12, %c0_13] : memref<4x64xf32, #tpu.memory_space<vmem>>, vector<1x64xf32>
    %33 = vector.broadcast %32 : vector<1x64xf32> to vector<16x64xf32>
    %34 = arith.addf %31, %33 : vector<16x64xf32>
    %35 = vector.extract_strided_slice %24 {offsets = [0, 64], sizes = [16, 64], strides = [1, 1]} : vector<16x256xf32> to vector<16x64xf32>
    %36 = vector.extract_strided_slice %26 {offsets = [0, 0], sizes = [16, 64], strides = [1, 1]} : vector<16x256xf32> to vector<16x64xf32>
    %37 = arith.addf %35, %36 : vector<16x64xf32>
    %c1 = arith.constant 1 : index
    %c0_14 = arith.constant 0 : index
    %38 = vector.load %arg6[%c1, %c0_14] : memref<4x64xf32, #tpu.memory_space<vmem>>, vector<1x64xf32>
    %39 = vector.broadcast %38 : vector<1x64xf32> to vector<16x64xf32>
    %40 = arith.addf %37, %39 : vector<16x64xf32>
    %41 = vector.extract_strided_slice %24 {offsets = [0, 128], sizes = [16, 64], strides = [1, 1]} : vector<16x256xf32> to vector<16x64xf32>
    %42 = vector.extract_strided_slice %26 {offsets = [0, 192], sizes = [16, 64], strides = [1, 1]} : vector<16x256xf32> to vector<16x64xf32>
    %43 = vector.broadcast %3 : f32 to vector<16x64xf32>
    %44 = arith.mulf %43, %42 : vector<16x64xf32>
    %45 = arith.addf %41, %44 : vector<16x64xf32>
    %c2 = arith.constant 2 : index
    %c0_15 = arith.constant 0 : index
    %46 = vector.load %arg6[%c2, %c0_15] : memref<4x64xf32, #tpu.memory_space<vmem>>, vector<1x64xf32>
    %47 = vector.broadcast %46 : vector<1x64xf32> to vector<16x64xf32>
    %48 = arith.addf %45, %47 : vector<16x64xf32>
    %49 = vector.extract_strided_slice %24 {offsets = [0, 192], sizes = [16, 64], strides = [1, 1]} : vector<16x256xf32> to vector<16x64xf32>
    %50 = vector.extract_strided_slice %26 {offsets = [0, 128], sizes = [16, 64], strides = [1, 1]} : vector<16x256xf32> to vector<16x64xf32>
    %51 = arith.addf %49, %50 : vector<16x64xf32>
    %c3 = arith.constant 3 : index
    %c0_16 = arith.constant 0 : index
    %52 = vector.load %arg6[%c3, %c0_16] : memref<4x64xf32, #tpu.memory_space<vmem>>, vector<1x64xf32>
    %53 = vector.broadcast %52 : vector<1x64xf32> to vector<16x64xf32>
    %54 = arith.addf %51, %53 : vector<16x64xf32>
    %55 = arith.mulf %34, %34 : vector<16x64xf32>
    %56 = arith.mulf %40, %40 : vector<16x64xf32>
    %57 = arith.addf %55, %56 : vector<16x64xf32>
    %58 = math.sqrt %57 : vector<16x64xf32>
    %59 = arith.negf %58 : vector<16x64xf32>
    %60 = math.exp %59 : vector<16x64xf32>
    %cst_17 = arith.constant 1.000000e+00 : f32
    %61 = vector.broadcast %cst_17 : f32 to vector<16x64xf32>
    %62 = arith.addf %61, %60 : vector<16x64xf32>
    %63 = arith.divf %61, %62 : vector<16x64xf32>
    %64 = arith.mulf %58, %63 : vector<16x64xf32>
    %65 = arith.mulf %64, %48 : vector<16x64xf32>
    %66 = arith.mulf %64, %54 : vector<16x64xf32>
    %c0_18 = arith.constant 0 : index
    %c0_19 = arith.constant 0 : index
    %67 = vector.load %arg7[%c0_18, %c0_19] : memref<64x64xbf16, #tpu.memory_space<vmem>>, vector<64x64xbf16>
    %68 = arith.truncf %65 : vector<16x64xf32> to vector<16x64xbf16>
    %cst_20 = arith.constant dense<0.000000e+00> : vector<16x64xf32>
    %69 = tpu.matmul %68, %67, %cst_20 {dimension_numbers = #tpu.dot_dimension_numbers<[1], [0], [0], [1], [0, 0, 1, 1], [], []>} : vector<16x64xbf16>, vector<64x64xbf16>, vector<16x64xf32> -> vector<16x64xf32>
    %70 = arith.truncf %66 : vector<16x64xf32> to vector<16x64xbf16>
    %cst_21 = arith.constant dense<0.000000e+00> : vector<16x64xf32>
    %71 = tpu.matmul %70, %67, %cst_21 {dimension_numbers = #tpu.dot_dimension_numbers<[1], [0], [0], [1], [0, 0, 1, 1], [], []>} : vector<16x64xbf16>, vector<64x64xbf16>, vector<16x64xf32> -> vector<16x64xf32>
    %72 = vector.extract_strided_slice %69 {offsets = [0, 0], sizes = [16, 32], strides = [1, 1]} : vector<16x64xf32> to vector<16x32xf32>
    %73 = vector.extract_strided_slice %71 {offsets = [0, 32], sizes = [16, 32], strides = [1, 1]} : vector<16x64xf32> to vector<16x32xf32>
    %74 = vector.broadcast %3 : f32 to vector<16x32xf32>
    %75 = arith.mulf %74, %73 : vector<16x32xf32>
    %76 = arith.addf %72, %75 : vector<16x32xf32>
    %c0_22 = arith.constant 0 : index
    %c0_23 = arith.constant 0 : index
    %77 = vector.load %arg8[%c0_22, %c0_23] : memref<2x32xf32, #tpu.memory_space<vmem>>, vector<1x32xf32>
    %78 = vector.broadcast %77 : vector<1x32xf32> to vector<16x32xf32>
    %79 = arith.addf %76, %78 : vector<16x32xf32>
    %80 = vector.extract_strided_slice %69 {offsets = [0, 32], sizes = [16, 32], strides = [1, 1]} : vector<16x64xf32> to vector<16x32xf32>
    %81 = vector.extract_strided_slice %71 {offsets = [0, 0], sizes = [16, 32], strides = [1, 1]} : vector<16x64xf32> to vector<16x32xf32>
    %82 = arith.addf %80, %81 : vector<16x32xf32>
    %c1_24 = arith.constant 1 : index
    %c0_25 = arith.constant 0 : index
    %83 = vector.load %arg8[%c1_24, %c0_25] : memref<2x32xf32, #tpu.memory_space<vmem>>, vector<1x32xf32>
    %84 = vector.broadcast %83 : vector<1x32xf32> to vector<16x32xf32>
    %85 = arith.addf %82, %84 : vector<16x32xf32>
    %86 = arith.addf %0, %79 : vector<16x32xf32>
    %c0_26 = arith.constant 0 : index
    %c0_27 = arith.constant 0 : index
    %87 = vector.load %arg9[%c0_26, %c0_27] : memref<16x32xf32, #tpu.memory_space<vmem>>, vector<16x32xf32>
    tpu.vector_store %arg9[%c0_26, %c0_27], %86 {strides = array<i32>} : memref<16x32xf32, #tpu.memory_space<vmem>>, vector<16x32xf32>,
    %88 = arith.addf %1, %85 : vector<16x32xf32>
    %c0_28 = arith.constant 0 : index
    %c0_29 = arith.constant 0 : index
    %89 = vector.load %arg10[%c0_28, %c0_29] : memref<16x32xf32, #tpu.memory_space<vmem>>, vector<16x32xf32>
    tpu.vector_store %arg10[%c0_28, %c0_29], %88 {strides = array<i32>} : memref<16x32xf32, #tpu.memory_space<vmem>>, vector<16x32xf32>,
    return
  }
  func.func @transform_0(%arg0: i32) -> i32 {
    %c0_i32 = arith.constant 0 : i32
    %c0_i32_0 = arith.constant 0 : i32
    return %c0_i32 : i32
  }
  func.func @transform_1(%arg0: i32) -> (i32, i32) {
    %c0_i32 = arith.constant 0 : i32
    %c0_i32_0 = arith.constant 0 : i32
    return %arg0, %c0_i32 : i32, i32
  }
  func.func @transform_2(%arg0: i32) -> (i32, i32) {
    %c0_i32 = arith.constant 0 : i32
    %c0_i32_0 = arith.constant 0 : i32
    return %arg0, %c0_i32 : i32, i32
  }
  func.func @transform_3(%arg0: i32) -> (i32, i32) {
    %c0_i32 = arith.constant 0 : i32
    %c0_i32_0 = arith.constant 0 : i32
    %c0_i32_1 = arith.constant 0 : i32
    return %c0_i32, %c0_i32_0 : i32, i32
  }
  func.func @transform_4(%arg0: i32) -> (i32, i32) {
    %c0_i32 = arith.constant 0 : i32
    %c0_i32_0 = arith.constant 0 : i32
    %c0_i32_1 = arith.constant 0 : i32
    return %c0_i32, %c0_i32_0 : i32, i32
  }
  func.func @transform_5(%arg0: i32) -> (i32, i32) {
    %c0_i32 = arith.constant 0 : i32
    %c0_i32_0 = arith.constant 0 : i32
    %c0_i32_1 = arith.constant 0 : i32
    return %c0_i32, %c0_i32_0 : i32, i32
  }
  func.func @transform_6(%arg0: i32) -> (i32, i32) {
    %c0_i32 = arith.constant 0 : i32
    %c0_i32_0 = arith.constant 0 : i32
    %c0_i32_1 = arith.constant 0 : i32
    return %c0_i32, %c0_i32_0 : i32, i32
  }
  func.func @transform_7(%arg0: i32) -> (i32, i32) {
    %c0_i32 = arith.constant 0 : i32
    %c0_i32_0 = arith.constant 0 : i32
    %c0_i32_1 = arith.constant 0 : i32
    return %c0_i32, %c0_i32_0 : i32, i32
  }
  func.func @transform_8(%arg0: i32) -> (i32, i32) {
    %c0_i32 = arith.constant 0 : i32
    %c0_i32_0 = arith.constant 0 : i32
    return %arg0, %c0_i32 : i32, i32
  }
  func.func @transform_9(%arg0: i32) -> (i32, i32) {
    %c0_i32 = arith.constant 0 : i32
    %c0_i32_0 = arith.constant 0 : i32
    return %arg0, %c0_i32 : i32, i32
  }
}

module attributes {stable_mosaic.version = 11 : i64} {
  func.func @_pool_classify_kernel(%arg0: memref<2x8x32xf32, #tpu.memory_space<vmem>>, %arg1: memref<32x2xf32, #tpu.memory_space<vmem>>, %arg2: memref<1x2xf32, #tpu.memory_space<vmem>>, %arg3: memref<2x2xf32, #tpu.memory_space<vmem>>) attributes {dimension_semantics = [], scalar_prefetch = 0 : i64, scratch_operands = 0 : i64, tpu.core_type = #tpu.core_type<tc>} {
    %c0 = arith.constant 0 : index
    %c0_0 = arith.constant 0 : index
    %c0_1 = arith.constant 0 : index
    %0 = vector.load %arg0[%c0, %c0_0, %c0_1] : memref<2x8x32xf32, #tpu.memory_space<vmem>>, vector<2x8x32xf32>
    %cst = arith.constant dense<0.000000e+00> : vector<2x32xf32>
    %1 = vector.multi_reduction <add>, %0, %cst [1] : vector<2x8x32xf32> to vector<2x32xf32>
    %cst_2 = arith.constant 8.000000e+00 : f32
    %2 = vector.broadcast %cst_2 : f32 to vector<2x32xf32>
    %3 = arith.divf %1, %2 : vector<2x32xf32>
    %c0_3 = arith.constant 0 : index
    %c0_4 = arith.constant 0 : index
    %4 = vector.load %arg1[%c0_3, %c0_4] : memref<32x2xf32, #tpu.memory_space<vmem>>, vector<32x2xf32>
    %cst_5 = arith.constant dense<0.000000e+00> : vector<2x2xf32>
    %5 = tpu.matmul %3, %4, %cst_5 {dimension_numbers = #tpu.dot_dimension_numbers<[1], [0], [0], [1], [0, 0, 1, 1], [], []>} : vector<2x32xf32>, vector<32x2xf32>, vector<2x2xf32> -> vector<2x2xf32>
    %c0_6 = arith.constant 0 : index
    %c0_7 = arith.constant 0 : index
    %6 = vector.load %arg2[%c0_6, %c0_7] : memref<1x2xf32, #tpu.memory_space<vmem>>, vector<1x2xf32>
    %7 = vector.broadcast %6 : vector<1x2xf32> to vector<2x2xf32>
    %8 = arith.addf %5, %7 : vector<2x2xf32>
    %c0_8 = arith.constant 0 : index
    %c0_9 = arith.constant 0 : index
    %9 = vector.load %arg3[%c0_8, %c0_9] : memref<2x2xf32, #tpu.memory_space<vmem>>, vector<2x2xf32>
    tpu.vector_store %arg3[%c0_8, %c0_9], %8 {strides = array<i32>} : memref<2x2xf32, #tpu.memory_space<vmem>>, vector<2x2xf32>,
    return
  }
}

module attributes {stable_mosaic.version = 11 : i64} {
  func.func @_ffn_block_kernel(%arg0: i32, %arg1: memref<1xf32, #tpu.memory_space<smem>>, %arg2: memref<16x32xf32, #tpu.memory_space<vmem>>, %arg3: memref<16x32xf32, #tpu.memory_space<vmem>>, %arg4: memref<1x32xf32, #tpu.memory_space<vmem>>, %arg5: memref<32x256xbf16, #tpu.memory_space<vmem>>, %arg6: memref<4x64xf32, #tpu.memory_space<vmem>>, %arg7: memref<64x64xbf16, #tpu.memory_space<vmem>>, %arg8: memref<2x32xf32, #tpu.memory_space<vmem>>, %arg9: memref<16x32xf32, #tpu.memory_space<vmem>>, %arg10: memref<16x32xf32, #tpu.memory_space<vmem>>) attributes {dimension_semantics = [#tpu.dimension_semantics<parallel>], iteration_bounds = array<i64: 1>, scalar_prefetch = 0 : i64, scratch_operands = 0 : i64, tpu.core_type = #tpu.core_type<tc>, window_params = [{transform_indices = @transform_0, window_bounds = array<i64: 1>}, {transform_indices = @transform_1, window_bounds = array<i64: 16, 32>}, {transform_indices = @transform_2, window_bounds = array<i64: 16, 32>}, {pipeline_mode = #tpu.pipeline_mode<synchronous>, transform_indices = @transform_3, window_bounds = array<i64: 1, 32>}, {pipeline_mode = #tpu.pipeline_mode<synchronous>, transform_indices = @transform_4, window_bounds = array<i64: 32, 256>}, {pipeline_mode = #tpu.pipeline_mode<synchronous>, transform_indices = @transform_5, window_bounds = array<i64: 4, 64>}, {pipeline_mode = #tpu.pipeline_mode<synchronous>, transform_indices = @transform_6, window_bounds = array<i64: 64, 64>}, {pipeline_mode = #tpu.pipeline_mode<synchronous>, transform_indices = @transform_7, window_bounds = array<i64: 2, 32>}, {transform_indices = @transform_8, window_bounds = array<i64: 16, 32>}, {transform_indices = @transform_9, window_bounds = array<i64: 16, 32>}]} {
    %c0 = arith.constant 0 : index
    %c0_0 = arith.constant 0 : index
    %0 = vector.load %arg2[%c0, %c0_0] : memref<16x32xf32, #tpu.memory_space<vmem>>, vector<16x32xf32>
    %c0_1 = arith.constant 0 : index
    %c0_2 = arith.constant 0 : index
    %1 = vector.load %arg3[%c0_1, %c0_2] : memref<16x32xf32, #tpu.memory_space<vmem>>, vector<16x32xf32>
    %c0_3 = arith.constant 0 : index
    %c0_4 = arith.constant 0 : index
    %2 = vector.load %arg4[%c0_3, %c0_4] : memref<1x32xf32, #tpu.memory_space<vmem>>, vector<1x32xf32>
    %c0_5 = arith.constant 0 : index
    %3 = memref.load %arg1[%c0_5] : memref<1xf32, #tpu.memory_space<smem>>
    %4 = arith.mulf %0, %0 : vector<16x32xf32>
    %5 = arith.mulf %1, %1 : vector<16x32xf32>
    %6 = arith.addf %4, %5 : vector<16x32xf32>
    %cst = arith.constant dense<0.000000e+00> : vector<16xf32>
    %7 = vector.multi_reduction <add>, %6, %cst [1] : vector<16x32xf32> to vector<16xf32>
    %8 = vector.shape_cast %7 : vector<16xf32> to vector<16x1xf32>
    %cst_6 = arith.constant 3.200000e+01 : f32
    %9 = vector.broadcast %cst_6 : f32 to vector<16x1xf32>
    %10 = arith.divf %8, %9 : vector<16x1xf32>
    %cst_7 = arith.constant 9.99999997E-7 : f32
    %11 = vector.broadcast %cst_7 : f32 to vector<16x1xf32>
    %12 = arith.addf %10, %11 : vector<16x1xf32>
    %13 = math.rsqrt %12 : vector<16x1xf32>
    %14 = vector.broadcast %13 : vector<16x1xf32> to vector<16x32xf32>
    %15 = arith.mulf %0, %14 : vector<16x32xf32>
    %16 = vector.broadcast %2 : vector<1x32xf32> to vector<16x32xf32>
    %17 = arith.mulf %15, %16 : vector<16x32xf32>
    %18 = vector.broadcast %13 : vector<16x1xf32> to vector<16x32xf32>
    %19 = arith.mulf %1, %18 : vector<16x32xf32>
    %20 = vector.broadcast %2 : vector<1x32xf32> to vector<16x32xf32>
    %21 = arith.mulf %19, %20 : vector<16x32xf32>
    %c0_8 = arith.constant 0 : index
    %c0_9 = arith.constant 0 : index
    %22 = vector.load %arg5[%c0_8, %c0_9] : memref<32x256xbf16, #tpu.memory_space<vmem>>, vector<32x256xbf16>
    %23 = arith.truncf %17 : vector<16x32xf32> to vector<16x32xbf16>
    %cst_10 = arith.constant dense<0.000000e+00> : vector<16x256xf32>
    %24 = tpu.matmul %23, %22, %cst_10 {dimension_numbers = #tpu.dot_dimension_numbers<[1], [0], [0], [1], [0, 0, 1, 1], [], []>} : vector<16x32xbf16>, vector<32x256xbf16>, vector<16x256xf32> -> vector<16x256xf32>
    %25 = arith.truncf %21 : vector<16x32xf32> to vector<16x32xbf16>
    %cst_11 = arith.constant dense<0.000000e+00> : vector<16x256xf32>
    %26 = tpu.matmul %25, %22, %cst_11 {dimension_numbers = #tpu.dot_dimension_numbers<[1], [0], [0], [1], [0, 0, 1, 1], [], []>} : vector<16x32xbf16>, vector<32x256xbf16>, vector<16x256xf32> -> vector<16x256xf32>
    %27 = vector.extract_strided_slice %24 {offsets = [0, 0], sizes = [16, 64], strides = [1, 1]} : vector<16x256xf32> to vector<16x64xf32>
    %28 = vector.extract_strided_slice %26 {offsets = [0, 64], sizes = [16, 64], strides = [1, 1]} : vector<16x256xf32> to vector<16x64xf32>
    %29 = vector.broadcast %3 : f32 to vector<16x64xf32>
    %30 = arith.mulf %29, %28 : vector<16x64xf32>
    %31 = arith.addf %27, %30 : vector<16x64xf32>
    %c0_12 = arith.constant 0 : index
    %c0_13 = arith.constant 0 : index
    %32 = vector.load %arg6[%c0_12, %c0_13] : memref<4x64xf32, #tpu.memory_space<vmem>>, vector<1x64xf32>
    %33 = vector.broadcast %32 : vector<1x64xf32> to vector<16x64xf32>
    %34 = arith.addf %31, %33 : vector<16x64xf32>
    %35 = vector.extract_strided_slice %24 {offsets = [0, 64], sizes = [16, 64], strides = [1, 1]} : vector<16x256xf32> to vector<16x64xf32>
    %36 = vector.extract_strided_slice %26 {offsets = [0, 0], sizes = [16, 64], strides = [1, 1]} : vector<16x256xf32> to vector<16x64xf32>
    %37 = arith.addf %35, %36 : vector<16x64xf32>
    %c1 = arith.constant 1 : index
    %c0_14 = arith.constant 0 : index
    %38 = vector.load %arg6[%c1, %c0_14] : memref<4x64xf32, #tpu.memory_space<vmem>>, vector<1x64xf32>
    %39 = vector.broadcast %38 : vector<1x64xf32> to vector<16x64xf32>
    %40 = arith.addf %37, %39 : vector<16x64xf32>
    %41 = vector.extract_strided_slice %24 {offsets = [0, 128], sizes = [16, 64], strides = [1, 1]} : vector<16x256xf32> to vector<16x64xf32>
    %42 = vector.extract_strided_slice %26 {offsets = [0, 192], sizes = [16, 64], strides = [1, 1]} : vector<16x256xf32> to vector<16x64xf32>
    %43 = vector.broadcast %3 : f32 to vector<16x64xf32>
    %44 = arith.mulf %43, %42 : vector<16x64xf32>
    %45 = arith.addf %41, %44 : vector<16x64xf32>
    %c2 = arith.constant 2 : index
    %c0_15 = arith.constant 0 : index
    %46 = vector.load %arg6[%c2, %c0_15] : memref<4x64xf32, #tpu.memory_space<vmem>>, vector<1x64xf32>
    %47 = vector.broadcast %46 : vector<1x64xf32> to vector<16x64xf32>
    %48 = arith.addf %45, %47 : vector<16x64xf32>
    %49 = vector.extract_strided_slice %24 {offsets = [0, 192], sizes = [16, 64], strides = [1, 1]} : vector<16x256xf32> to vector<16x64xf32>
    %50 = vector.extract_strided_slice %26 {offsets = [0, 128], sizes = [16, 64], strides = [1, 1]} : vector<16x256xf32> to vector<16x64xf32>
    %51 = arith.addf %49, %50 : vector<16x64xf32>
    %c3 = arith.constant 3 : index
    %c0_16 = arith.constant 0 : index
    %52 = vector.load %arg6[%c3, %c0_16] : memref<4x64xf32, #tpu.memory_space<vmem>>, vector<1x64xf32>
    %53 = vector.broadcast %52 : vector<1x64xf32> to vector<16x64xf32>
    %54 = arith.addf %51, %53 : vector<16x64xf32>
    %55 = arith.mulf %34, %34 : vector<16x64xf32>
    %56 = arith.mulf %40, %40 : vector<16x64xf32>
    %57 = arith.addf %55, %56 : vector<16x64xf32>
    %58 = math.sqrt %57 : vector<16x64xf32>
    %59 = arith.negf %58 : vector<16x64xf32>
    %60 = math.exp %59 : vector<16x64xf32>
    %cst_17 = arith.constant 1.000000e+00 : f32
    %61 = vector.broadcast %cst_17 : f32 to vector<16x64xf32>
    %62 = arith.addf %61, %60 : vector<16x64xf32>
    %63 = arith.divf %61, %62 : vector<16x64xf32>
    %64 = arith.mulf %58, %63 : vector<16x64xf32>
    %65 = arith.mulf %64, %48 : vector<16x64xf32>
    %66 = arith.mulf %64, %54 : vector<16x64xf32>
    %c0_18 = arith.constant 0 : index
    %c0_19 = arith.constant 0 : index
    %67 = vector.load %arg7[%c0_18, %c0_19] : memref<64x64xbf16, #tpu.memory_space<vmem>>, vector<64x64xbf16>
    %68 = arith.truncf %65 : vector<16x64xf32> to vector<16x64xbf16>
    %cst_20 = arith.constant dense<0.000000e+00> : vector<16x64xf32>
    %69 = tpu.matmul %68, %67, %cst_20 {dimension_numbers = #tpu.dot_dimension_numbers<[1], [0], [0], [1], [0, 0, 1, 1], [], []>} : vector<16x64xbf16>, vector<64x64xbf16>, vector<16x64xf32> -> vector<16x64xf32>
    %70 = arith.truncf %66 : vector<16x64xf32> to vector<16x64xbf16>
    %cst_21 = arith.constant dense<0.000000e+00> : vector<16x64xf32>
    %71 = tpu.matmul %70, %67, %cst_21 {dimension_numbers = #tpu.dot_dimension_numbers<[1], [0], [0], [1], [0, 0, 1, 1], [], []>} : vector<16x64xbf16>, vector<64x64xbf16>, vector<16x64xf32> -> vector<16x64xf32>
    %72 = vector.extract_strided_slice %69 {offsets = [0, 0], sizes = [16, 32], strides = [1, 1]} : vector<16x64xf32> to vector<16x32xf32>
    %73 = vector.extract_strided_slice %71 {offsets = [0, 32], sizes = [16, 32], strides = [1, 1]} : vector<16x64xf32> to vector<16x32xf32>
    %74 = vector.broadcast %3 : f32 to vector<16x32xf32>
    %75 = arith.mulf %74, %73 : vector<16x32xf32>
    %76 = arith.addf %72, %75 : vector<16x32xf32>
    %c0_22 = arith.constant 0 : index
    %c0_23 = arith.constant 0 : index
    %77 = vector.load %arg8[%c0_22, %c0_23] : memref<2x32xf32, #tpu.memory_space<vmem>>, vector<1x32xf32>
    %78 = vector.broadcast %77 : vector<1x32xf32> to vector<16x32xf32>
    %79 = arith.addf %76, %78 : vector<16x32xf32>
    %80 = vector.extract_strided_slice %69 {offsets = [0, 32], sizes = [16, 32], strides = [1, 1]} : vector<16x64xf32> to vector<16x32xf32>
    %81 = vector.extract_strided_slice %71 {offsets = [0, 0], sizes = [16, 32], strides = [1, 1]} : vector<16x64xf32> to vector<16x32xf32>
    %82 = arith.addf %80, %81 : vector<16x32xf32>
    %c1_24 = arith.constant 1 : index
    %c0_25 = arith.constant 0 : index
    %83 = vector.load %arg8[%c1_24, %c0_25] : memref<2x32xf32, #tpu.memory_space<vmem>>, vector<1x32xf32>
    %84 = vector.broadcast %83 : vector<1x32xf32> to vector<16x32xf32>
    %85 = arith.addf %82, %84 : vector<16x32xf32>
    %86 = arith.addf %0, %79 : vector<16x32xf32>
    %c0_26 = arith.constant 0 : index
    %c0_27 = arith.constant 0 : index
    %87 = vector.load %arg9[%c0_26, %c0_27] : memref<16x32xf32, #tpu.memory_space<vmem>>, vector<16x32xf32>
    tpu.vector_store %arg9[%c0_26, %c0_27], %86 {strides = array<i32>} : memref<16x32xf32, #tpu.memory_space<vmem>>, vector<16x32xf32>,
    %88 = arith.addf %1, %85 : vector<16x32xf32>
    %c0_28 = arith.constant 0 : index
    %c0_29 = arith.constant 0 : index
    %89 = vector.load %arg10[%c0_28, %c0_29] : memref<16x32xf32, #tpu.memory_space<vmem>>, vector<16x32xf32>
    tpu.vector_store %arg10[%c0_28, %c0_29], %88 {strides = array<i32>} : memref<16x32xf32, #tpu.memory_space<vmem>>, vector<16x32xf32>,
    return
  }
  func.func @transform_0(%arg0: i32) -> i32 {
    %c0_i32 = arith.constant 0 : i32
    %c0_i32_0 = arith.constant 0 : i32
    return %c0_i32 : i32
  }
  func.func @transform_1(%arg0: i32) -> (i32, i32) {
    %c0_i32 = arith.constant 0 : i32
    %c0_i32_0 = arith.constant 0 : i32
    return %arg0, %c0_i32 : i32, i32
  }
  func.func @transform_2(%arg0: i32) -> (i32, i32) {
    %c0_i32 = arith.constant 0 : i32
    %c0_i32_0 = arith.constant 0 : i32
    return %arg0, %c0_i32 : i32, i32
  }
  func.func @transform_3(%arg0: i32) -> (i32, i32) {
    %c0_i32 = arith.constant 0 : i32
    %c0_i32_0 = arith.constant 0 : i32
    %c0_i32_1 = arith.constant 0 : i32
    return %c0_i32, %c0_i32_0 : i32, i32
  }
  func.func @transform_4(%arg0: i32) -> (i32, i32) {
    %c0_i32 = arith.constant 0 : i32
    %c0_i32_0 = arith.constant 0 : i32
    %c0_i32_1 = arith.constant 0 : i32
    return %c0_i32, %c0_i32_0 : i32, i32
  }
  func.func @transform_5(%arg0: i32) -> (i32, i32) {
    %c0_i32 = arith.constant 0 : i32
    %c0_i32_0 = arith.constant 0 : i32
    %c0_i32_1 = arith.constant 0 : i32
    return %c0_i32, %c0_i32_0 : i32, i32
  }
  func.func @transform_6(%arg0: i32) -> (i32, i32) {
    %c0_i32 = arith.constant 0 : i32
    %c0_i32_0 = arith.constant 0 : i32
    %c0_i32_1 = arith.constant 0 : i32
    return %c0_i32, %c0_i32_0 : i32, i32
  }
  func.func @transform_7(%arg0: i32) -> (i32, i32) {
    %c0_i32 = arith.constant 0 : i32
    %c0_i32_0 = arith.constant 0 : i32
    %c0_i32_1 = arith.constant 0 : i32
    return %c0_i32, %c0_i32_0 : i32, i32
  }
  func.func @transform_8(%arg0: i32) -> (i32, i32) {
    %c0_i32 = arith.constant 0 : i32
    %c0_i32_0 = arith.constant 0 : i32
    return %arg0, %c0_i32 : i32, i32
  }
  func.func @transform_9(%arg0: i32) -> (i32, i32) {
    %c0_i32 = arith.constant 0 : i32
    %c0_i32_0 = arith.constant 0 : i32
    return %arg0, %c0_i32 : i32, i32
  }
}

module attributes {stable_mosaic.version = 11 : i64} {
  func.func @_attn_block_kernel(%arg0: i32, %arg1: memref<1xf32, #tpu.memory_space<smem>>, %arg2: memref<4xf32, #tpu.memory_space<smem>>, %arg3: memref<2x8x32xf32, #tpu.memory_space<vmem>>, %arg4: memref<2x8x32xf32, #tpu.memory_space<vmem>>, %arg5: memref<1x32xf32, #tpu.memory_space<vmem>>, %arg6: memref<32x192xbf16, #tpu.memory_space<vmem>>, %arg7: memref<6x32xf32, #tpu.memory_space<vmem>>, %arg8: memref<32x64xbf16, #tpu.memory_space<vmem>>, %arg9: memref<2x32xf32, #tpu.memory_space<vmem>>, %arg10: memref<8x8xf32, #tpu.memory_space<vmem>>, %arg11: memref<8x8xf32, #tpu.memory_space<vmem>>, %arg12: memref<2x8x8xf32, #tpu.memory_space<vmem>>, %arg13: memref<2x8x32xf32, #tpu.memory_space<vmem>>, %arg14: memref<2x8x32xf32, #tpu.memory_space<vmem>>, %arg15: memref<16x32xf32, #tpu.memory_space<vmem>>, %arg16: memref<16x32xf32, #tpu.memory_space<vmem>>) attributes {dimension_semantics = [#tpu.dimension_semantics<parallel>], iteration_bounds = array<i64: 1>, scalar_prefetch = 0 : i64, scratch_operands = 2 : i64, tpu.core_type = #tpu.core_type<tc>, window_params = [{transform_indices = @transform_0, window_bounds = array<i64: 1>}, {transform_indices = @transform_1, window_bounds = array<i64: 4>}, {transform_indices = @transform_2, window_bounds = array<i64: 2, 8, 32>}, {transform_indices = @transform_3, window_bounds = array<i64: 2, 8, 32>}, {pipeline_mode = #tpu.pipeline_mode<synchronous>, transform_indices = @transform_4, window_bounds = array<i64: 1, 32>}, {pipeline_mode = #tpu.pipeline_mode<synchronous>, transform_indices = @transform_5, window_bounds = array<i64: 32, 192>}, {pipeline_mode = #tpu.pipeline_mode<synchronous>, transform_indices = @transform_6, window_bounds = array<i64: 6, 32>}, {pipeline_mode = #tpu.pipeline_mode<synchronous>, transform_indices = @transform_7, window_bounds = array<i64: 32, 64>}, {pipeline_mode = #tpu.pipeline_mode<synchronous>, transform_indices = @transform_8, window_bounds = array<i64: 2, 32>}, {pipeline_mode = #tpu.pipeline_mode<synchronous>, transform_indices = @transform_9, window_bounds = array<i64: 8, 8>}, {pipeline_mode = #tpu.pipeline_mode<synchronous>, transform_indices = @transform_10, window_bounds = array<i64: 8, 8>}, {transform_indices = @transform_11, window_bounds = array<i64: 2, 8, 8>}, {transform_indices = @transform_12, window_bounds = array<i64: 2, 8, 32>}, {transform_indices = @transform_13, window_bounds = array<i64: 2, 8, 32>}]} {
    %c0 = arith.constant 0 : index
    %c0_0 = arith.constant 0 : index
    %c0_1 = arith.constant 0 : index
    %0 = vector.load %arg3[%c0, %c0_0, %c0_1] : memref<2x8x32xf32, #tpu.memory_space<vmem>>, vector<2x8x32xf32>
    %1 = vector.shape_cast %0 : vector<2x8x32xf32> to vector<16x32xf32>
    %c0_2 = arith.constant 0 : index
    %c0_3 = arith.constant 0 : index
    %c0_4 = arith.constant 0 : index
    %2 = vector.load %arg4[%c0_2, %c0_3, %c0_4] : memref<2x8x32xf32, #tpu.memory_space<vmem>>, vector<2x8x32xf32>
    %3 = vector.shape_cast %2 : vector<2x8x32xf32> to vector<16x32xf32>
    %c0_5 = arith.constant 0 : index
    %c0_6 = arith.constant 0 : index
    %4 = vector.load %arg5[%c0_5, %c0_6] : memref<1x32xf32, #tpu.memory_space<vmem>>, vector<1x32xf32>
    %c0_7 = arith.constant 0 : index
    %5 = memref.load %arg1[%c0_7] : memref<1xf32, #tpu.memory_space<smem>>
    %6 = arith.mulf %1, %1 : vector<16x32xf32>
    %7 = arith.mulf %3, %3 : vector<16x32xf32>
    %8 = arith.addf %6, %7 : vector<16x32xf32>
    %cst = arith.constant dense<0.000000e+00> : vector<16xf32>
    %9 = vector.multi_reduction <add>, %8, %cst [1] : vector<16x32xf32> to vector<16xf32>
    %10 = vector.shape_cast %9 : vector<16xf32> to vector<16x1xf32>
    %cst_8 = arith.constant 3.200000e+01 : f32
    %11 = vector.broadcast %cst_8 : f32 to vector<16x1xf32>
    %12 = arith.divf %10, %11 : vector<16x1xf32>
    %cst_9 = arith.constant 9.99999997E-7 : f32
    %13 = vector.broadcast %cst_9 : f32 to vector<16x1xf32>
    %14 = arith.addf %12, %13 : vector<16x1xf32>
    %15 = math.rsqrt %14 : vector<16x1xf32>
    %16 = vector.broadcast %15 : vector<16x1xf32> to vector<16x32xf32>
    %17 = arith.mulf %1, %16 : vector<16x32xf32>
    %18 = vector.broadcast %4 : vector<1x32xf32> to vector<16x32xf32>
    %19 = arith.mulf %17, %18 : vector<16x32xf32>
    %20 = vector.broadcast %15 : vector<16x1xf32> to vector<16x32xf32>
    %21 = arith.mulf %3, %20 : vector<16x32xf32>
    %22 = vector.broadcast %4 : vector<1x32xf32> to vector<16x32xf32>
    %23 = arith.mulf %21, %22 : vector<16x32xf32>
    %c0_10 = arith.constant 0 : index
    %c0_11 = arith.constant 0 : index
    %24 = vector.load %arg6[%c0_10, %c0_11] : memref<32x192xbf16, #tpu.memory_space<vmem>>, vector<32x192xbf16>
    %25 = arith.truncf %19 : vector<16x32xf32> to vector<16x32xbf16>
    %cst_12 = arith.constant dense<0.000000e+00> : vector<16x192xf32>
    %26 = tpu.matmul %25, %24, %cst_12 {dimension_numbers = #tpu.dot_dimension_numbers<[1], [0], [0], [1], [0, 0, 1, 1], [], []>} : vector<16x32xbf16>, vector<32x192xbf16>, vector<16x192xf32> -> vector<16x192xf32>
    %27 = arith.truncf %23 : vector<16x32xf32> to vector<16x32xbf16>
    %cst_13 = arith.constant dense<0.000000e+00> : vector<16x192xf32>
    %28 = tpu.matmul %27, %24, %cst_13 {dimension_numbers = #tpu.dot_dimension_numbers<[1], [0], [0], [1], [0, 0, 1, 1], [], []>} : vector<16x32xbf16>, vector<32x192xbf16>, vector<16x192xf32> -> vector<16x192xf32>
    %c0_14 = arith.constant 0 : index
    %c0_15 = arith.constant 0 : index
    %29 = vector.load %arg7[%c0_14, %c0_15] : memref<6x32xf32, #tpu.memory_space<vmem>>, vector<1x32xf32>
    %c1 = arith.constant 1 : index
    %c0_16 = arith.constant 0 : index
    %30 = vector.load %arg7[%c1, %c0_16] : memref<6x32xf32, #tpu.memory_space<vmem>>, vector<1x32xf32>
    %31 = vector.extract_strided_slice %26 {offsets = [0, 0], sizes = [16, 32], strides = [1, 1]} : vector<16x192xf32> to vector<16x32xf32>
    %32 = vector.extract_strided_slice %28 {offsets = [0, 32], sizes = [16, 32], strides = [1, 1]} : vector<16x192xf32> to vector<16x32xf32>
    %33 = vector.broadcast %5 : f32 to vector<16x32xf32>
    %34 = arith.mulf %33, %32 : vector<16x32xf32>
    %35 = arith.addf %31, %34 : vector<16x32xf32>
    %36 = vector.broadcast %29 : vector<1x32xf32> to vector<16x32xf32>
    %37 = arith.addf %35, %36 : vector<16x32xf32>
    %38 = vector.extract_strided_slice %26 {offsets = [0, 32], sizes = [16, 32], strides = [1, 1]} : vector<16x192xf32> to vector<16x32xf32>
    %39 = vector.extract_strided_slice %28 {offsets = [0, 0], sizes = [16, 32], strides = [1, 1]} : vector<16x192xf32> to vector<16x32xf32>
    %40 = arith.addf %38, %39 : vector<16x32xf32>
    %41 = vector.broadcast %30 : vector<1x32xf32> to vector<16x32xf32>
    %42 = arith.addf %40, %41 : vector<16x32xf32>
    %c2 = arith.constant 2 : index
    %c0_17 = arith.constant 0 : index
    %43 = vector.load %arg7[%c2, %c0_17] : memref<6x32xf32, #tpu.memory_space<vmem>>, vector<1x32xf32>
    %c3 = arith.constant 3 : index
    %c0_18 = arith.constant 0 : index
    %44 = vector.load %arg7[%c3, %c0_18] : memref<6x32xf32, #tpu.memory_space<vmem>>, vector<1x32xf32>
    %45 = vector.extract_strided_slice %26 {offsets = [0, 64], sizes = [16, 32], strides = [1, 1]} : vector<16x192xf32> to vector<16x32xf32>
    %46 = vector.extract_strided_slice %28 {offsets = [0, 96], sizes = [16, 32], strides = [1, 1]} : vector<16x192xf32> to vector<16x32xf32>
    %47 = vector.broadcast %5 : f32 to vector<16x32xf32>
    %48 = arith.mulf %47, %46 : vector<16x32xf32>
    %49 = arith.addf %45, %48 : vector<16x32xf32>
    %50 = vector.broadcast %43 : vector<1x32xf32> to vector<16x32xf32>
    %51 = arith.addf %49, %50 : vector<16x32xf32>
    %52 = vector.extract_strided_slice %26 {offsets = [0, 96], sizes = [16, 32], strides = [1, 1]} : vector<16x192xf32> to vector<16x32xf32>
    %53 = vector.extract_strided_slice %28 {offsets = [0, 64], sizes = [16, 32], strides = [1, 1]} : vector<16x192xf32> to vector<16x32xf32>
    %54 = arith.addf %52, %53 : vector<16x32xf32>
    %55 = vector.broadcast %44 : vector<1x32xf32> to vector<16x32xf32>
    %56 = arith.addf %54, %55 : vector<16x32xf32>
    %c4 = arith.constant 4 : index
    %c0_19 = arith.constant 0 : index
    %57 = vector.load %arg7[%c4, %c0_19] : memref<6x32xf32, #tpu.memory_space<vmem>>, vector<1x32xf32>
    %c5 = arith.constant 5 : index
    %c0_20 = arith.constant 0 : index
    %58 = vector.load %arg7[%c5, %c0_20] : memref<6x32xf32, #tpu.memory_space<vmem>>, vector<1x32xf32>
    %59 = vector.extract_strided_slice %26 {offsets = [0, 128], sizes = [16, 32], strides = [1, 1]} : vector<16x192xf32> to vector<16x32xf32>
    %60 = vector.extract_strided_slice %28 {offsets = [0, 160], sizes = [16, 32], strides = [1, 1]} : vector<16x192xf32> to vector<16x32xf32>
    %61 = vector.broadcast %5 : f32 to vector<16x32xf32>
    %62 = arith.mulf %61, %60 : vector<16x32xf32>
    %63 = arith.addf %59, %62 : vector<16x32xf32>
    %64 = vector.broadcast %57 : vector<1x32xf32> to vector<16x32xf32>
    %65 = arith.addf %63, %64 : vector<16x32xf32>
    %66 = vector.extract_strided_slice %26 {offsets = [0, 160], sizes = [16, 32], strides = [1, 1]} : vector<16x192xf32> to vector<16x32xf32>
    %67 = vector.extract_strided_slice %28 {offsets = [0, 128], sizes = [16, 32], strides = [1, 1]} : vector<16x192xf32> to vector<16x32xf32>
    %68 = arith.addf %66, %67 : vector<16x32xf32>
    %69 = vector.broadcast %58 : vector<1x32xf32> to vector<16x32xf32>
    %70 = arith.addf %68, %69 : vector<16x32xf32>
    %c0_21 = arith.constant 0 : index
    %c0_22 = arith.constant 0 : index
    %71 = vector.load %arg10[%c0_21, %c0_22] : memref<8x8xf32, #tpu.memory_space<vmem>>, vector<8x8xf32>
    %c0_23 = arith.constant 0 : index
    %c0_24 = arith.constant 0 : index
    %72 = vector.load %arg11[%c0_23, %c0_24] : memref<8x8xf32, #tpu.memory_space<vmem>>, vector<8x8xf32>
    %c0_25 = arith.constant 0 : index
    %c0_26 = arith.constant 0 : index
    %c0_27 = arith.constant 0 : index
    %73 = vector.load %arg12[%c0_25, %c0_26, %c0_27] : memref<2x8x8xf32, #tpu.memory_space<vmem>>, vector<2x8x8xf32>
    %74 = vector.extract_strided_slice %37 {offsets = [0, 0], sizes = [16, 8], strides = [1, 1]} : vector<16x32xf32> to vector<16x8xf32>
    %75 = vector.shape_cast %74 : vector<16x8xf32> to vector<2x8x8xf32>
    %76 = vector.extract_strided_slice %75 {offsets = [0, 0, 4], sizes = [2, 8, 4], strides = [1, 1, 1]} : vector<2x8x8xf32> to vector<2x8x4xf32>
    %77 = vector.extract_strided_slice %75 {offsets = [0, 0, 0], sizes = [2, 8, 4], strides = [1, 1, 1]} : vector<2x8x8xf32> to vector<2x8x4xf32>
    %78 = tpu.concatenate %76, %77 in 2 : vector<2x8x4xf32>, vector<2x8x4xf32> -> vector<2x8x8xf32>
    %79 = vector.shape_cast %71 : vector<8x8xf32> to vector<1x8x8xf32>
    %80 = vector.broadcast %79 : vector<1x8x8xf32> to vector<2x8x8xf32>
    %81 = arith.mulf %75, %80 : vector<2x8x8xf32>
    %82 = vector.shape_cast %72 : vector<8x8xf32> to vector<1x8x8xf32>
    %83 = vector.broadcast %82 : vector<1x8x8xf32> to vector<2x8x8xf32>
    %84 = arith.mulf %78, %83 : vector<2x8x8xf32>
    %85 = arith.addf %81, %84 : vector<2x8x8xf32>
    %86 = vector.extract_strided_slice %42 {offsets = [0, 0], sizes = [16, 8], strides = [1, 1]} : vector<16x32xf32> to vector<16x8xf32>
    %87 = vector.shape_cast %86 : vector<16x8xf32> to vector<2x8x8xf32>
    %88 = vector.extract_strided_slice %87 {offsets = [0, 0, 4], sizes = [2, 8, 4], strides = [1, 1, 1]} : vector<2x8x8xf32> to vector<2x8x4xf32>
    %89 = vector.extract_strided_slice %87 {offsets = [0, 0, 0], sizes = [2, 8, 4], strides = [1, 1, 1]} : vector<2x8x8xf32> to vector<2x8x4xf32>
    %90 = tpu.concatenate %88, %89 in 2 : vector<2x8x4xf32>, vector<2x8x4xf32> -> vector<2x8x8xf32>
    %91 = vector.shape_cast %71 : vector<8x8xf32> to vector<1x8x8xf32>
    %92 = vector.broadcast %91 : vector<1x8x8xf32> to vector<2x8x8xf32>
    %93 = arith.mulf %87, %92 : vector<2x8x8xf32>
    %94 = vector.shape_cast %72 : vector<8x8xf32> to vector<1x8x8xf32>
    %95 = vector.broadcast %94 : vector<1x8x8xf32> to vector<2x8x8xf32>
    %96 = arith.mulf %90, %95 : vector<2x8x8xf32>
    %97 = arith.addf %93, %96 : vector<2x8x8xf32>
    %98 = vector.extract_strided_slice %51 {offsets = [0, 0], sizes = [16, 8], strides = [1, 1]} : vector<16x32xf32> to vector<16x8xf32>
    %99 = vector.shape_cast %98 : vector<16x8xf32> to vector<2x8x8xf32>
    %100 = vector.extract_strided_slice %99 {offsets = [0, 0, 4], sizes = [2, 8, 4], strides = [1, 1, 1]} : vector<2x8x8xf32> to vector<2x8x4xf32>
    %101 = vector.extract_strided_slice %99 {offsets = [0, 0, 0], sizes = [2, 8, 4], strides = [1, 1, 1]} : vector<2x8x8xf32> to vector<2x8x4xf32>
    %102 = tpu.concatenate %100, %101 in 2 : vector<2x8x4xf32>, vector<2x8x4xf32> -> vector<2x8x8xf32>
    %103 = vector.shape_cast %71 : vector<8x8xf32> to vector<1x8x8xf32>
    %104 = vector.broadcast %103 : vector<1x8x8xf32> to vector<2x8x8xf32>
    %105 = arith.mulf %99, %104 : vector<2x8x8xf32>
    %106 = vector.shape_cast %72 : vector<8x8xf32> to vector<1x8x8xf32>
    %107 = vector.broadcast %106 : vector<1x8x8xf32> to vector<2x8x8xf32>
    %108 = arith.mulf %102, %107 : vector<2x8x8xf32>
    %109 = arith.addf %105, %108 : vector<2x8x8xf32>
    %110 = vector.extract_strided_slice %56 {offsets = [0, 0], sizes = [16, 8], strides = [1, 1]} : vector<16x32xf32> to vector<16x8xf32>
    %111 = vector.shape_cast %110 : vector<16x8xf32> to vector<2x8x8xf32>
    %112 = vector.extract_strided_slice %111 {offsets = [0, 0, 4], sizes = [2, 8, 4], strides = [1, 1, 1]} : vector<2x8x8xf32> to vector<2x8x4xf32>
    %113 = vector.extract_strided_slice %111 {offsets = [0, 0, 0], sizes = [2, 8, 4], strides = [1, 1, 1]} : vector<2x8x8xf32> to vector<2x8x4xf32>
    %114 = tpu.concatenate %112, %113 in 2 : vector<2x8x4xf32>, vector<2x8x4xf32> -> vector<2x8x8xf32>
    %115 = vector.shape_cast %71 : vector<8x8xf32> to vector<1x8x8xf32>
    %116 = vector.broadcast %115 : vector<1x8x8xf32> to vector<2x8x8xf32>
    %117 = arith.mulf %111, %116 : vector<2x8x8xf32>
    %118 = vector.shape_cast %72 : vector<8x8xf32> to vector<1x8x8xf32>
    %119 = vector.broadcast %118 : vector<1x8x8xf32> to vector<2x8x8xf32>
    %120 = arith.mulf %114, %119 : vector<2x8x8xf32>
    %121 = arith.addf %117, %120 : vector<2x8x8xf32>
    %122 = vector.extract_strided_slice %65 {offsets = [0, 0], sizes = [16, 8], strides = [1, 1]} : vector<16x32xf32> to vector<16x8xf32>
    %123 = vector.shape_cast %122 : vector<16x8xf32> to vector<2x8x8xf32>
    %124 = vector.extract_strided_slice %70 {offsets = [0, 0], sizes = [16, 8], strides = [1, 1]} : vector<16x32xf32> to vector<16x8xf32>
    %125 = vector.shape_cast %124 : vector<16x8xf32> to vector<2x8x8xf32>
    %c0_28 = arith.constant 0 : index
    %126 = memref.load %arg2[%c0_28] : memref<4xf32, #tpu.memory_space<smem>>
    %127 = tpu.concatenate %85, %97 in 2 : vector<2x8x8xf32>, vector<2x8x8xf32> -> vector<2x8x16xf32>
    %128 = arith.truncf %127 : vector<2x8x16xf32> to vector<2x8x16xbf16>
    %129 = vector.broadcast %126 : f32 to vector<2x8x8xf32>
    %130 = arith.mulf %129, %121 : vector<2x8x8xf32>
    %131 = tpu.concatenate %109, %130 in 2 : vector<2x8x8xf32>, vector<2x8x8xf32> -> vector<2x8x16xf32>
    %132 = arith.truncf %131 : vector<2x8x16xf32> to vector<2x8x16xbf16>
    %133 = tpu.concatenate %121, %109 in 2 : vector<2x8x8xf32>, vector<2x8x8xf32> -> vector<2x8x16xf32>
    %134 = arith.truncf %133 : vector<2x8x16xf32> to vector<2x8x16xbf16>
    "tpu.trace_start"() <{level = 10 : i32, message = "bqd,bkd->bqk"}> : () -> ()
    %cst_29 = arith.constant dense<0.000000e+00> : vector<2x8x8xf32>
    %135 = tpu.matmul %128, %132, %cst_29 {dimension_numbers = #tpu.dot_dimension_numbers<[2], [2], [1], [1], [0, 0, 0, 1, 1, 1], [0], [0]>} : vector<2x8x16xbf16>, vector<2x8x16xbf16>, vector<2x8x8xf32> -> vector<2x8x8xf32>
    %cst_30 = arith.constant dense<0.000000e+00> : vector<2x8x8xf32>
    %136 = tpu.matmul %128, %134, %cst_30 {dimension_numbers = #tpu.dot_dimension_numbers<[2], [2], [1], [1], [0, 0, 0, 1, 1, 1], [0], [0]>} : vector<2x8x16xbf16>, vector<2x8x16xbf16>, vector<2x8x8xf32> -> vector<2x8x8xf32>
    "tpu.trace_stop"() : () -> ()
    %137 = arith.mulf %135, %135 : vector<2x8x8xf32>
    %138 = arith.mulf %136, %136 : vector<2x8x8xf32>
    %139 = arith.addf %137, %138 : vector<2x8x8xf32>
    %cst_31 = arith.constant 9.99999993E-9 : f32
    %140 = vector.broadcast %cst_31 : f32 to vector<2x8x8xf32>
    %141 = arith.addf %139, %140 : vector<2x8x8xf32>
    %142 = math.sqrt %141 : vector<2x8x8xf32>
    %cst_32 = arith.constant 0.353553385 : f32
    %143 = vector.broadcast %cst_32 : f32 to vector<2x8x8xf32>
    %144 = arith.mulf %142, %143 : vector<2x8x8xf32>
    %cst_33 = arith.constant 0.000000e+00 : f32
    %145 = vector.broadcast %cst_33 : f32 to vector<2x8x8xf32>
    %146 = arith.cmpf oeq, %73, %145 : vector<2x8x8xf32>
    %cst_34 = arith.constant -1.000000e+09 : f32
    %147 = vector.broadcast %cst_34 : f32 to vector<2x8x8xf32>
    %148 = arith.select %146, %147, %144 : vector<2x8x8xi1>, vector<2x8x8xf32>
    %cst_35 = arith.constant dense<0xFF800000> : vector<2x8xf32>
    %149 = vector.multi_reduction <maximumf>, %148, %cst_35 [2] : vector<2x8x8xf32> to vector<2x8xf32>
    %150 = vector.shape_cast %149 : vector<2x8xf32> to vector<2x8x1xf32>
    %151 = vector.broadcast %150 : vector<2x8x1xf32> to vector<2x8x8xf32>
    %152 = arith.subf %148, %151 : vector<2x8x8xf32>
    %153 = math.exp %152 : vector<2x8x8xf32>
    %cst_36 = arith.constant dense<0.000000e+00> : vector<2x8xf32>
    %154 = vector.multi_reduction <add>, %153, %cst_36 [2] : vector<2x8x8xf32> to vector<2x8xf32>
    %155 = vector.shape_cast %154 : vector<2x8xf32> to vector<2x8x1xf32>
    %156 = tpu.reciprocal %155 {approx = true} : vector<2x8x1xf32> -> vector<2x8x1xf32>
    %157 = vector.broadcast %156 : vector<2x8x1xf32> to vector<2x8x8xf32>
    %158 = arith.mulf %153, %157 : vector<2x8x8xf32>
    %159 = tpu.concatenate %123, %125 in 2 : vector<2x8x8xf32>, vector<2x8x8xf32> -> vector<2x8x16xf32>
    %160 = arith.truncf %159 : vector<2x8x16xf32> to vector<2x8x16xbf16>
    %161 = arith.truncf %158 : vector<2x8x8xf32> to vector<2x8x8xbf16>
    "tpu.trace_start"() <{level = 10 : i32, message = "bqk,bkd->bqd"}> : () -> ()
    %cst_37 = arith.constant dense<0.000000e+00> : vector<2x8x16xf32>
    %162 = tpu.matmul %161, %160, %cst_37 {dimension_numbers = #tpu.dot_dimension_numbers<[2], [1], [1], [2], [0, 0, 0, 1, 1, 2], [0], [0]>} : vector<2x8x8xbf16>, vector<2x8x16xbf16>, vector<2x8x16xf32> -> vector<2x8x16xf32>
    "tpu.trace_stop"() : () -> ()
    %163 = vector.shape_cast %162 : vector<2x8x16xf32> to vector<16x16xf32>
    %164 = vector.extract_strided_slice %163 {offsets = [0, 0], sizes = [16, 8], strides = [1, 1]} : vector<16x16xf32> to vector<16x8xf32>
    %c0_38 = arith.constant 0 : index
    %c0_39 = arith.constant 0 : index
    %165 = vector.load %arg15[%c0_38, %c0_39] : memref<16x32xf32, #tpu.memory_space<vmem>>, vector<16x8xf32>
    tpu.vector_store %arg15[%c0_38, %c0_39], %164 {strides = array<i32>} : memref<16x32xf32, #tpu.memory_space<vmem>>, vector<16x8xf32>,
    %166 = vector.extract_strided_slice %163 {offsets = [0, 8], sizes = [16, 8], strides = [1, 1]} : vector<16x16xf32> to vector<16x8xf32>
    %c0_40 = arith.constant 0 : index
    %c0_41 = arith.constant 0 : index
    %167 = vector.load %arg16[%c0_40, %c0_41] : memref<16x32xf32, #tpu.memory_space<vmem>>, vector<16x8xf32>
    tpu.vector_store %arg16[%c0_40, %c0_41], %166 {strides = array<i32>} : memref<16x32xf32, #tpu.memory_space<vmem>>, vector<16x8xf32>,
    %168 = vector.extract_strided_slice %37 {offsets = [0, 8], sizes = [16, 8], strides = [1, 1]} : vector<16x32xf32> to vector<16x8xf32>
    %169 = vector.shape_cast %168 : vector<16x8xf32> to vector<2x8x8xf32>
    %170 = vector.extract_strided_slice %169 {offsets = [0, 0, 4], sizes = [2, 8, 4], strides = [1, 1, 1]} : vector<2x8x8xf32> to vector<2x8x4xf32>
    %171 = vector.extract_strided_slice %169 {offsets = [0, 0, 0], sizes = [2, 8, 4], strides = [1, 1, 1]} : vector<2x8x8xf32> to vector<2x8x4xf32>
    %172 = tpu.concatenate %170, %171 in 2 : vector<2x8x4xf32>, vector<2x8x4xf32> -> vector<2x8x8xf32>
    %173 = vector.shape_cast %71 : vector<8x8xf32> to vector<1x8x8xf32>
    %174 = vector.broadcast %173 : vector<1x8x8xf32> to vector<2x8x8xf32>
    %175 = arith.mulf %169, %174 : vector<2x8x8xf32>
    %176 = vector.shape_cast %72 : vector<8x8xf32> to vector<1x8x8xf32>
    %177 = vector.broadcast %176 : vector<1x8x8xf32> to vector<2x8x8xf32>
    %178 = arith.mulf %172, %177 : vector<2x8x8xf32>
    %179 = arith.addf %175, %178 : vector<2x8x8xf32>
    %180 = vector.extract_strided_slice %42 {offsets = [0, 8], sizes = [16, 8], strides = [1, 1]} : vector<16x32xf32> to vector<16x8xf32>
    %181 = vector.shape_cast %180 : vector<16x8xf32> to vector<2x8x8xf32>
    %182 = vector.extract_strided_slice %181 {offsets = [0, 0, 4], sizes = [2, 8, 4], strides = [1, 1, 1]} : vector<2x8x8xf32> to vector<2x8x4xf32>
    %183 = vector.extract_strided_slice %181 {offsets = [0, 0, 0], sizes = [2, 8, 4], strides = [1, 1, 1]} : vector<2x8x8xf32> to vector<2x8x4xf32>
    %184 = tpu.concatenate %182, %183 in 2 : vector<2x8x4xf32>, vector<2x8x4xf32> -> vector<2x8x8xf32>
    %185 = vector.shape_cast %71 : vector<8x8xf32> to vector<1x8x8xf32>
    %186 = vector.broadcast %185 : vector<1x8x8xf32> to vector<2x8x8xf32>
    %187 = arith.mulf %181, %186 : vector<2x8x8xf32>
    %188 = vector.shape_cast %72 : vector<8x8xf32> to vector<1x8x8xf32>
    %189 = vector.broadcast %188 : vector<1x8x8xf32> to vector<2x8x8xf32>
    %190 = arith.mulf %184, %189 : vector<2x8x8xf32>
    %191 = arith.addf %187, %190 : vector<2x8x8xf32>
    %192 = vector.extract_strided_slice %51 {offsets = [0, 8], sizes = [16, 8], strides = [1, 1]} : vector<16x32xf32> to vector<16x8xf32>
    %193 = vector.shape_cast %192 : vector<16x8xf32> to vector<2x8x8xf32>
    %194 = vector.extract_strided_slice %193 {offsets = [0, 0, 4], sizes = [2, 8, 4], strides = [1, 1, 1]} : vector<2x8x8xf32> to vector<2x8x4xf32>
    %195 = vector.extract_strided_slice %193 {offsets = [0, 0, 0], sizes = [2, 8, 4], strides = [1, 1, 1]} : vector<2x8x8xf32> to vector<2x8x4xf32>
    %196 = tpu.concatenate %194, %195 in 2 : vector<2x8x4xf32>, vector<2x8x4xf32> -> vector<2x8x8xf32>
    %197 = vector.shape_cast %71 : vector<8x8xf32> to vector<1x8x8xf32>
    %198 = vector.broadcast %197 : vector<1x8x8xf32> to vector<2x8x8xf32>
    %199 = arith.mulf %193, %198 : vector<2x8x8xf32>
    %200 = vector.shape_cast %72 : vector<8x8xf32> to vector<1x8x8xf32>
    %201 = vector.broadcast %200 : vector<1x8x8xf32> to vector<2x8x8xf32>
    %202 = arith.mulf %196, %201 : vector<2x8x8xf32>
    %203 = arith.addf %199, %202 : vector<2x8x8xf32>
    %204 = vector.extract_strided_slice %56 {offsets = [0, 8], sizes = [16, 8], strides = [1, 1]} : vector<16x32xf32> to vector<16x8xf32>
    %205 = vector.shape_cast %204 : vector<16x8xf32> to vector<2x8x8xf32>
    %206 = vector.extract_strided_slice %205 {offsets = [0, 0, 4], sizes = [2, 8, 4], strides = [1, 1, 1]} : vector<2x8x8xf32> to vector<2x8x4xf32>
    %207 = vector.extract_strided_slice %205 {offsets = [0, 0, 0], sizes = [2, 8, 4], strides = [1, 1, 1]} : vector<2x8x8xf32> to vector<2x8x4xf32>
    %208 = tpu.concatenate %206, %207 in 2 : vector<2x8x4xf32>, vector<2x8x4xf32> -> vector<2x8x8xf32>
    %209 = vector.shape_cast %71 : vector<8x8xf32> to vector<1x8x8xf32>
    %210 = vector.broadcast %209 : vector<1x8x8xf32> to vector<2x8x8xf32>
    %211 = arith.mulf %205, %210 : vector<2x8x8xf32>
    %212 = vector.shape_cast %72 : vector<8x8xf32> to vector<1x8x8xf32>
    %213 = vector.broadcast %212 : vector<1x8x8xf32> to vector<2x8x8xf32>
    %214 = arith.mulf %208, %213 : vector<2x8x8xf32>
    %215 = arith.addf %211, %214 : vector<2x8x8xf32>
    %216 = vector.extract_strided_slice %65 {offsets = [0, 8], sizes = [16, 8], strides = [1, 1]} : vector<16x32xf32> to vector<16x8xf32>
    %217 = vector.shape_cast %216 : vector<16x8xf32> to vector<2x8x8xf32>
    %218 = vector.extract_strided_slice %70 {offsets = [0, 8], sizes = [16, 8], strides = [1, 1]} : vector<16x32xf32> to vector<16x8xf32>
    %219 = vector.shape_cast %218 : vector<16x8xf32> to vector<2x8x8xf32>
    %c1_42 = arith.constant 1 : index
    %220 = memref.load %arg2[%c1_42] : memref<4xf32, #tpu.memory_space<smem>>
    %221 = tpu.concatenate %179, %191 in 2 : vector<2x8x8xf32>, vector<2x8x8xf32> -> vector<2x8x16xf32>
    %222 = arith.truncf %221 : vector<2x8x16xf32> to vector<2x8x16xbf16>
    %223 = vector.broadcast %220 : f32 to vector<2x8x8xf32>
    %224 = arith.mulf %223, %215 : vector<2x8x8xf32>
    %225 = tpu.concatenate %203, %224 in 2 : vector<2x8x8xf32>, vector<2x8x8xf32> -> vector<2x8x16xf32>
    %226 = arith.truncf %225 : vector<2x8x16xf32> to vector<2x8x16xbf16>
    %227 = tpu.concatenate %215, %203 in 2 : vector<2x8x8xf32>, vector<2x8x8xf32> -> vector<2x8x16xf32>
    %228 = arith.truncf %227 : vector<2x8x16xf32> to vector<2x8x16xbf16>
    "tpu.trace_start"() <{level = 10 : i32, message = "bqd,bkd->bqk"}> : () -> ()
    %cst_43 = arith.constant dense<0.000000e+00> : vector<2x8x8xf32>
    %229 = tpu.matmul %222, %226, %cst_43 {dimension_numbers = #tpu.dot_dimension_numbers<[2], [2], [1], [1], [0, 0, 0, 1, 1, 1], [0], [0]>} : vector<2x8x16xbf16>, vector<2x8x16xbf16>, vector<2x8x8xf32> -> vector<2x8x8xf32>
    %cst_44 = arith.constant dense<0.000000e+00> : vector<2x8x8xf32>
    %230 = tpu.matmul %222, %228, %cst_44 {dimension_numbers = #tpu.dot_dimension_numbers<[2], [2], [1], [1], [0, 0, 0, 1, 1, 1], [0], [0]>} : vector<2x8x16xbf16>, vector<2x8x16xbf16>, vector<2x8x8xf32> -> vector<2x8x8xf32>
    "tpu.trace_stop"() : () -> ()
    %231 = arith.mulf %229, %229 : vector<2x8x8xf32>
    %232 = arith.mulf %230, %230 : vector<2x8x8xf32>
    %233 = arith.addf %231, %232 : vector<2x8x8xf32>
    %cst_45 = arith.constant 9.99999993E-9 : f32
    %234 = vector.broadcast %cst_45 : f32 to vector<2x8x8xf32>
    %235 = arith.addf %233, %234 : vector<2x8x8xf32>
    %236 = math.sqrt %235 : vector<2x8x8xf32>
    %cst_46 = arith.constant 0.353553385 : f32
    %237 = vector.broadcast %cst_46 : f32 to vector<2x8x8xf32>
    %238 = arith.mulf %236, %237 : vector<2x8x8xf32>
    %cst_47 = arith.constant 0.000000e+00 : f32
    %239 = vector.broadcast %cst_47 : f32 to vector<2x8x8xf32>
    %240 = arith.cmpf oeq, %73, %239 : vector<2x8x8xf32>
    %cst_48 = arith.constant -1.000000e+09 : f32
    %241 = vector.broadcast %cst_48 : f32 to vector<2x8x8xf32>
    %242 = arith.select %240, %241, %238 : vector<2x8x8xi1>, vector<2x8x8xf32>
    %cst_49 = arith.constant dense<0xFF800000> : vector<2x8xf32>
    %243 = vector.multi_reduction <maximumf>, %242, %cst_49 [2] : vector<2x8x8xf32> to vector<2x8xf32>
    %244 = vector.shape_cast %243 : vector<2x8xf32> to vector<2x8x1xf32>
    %245 = vector.broadcast %244 : vector<2x8x1xf32> to vector<2x8x8xf32>
    %246 = arith.subf %242, %245 : vector<2x8x8xf32>
    %247 = math.exp %246 : vector<2x8x8xf32>
    %cst_50 = arith.constant dense<0.000000e+00> : vector<2x8xf32>
    %248 = vector.multi_reduction <add>, %247, %cst_50 [2] : vector<2x8x8xf32> to vector<2x8xf32>
    %249 = vector.shape_cast %248 : vector<2x8xf32> to vector<2x8x1xf32>
    %250 = tpu.reciprocal %249 {approx = true} : vector<2x8x1xf32> -> vector<2x8x1xf32>
    %251 = vector.broadcast %250 : vector<2x8x1xf32> to vector<2x8x8xf32>
    %252 = arith.mulf %247, %251 : vector<2x8x8xf32>
    %253 = tpu.concatenate %217, %219 in 2 : vector<2x8x8xf32>, vector<2x8x8xf32> -> vector<2x8x16xf32>
    %254 = arith.truncf %253 : vector<2x8x16xf32> to vector<2x8x16xbf16>
    %255 = arith.truncf %252 : vector<2x8x8xf32> to vector<2x8x8xbf16>
    "tpu.trace_start"() <{level = 10 : i32, message = "bqk,bkd->bqd"}> : () -> ()
    %cst_51 = arith.constant dense<0.000000e+00> : vector<2x8x16xf32>
    %256 = tpu.matmul %255, %254, %cst_51 {dimension_numbers = #tpu.dot_dimension_numbers<[2], [1], [1], [2], [0, 0, 0, 1, 1, 2], [0], [0]>} : vector<2x8x8xbf16>, vector<2x8x16xbf16>, vector<2x8x16xf32> -> vector<2x8x16xf32>
    "tpu.trace_stop"() : () -> ()
    %257 = vector.shape_cast %256 : vector<2x8x16xf32> to vector<16x16xf32>
    %258 = vector.extract_strided_slice %257 {offsets = [0, 0], sizes = [16, 8], strides = [1, 1]} : vector<16x16xf32> to vector<16x8xf32>
    %c0_52 = arith.constant 0 : index
    %c8 = arith.constant 8 : index
    %259 = vector.load %arg15[%c0_52, %c8] : memref<16x32xf32, #tpu.memory_space<vmem>>, vector<16x8xf32>
    tpu.vector_store %arg15[%c0_52, %c8], %258 {strides = array<i32>} : memref<16x32xf32, #tpu.memory_space<vmem>>, vector<16x8xf32>,
    %260 = vector.extract_strided_slice %257 {offsets = [0, 8], sizes = [16, 8], strides = [1, 1]} : vector<16x16xf32> to vector<16x8xf32>
    %c0_53 = arith.constant 0 : index
    %c8_54 = arith.constant 8 : index
    %261 = vector.load %arg16[%c0_53, %c8_54] : memref<16x32xf32, #tpu.memory_space<vmem>>, vector<16x8xf32>
    tpu.vector_store %arg16[%c0_53, %c8_54], %260 {strides = array<i32>} : memref<16x32xf32, #tpu.memory_space<vmem>>, vector<16x8xf32>,
    %262 = vector.extract_strided_slice %37 {offsets = [0, 16], sizes = [16, 8], strides = [1, 1]} : vector<16x32xf32> to vector<16x8xf32>
    %263 = vector.shape_cast %262 : vector<16x8xf32> to vector<2x8x8xf32>
    %264 = vector.extract_strided_slice %263 {offsets = [0, 0, 4], sizes = [2, 8, 4], strides = [1, 1, 1]} : vector<2x8x8xf32> to vector<2x8x4xf32>
    %265 = vector.extract_strided_slice %263 {offsets = [0, 0, 0], sizes = [2, 8, 4], strides = [1, 1, 1]} : vector<2x8x8xf32> to vector<2x8x4xf32>
    %266 = tpu.concatenate %264, %265 in 2 : vector<2x8x4xf32>, vector<2x8x4xf32> -> vector<2x8x8xf32>
    %267 = vector.shape_cast %71 : vector<8x8xf32> to vector<1x8x8xf32>
    %268 = vector.broadcast %267 : vector<1x8x8xf32> to vector<2x8x8xf32>
    %269 = arith.mulf %263, %268 : vector<2x8x8xf32>
    %270 = vector.shape_cast %72 : vector<8x8xf32> to vector<1x8x8xf32>
    %271 = vector.broadcast %270 : vector<1x8x8xf32> to vector<2x8x8xf32>
    %272 = arith.mulf %266, %271 : vector<2x8x8xf32>
    %273 = arith.addf %269, %272 : vector<2x8x8xf32>
    %274 = vector.extract_strided_slice %42 {offsets = [0, 16], sizes = [16, 8], strides = [1, 1]} : vector<16x32xf32> to vector<16x8xf32>
    %275 = vector.shape_cast %274 : vector<16x8xf32> to vector<2x8x8xf32>
    %276 = vector.extract_strided_slice %275 {offsets = [0, 0, 4], sizes = [2, 8, 4], strides = [1, 1, 1]} : vector<2x8x8xf32> to vector<2x8x4xf32>
    %277 = vector.extract_strided_slice %275 {offsets = [0, 0, 0], sizes = [2, 8, 4], strides = [1, 1, 1]} : vector<2x8x8xf32> to vector<2x8x4xf32>
    %278 = tpu.concatenate %276, %277 in 2 : vector<2x8x4xf32>, vector<2x8x4xf32> -> vector<2x8x8xf32>
    %279 = vector.shape_cast %71 : vector<8x8xf32> to vector<1x8x8xf32>
    %280 = vector.broadcast %279 : vector<1x8x8xf32> to vector<2x8x8xf32>
    %281 = arith.mulf %275, %280 : vector<2x8x8xf32>
    %282 = vector.shape_cast %72 : vector<8x8xf32> to vector<1x8x8xf32>
    %283 = vector.broadcast %282 : vector<1x8x8xf32> to vector<2x8x8xf32>
    %284 = arith.mulf %278, %283 : vector<2x8x8xf32>
    %285 = arith.addf %281, %284 : vector<2x8x8xf32>
    %286 = vector.extract_strided_slice %51 {offsets = [0, 16], sizes = [16, 8], strides = [1, 1]} : vector<16x32xf32> to vector<16x8xf32>
    %287 = vector.shape_cast %286 : vector<16x8xf32> to vector<2x8x8xf32>
    %288 = vector.extract_strided_slice %287 {offsets = [0, 0, 4], sizes = [2, 8, 4], strides = [1, 1, 1]} : vector<2x8x8xf32> to vector<2x8x4xf32>
    %289 = vector.extract_strided_slice %287 {offsets = [0, 0, 0], sizes = [2, 8, 4], strides = [1, 1, 1]} : vector<2x8x8xf32> to vector<2x8x4xf32>
    %290 = tpu.concatenate %288, %289 in 2 : vector<2x8x4xf32>, vector<2x8x4xf32> -> vector<2x8x8xf32>
    %291 = vector.shape_cast %71 : vector<8x8xf32> to vector<1x8x8xf32>
    %292 = vector.broadcast %291 : vector<1x8x8xf32> to vector<2x8x8xf32>
    %293 = arith.mulf %287, %292 : vector<2x8x8xf32>
    %294 = vector.shape_cast %72 : vector<8x8xf32> to vector<1x8x8xf32>
    %295 = vector.broadcast %294 : vector<1x8x8xf32> to vector<2x8x8xf32>
    %296 = arith.mulf %290, %295 : vector<2x8x8xf32>
    %297 = arith.addf %293, %296 : vector<2x8x8xf32>
    %298 = vector.extract_strided_slice %56 {offsets = [0, 16], sizes = [16, 8], strides = [1, 1]} : vector<16x32xf32> to vector<16x8xf32>
    %299 = vector.shape_cast %298 : vector<16x8xf32> to vector<2x8x8xf32>
    %300 = vector.extract_strided_slice %299 {offsets = [0, 0, 4], sizes = [2, 8, 4], strides = [1, 1, 1]} : vector<2x8x8xf32> to vector<2x8x4xf32>
    %301 = vector.extract_strided_slice %299 {offsets = [0, 0, 0], sizes = [2, 8, 4], strides = [1, 1, 1]} : vector<2x8x8xf32> to vector<2x8x4xf32>
    %302 = tpu.concatenate %300, %301 in 2 : vector<2x8x4xf32>, vector<2x8x4xf32> -> vector<2x8x8xf32>
    %303 = vector.shape_cast %71 : vector<8x8xf32> to vector<1x8x8xf32>
    %304 = vector.broadcast %303 : vector<1x8x8xf32> to vector<2x8x8xf32>
    %305 = arith.mulf %299, %304 : vector<2x8x8xf32>
    %306 = vector.shape_cast %72 : vector<8x8xf32> to vector<1x8x8xf32>
    %307 = vector.broadcast %306 : vector<1x8x8xf32> to vector<2x8x8xf32>
    %308 = arith.mulf %302, %307 : vector<2x8x8xf32>
    %309 = arith.addf %305, %308 : vector<2x8x8xf32>
    %310 = vector.extract_strided_slice %65 {offsets = [0, 16], sizes = [16, 8], strides = [1, 1]} : vector<16x32xf32> to vector<16x8xf32>
    %311 = vector.shape_cast %310 : vector<16x8xf32> to vector<2x8x8xf32>
    %312 = vector.extract_strided_slice %70 {offsets = [0, 16], sizes = [16, 8], strides = [1, 1]} : vector<16x32xf32> to vector<16x8xf32>
    %313 = vector.shape_cast %312 : vector<16x8xf32> to vector<2x8x8xf32>
    %c2_55 = arith.constant 2 : index
    %314 = memref.load %arg2[%c2_55] : memref<4xf32, #tpu.memory_space<smem>>
    %315 = tpu.concatenate %273, %285 in 2 : vector<2x8x8xf32>, vector<2x8x8xf32> -> vector<2x8x16xf32>
    %316 = arith.truncf %315 : vector<2x8x16xf32> to vector<2x8x16xbf16>
    %317 = vector.broadcast %314 : f32 to vector<2x8x8xf32>
    %318 = arith.mulf %317, %309 : vector<2x8x8xf32>
    %319 = tpu.concatenate %297, %318 in 2 : vector<2x8x8xf32>, vector<2x8x8xf32> -> vector<2x8x16xf32>
    %320 = arith.truncf %319 : vector<2x8x16xf32> to vector<2x8x16xbf16>
    %321 = tpu.concatenate %309, %297 in 2 : vector<2x8x8xf32>, vector<2x8x8xf32> -> vector<2x8x16xf32>
    %322 = arith.truncf %321 : vector<2x8x16xf32> to vector<2x8x16xbf16>
    "tpu.trace_start"() <{level = 10 : i32, message = "bqd,bkd->bqk"}> : () -> ()
    %cst_56 = arith.constant dense<0.000000e+00> : vector<2x8x8xf32>
    %323 = tpu.matmul %316, %320, %cst_56 {dimension_numbers = #tpu.dot_dimension_numbers<[2], [2], [1], [1], [0, 0, 0, 1, 1, 1], [0], [0]>} : vector<2x8x16xbf16>, vector<2x8x16xbf16>, vector<2x8x8xf32> -> vector<2x8x8xf32>
    %cst_57 = arith.constant dense<0.000000e+00> : vector<2x8x8xf32>
    %324 = tpu.matmul %316, %322, %cst_57 {dimension_numbers = #tpu.dot_dimension_numbers<[2], [2], [1], [1], [0, 0, 0, 1, 1, 1], [0], [0]>} : vector<2x8x16xbf16>, vector<2x8x16xbf16>, vector<2x8x8xf32> -> vector<2x8x8xf32>
    "tpu.trace_stop"() : () -> ()
    %325 = arith.mulf %323, %323 : vector<2x8x8xf32>
    %326 = arith.mulf %324, %324 : vector<2x8x8xf32>
    %327 = arith.addf %325, %326 : vector<2x8x8xf32>
    %cst_58 = arith.constant 9.99999993E-9 : f32
    %328 = vector.broadcast %cst_58 : f32 to vector<2x8x8xf32>
    %329 = arith.addf %327, %328 : vector<2x8x8xf32>
    %330 = math.sqrt %329 : vector<2x8x8xf32>
    %cst_59 = arith.constant 0.353553385 : f32
    %331 = vector.broadcast %cst_59 : f32 to vector<2x8x8xf32>
    %332 = arith.mulf %330, %331 : vector<2x8x8xf32>
    %cst_60 = arith.constant 0.000000e+00 : f32
    %333 = vector.broadcast %cst_60 : f32 to vector<2x8x8xf32>
    %334 = arith.cmpf oeq, %73, %333 : vector<2x8x8xf32>
    %cst_61 = arith.constant -1.000000e+09 : f32
    %335 = vector.broadcast %cst_61 : f32 to vector<2x8x8xf32>
    %336 = arith.select %334, %335, %332 : vector<2x8x8xi1>, vector<2x8x8xf32>
    %cst_62 = arith.constant dense<0xFF800000> : vector<2x8xf32>
    %337 = vector.multi_reduction <maximumf>, %336, %cst_62 [2] : vector<2x8x8xf32> to vector<2x8xf32>
    %338 = vector.shape_cast %337 : vector<2x8xf32> to vector<2x8x1xf32>
    %339 = vector.broadcast %338 : vector<2x8x1xf32> to vector<2x8x8xf32>
    %340 = arith.subf %336, %339 : vector<2x8x8xf32>
    %341 = math.exp %340 : vector<2x8x8xf32>
    %cst_63 = arith.constant dense<0.000000e+00> : vector<2x8xf32>
    %342 = vector.multi_reduction <add>, %341, %cst_63 [2] : vector<2x8x8xf32> to vector<2x8xf32>
    %343 = vector.shape_cast %342 : vector<2x8xf32> to vector<2x8x1xf32>
    %344 = tpu.reciprocal %343 {approx = true} : vector<2x8x1xf32> -> vector<2x8x1xf32>
    %345 = vector.broadcast %344 : vector<2x8x1xf32> to vector<2x8x8xf32>
    %346 = arith.mulf %341, %345 : vector<2x8x8xf32>
    %347 = tpu.concatenate %311, %313 in 2 : vector<2x8x8xf32>, vector<2x8x8xf32> -> vector<2x8x16xf32>
    %348 = arith.truncf %347 : vector<2x8x16xf32> to vector<2x8x16xbf16>
    %349 = arith.truncf %346 : vector<2x8x8xf32> to vector<2x8x8xbf16>
    "tpu.trace_start"() <{level = 10 : i32, message = "bqk,bkd->bqd"}> : () -> ()
    %cst_64 = arith.constant dense<0.000000e+00> : vector<2x8x16xf32>
    %350 = tpu.matmul %349, %348, %cst_64 {dimension_numbers = #tpu.dot_dimension_numbers<[2], [1], [1], [2], [0, 0, 0, 1, 1, 2], [0], [0]>} : vector<2x8x8xbf16>, vector<2x8x16xbf16>, vector<2x8x16xf32> -> vector<2x8x16xf32>
    "tpu.trace_stop"() : () -> ()
    %351 = vector.shape_cast %350 : vector<2x8x16xf32> to vector<16x16xf32>
    %352 = vector.extract_strided_slice %351 {offsets = [0, 0], sizes = [16, 8], strides = [1, 1]} : vector<16x16xf32> to vector<16x8xf32>
    %c0_65 = arith.constant 0 : index
    %c16 = arith.constant 16 : index
    %353 = vector.load %arg15[%c0_65, %c16] : memref<16x32xf32, #tpu.memory_space<vmem>>, vector<16x8xf32>
    tpu.vector_store %arg15[%c0_65, %c16], %352 {strides = array<i32>} : memref<16x32xf32, #tpu.memory_space<vmem>>, vector<16x8xf32>,
    %354 = vector.extract_strided_slice %351 {offsets = [0, 8], sizes = [16, 8], strides = [1, 1]} : vector<16x16xf32> to vector<16x8xf32>
    %c0_66 = arith.constant 0 : index
    %c16_67 = arith.constant 16 : index
    %355 = vector.load %arg16[%c0_66, %c16_67] : memref<16x32xf32, #tpu.memory_space<vmem>>, vector<16x8xf32>
    tpu.vector_store %arg16[%c0_66, %c16_67], %354 {strides = array<i32>} : memref<16x32xf32, #tpu.memory_space<vmem>>, vector<16x8xf32>,
    %356 = vector.extract_strided_slice %37 {offsets = [0, 24], sizes = [16, 8], strides = [1, 1]} : vector<16x32xf32> to vector<16x8xf32>
    %357 = vector.shape_cast %356 : vector<16x8xf32> to vector<2x8x8xf32>
    %358 = vector.extract_strided_slice %357 {offsets = [0, 0, 4], sizes = [2, 8, 4], strides = [1, 1, 1]} : vector<2x8x8xf32> to vector<2x8x4xf32>
    %359 = vector.extract_strided_slice %357 {offsets = [0, 0, 0], sizes = [2, 8, 4], strides = [1, 1, 1]} : vector<2x8x8xf32> to vector<2x8x4xf32>
    %360 = tpu.concatenate %358, %359 in 2 : vector<2x8x4xf32>, vector<2x8x4xf32> -> vector<2x8x8xf32>
    %361 = vector.shape_cast %71 : vector<8x8xf32> to vector<1x8x8xf32>
    %362 = vector.broadcast %361 : vector<1x8x8xf32> to vector<2x8x8xf32>
    %363 = arith.mulf %357, %362 : vector<2x8x8xf32>
    %364 = vector.shape_cast %72 : vector<8x8xf32> to vector<1x8x8xf32>
    %365 = vector.broadcast %364 : vector<1x8x8xf32> to vector<2x8x8xf32>
    %366 = arith.mulf %360, %365 : vector<2x8x8xf32>
    %367 = arith.addf %363, %366 : vector<2x8x8xf32>
    %368 = vector.extract_strided_slice %42 {offsets = [0, 24], sizes = [16, 8], strides = [1, 1]} : vector<16x32xf32> to vector<16x8xf32>
    %369 = vector.shape_cast %368 : vector<16x8xf32> to vector<2x8x8xf32>
    %370 = vector.extract_strided_slice %369 {offsets = [0, 0, 4], sizes = [2, 8, 4], strides = [1, 1, 1]} : vector<2x8x8xf32> to vector<2x8x4xf32>
    %371 = vector.extract_strided_slice %369 {offsets = [0, 0, 0], sizes = [2, 8, 4], strides = [1, 1, 1]} : vector<2x8x8xf32> to vector<2x8x4xf32>
    %372 = tpu.concatenate %370, %371 in 2 : vector<2x8x4xf32>, vector<2x8x4xf32> -> vector<2x8x8xf32>
    %373 = vector.shape_cast %71 : vector<8x8xf32> to vector<1x8x8xf32>
    %374 = vector.broadcast %373 : vector<1x8x8xf32> to vector<2x8x8xf32>
    %375 = arith.mulf %369, %374 : vector<2x8x8xf32>
    %376 = vector.shape_cast %72 : vector<8x8xf32> to vector<1x8x8xf32>
    %377 = vector.broadcast %376 : vector<1x8x8xf32> to vector<2x8x8xf32>
    %378 = arith.mulf %372, %377 : vector<2x8x8xf32>
    %379 = arith.addf %375, %378 : vector<2x8x8xf32>
    %380 = vector.extract_strided_slice %51 {offsets = [0, 24], sizes = [16, 8], strides = [1, 1]} : vector<16x32xf32> to vector<16x8xf32>
    %381 = vector.shape_cast %380 : vector<16x8xf32> to vector<2x8x8xf32>
    %382 = vector.extract_strided_slice %381 {offsets = [0, 0, 4], sizes = [2, 8, 4], strides = [1, 1, 1]} : vector<2x8x8xf32> to vector<2x8x4xf32>
    %383 = vector.extract_strided_slice %381 {offsets = [0, 0, 0], sizes = [2, 8, 4], strides = [1, 1, 1]} : vector<2x8x8xf32> to vector<2x8x4xf32>
    %384 = tpu.concatenate %382, %383 in 2 : vector<2x8x4xf32>, vector<2x8x4xf32> -> vector<2x8x8xf32>
    %385 = vector.shape_cast %71 : vector<8x8xf32> to vector<1x8x8xf32>
    %386 = vector.broadcast %385 : vector<1x8x8xf32> to vector<2x8x8xf32>
    %387 = arith.mulf %381, %386 : vector<2x8x8xf32>
    %388 = vector.shape_cast %72 : vector<8x8xf32> to vector<1x8x8xf32>
    %389 = vector.broadcast %388 : vector<1x8x8xf32> to vector<2x8x8xf32>
    %390 = arith.mulf %384, %389 : vector<2x8x8xf32>
    %391 = arith.addf %387, %390 : vector<2x8x8xf32>
    %392 = vector.extract_strided_slice %56 {offsets = [0, 24], sizes = [16, 8], strides = [1, 1]} : vector<16x32xf32> to vector<16x8xf32>
    %393 = vector.shape_cast %392 : vector<16x8xf32> to vector<2x8x8xf32>
    %394 = vector.extract_strided_slice %393 {offsets = [0, 0, 4], sizes = [2, 8, 4], strides = [1, 1, 1]} : vector<2x8x8xf32> to vector<2x8x4xf32>
    %395 = vector.extract_strided_slice %393 {offsets = [0, 0, 0], sizes = [2, 8, 4], strides = [1, 1, 1]} : vector<2x8x8xf32> to vector<2x8x4xf32>
    %396 = tpu.concatenate %394, %395 in 2 : vector<2x8x4xf32>, vector<2x8x4xf32> -> vector<2x8x8xf32>
    %397 = vector.shape_cast %71 : vector<8x8xf32> to vector<1x8x8xf32>
    %398 = vector.broadcast %397 : vector<1x8x8xf32> to vector<2x8x8xf32>
    %399 = arith.mulf %393, %398 : vector<2x8x8xf32>
    %400 = vector.shape_cast %72 : vector<8x8xf32> to vector<1x8x8xf32>
    %401 = vector.broadcast %400 : vector<1x8x8xf32> to vector<2x8x8xf32>
    %402 = arith.mulf %396, %401 : vector<2x8x8xf32>
    %403 = arith.addf %399, %402 : vector<2x8x8xf32>
    %404 = vector.extract_strided_slice %65 {offsets = [0, 24], sizes = [16, 8], strides = [1, 1]} : vector<16x32xf32> to vector<16x8xf32>
    %405 = vector.shape_cast %404 : vector<16x8xf32> to vector<2x8x8xf32>
    %406 = vector.extract_strided_slice %70 {offsets = [0, 24], sizes = [16, 8], strides = [1, 1]} : vector<16x32xf32> to vector<16x8xf32>
    %407 = vector.shape_cast %406 : vector<16x8xf32> to vector<2x8x8xf32>
    %c3_68 = arith.constant 3 : index
    %408 = memref.load %arg2[%c3_68] : memref<4xf32, #tpu.memory_space<smem>>
    %409 = tpu.concatenate %367, %379 in 2 : vector<2x8x8xf32>, vector<2x8x8xf32> -> vector<2x8x16xf32>
    %410 = arith.truncf %409 : vector<2x8x16xf32> to vector<2x8x16xbf16>
    %411 = vector.broadcast %408 : f32 to vector<2x8x8xf32>
    %412 = arith.mulf %411, %403 : vector<2x8x8xf32>
    %413 = tpu.concatenate %391, %412 in 2 : vector<2x8x8xf32>, vector<2x8x8xf32> -> vector<2x8x16xf32>
    %414 = arith.truncf %413 : vector<2x8x16xf32> to vector<2x8x16xbf16>
    %415 = tpu.concatenate %403, %391 in 2 : vector<2x8x8xf32>, vector<2x8x8xf32> -> vector<2x8x16xf32>
    %416 = arith.truncf %415 : vector<2x8x16xf32> to vector<2x8x16xbf16>
    "tpu.trace_start"() <{level = 10 : i32, message = "bqd,bkd->bqk"}> : () -> ()
    %cst_69 = arith.constant dense<0.000000e+00> : vector<2x8x8xf32>
    %417 = tpu.matmul %410, %414, %cst_69 {dimension_numbers = #tpu.dot_dimension_numbers<[2], [2], [1], [1], [0, 0, 0, 1, 1, 1], [0], [0]>} : vector<2x8x16xbf16>, vector<2x8x16xbf16>, vector<2x8x8xf32> -> vector<2x8x8xf32>
    %cst_70 = arith.constant dense<0.000000e+00> : vector<2x8x8xf32>
    %418 = tpu.matmul %410, %416, %cst_70 {dimension_numbers = #tpu.dot_dimension_numbers<[2], [2], [1], [1], [0, 0, 0, 1, 1, 1], [0], [0]>} : vector<2x8x16xbf16>, vector<2x8x16xbf16>, vector<2x8x8xf32> -> vector<2x8x8xf32>
    "tpu.trace_stop"() : () -> ()
    %419 = arith.mulf %417, %417 : vector<2x8x8xf32>
    %420 = arith.mulf %418, %418 : vector<2x8x8xf32>
    %421 = arith.addf %419, %420 : vector<2x8x8xf32>
    %cst_71 = arith.constant 9.99999993E-9 : f32
    %422 = vector.broadcast %cst_71 : f32 to vector<2x8x8xf32>
    %423 = arith.addf %421, %422 : vector<2x8x8xf32>
    %424 = math.sqrt %423 : vector<2x8x8xf32>
    %cst_72 = arith.constant 0.353553385 : f32
    %425 = vector.broadcast %cst_72 : f32 to vector<2x8x8xf32>
    %426 = arith.mulf %424, %425 : vector<2x8x8xf32>
    %cst_73 = arith.constant 0.000000e+00 : f32
    %427 = vector.broadcast %cst_73 : f32 to vector<2x8x8xf32>
    %428 = arith.cmpf oeq, %73, %427 : vector<2x8x8xf32>
    %cst_74 = arith.constant -1.000000e+09 : f32
    %429 = vector.broadcast %cst_74 : f32 to vector<2x8x8xf32>
    %430 = arith.select %428, %429, %426 : vector<2x8x8xi1>, vector<2x8x8xf32>
    %cst_75 = arith.constant dense<0xFF800000> : vector<2x8xf32>
    %431 = vector.multi_reduction <maximumf>, %430, %cst_75 [2] : vector<2x8x8xf32> to vector<2x8xf32>
    %432 = vector.shape_cast %431 : vector<2x8xf32> to vector<2x8x1xf32>
    %433 = vector.broadcast %432 : vector<2x8x1xf32> to vector<2x8x8xf32>
    %434 = arith.subf %430, %433 : vector<2x8x8xf32>
    %435 = math.exp %434 : vector<2x8x8xf32>
    %cst_76 = arith.constant dense<0.000000e+00> : vector<2x8xf32>
    %436 = vector.multi_reduction <add>, %435, %cst_76 [2] : vector<2x8x8xf32> to vector<2x8xf32>
    %437 = vector.shape_cast %436 : vector<2x8xf32> to vector<2x8x1xf32>
    %438 = tpu.reciprocal %437 {approx = true} : vector<2x8x1xf32> -> vector<2x8x1xf32>
    %439 = vector.broadcast %438 : vector<2x8x1xf32> to vector<2x8x8xf32>
    %440 = arith.mulf %435, %439 : vector<2x8x8xf32>
    %441 = tpu.concatenate %405, %407 in 2 : vector<2x8x8xf32>, vector<2x8x8xf32> -> vector<2x8x16xf32>
    %442 = arith.truncf %441 : vector<2x8x16xf32> to vector<2x8x16xbf16>
    %443 = arith.truncf %440 : vector<2x8x8xf32> to vector<2x8x8xbf16>
    "tpu.trace_start"() <{level = 10 : i32, message = "bqk,bkd->bqd"}> : () -> ()
    %cst_77 = arith.constant dense<0.000000e+00> : vector<2x8x16xf32>
    %444 = tpu.matmul %443, %442, %cst_77 {dimension_numbers = #tpu.dot_dimension_numbers<[2], [1], [1], [2], [0, 0, 0, 1, 1, 2], [0], [0]>} : vector<2x8x8xbf16>, vector<2x8x16xbf16>, vector<2x8x16xf32> -> vector<2x8x16xf32>
    "tpu.trace_stop"() : () -> ()
    %445 = vector.shape_cast %444 : vector<2x8x16xf32> to vector<16x16xf32>
    %446 = vector.extract_strided_slice %445 {offsets = [0, 0], sizes = [16, 8], strides = [1, 1]} : vector<16x16xf32> to vector<16x8xf32>
    %c0_78 = arith.constant 0 : index
    %c24 = arith.constant 24 : index
    %447 = vector.load %arg15[%c0_78, %c24] : memref<16x32xf32, #tpu.memory_space<vmem>>, vector<16x8xf32>
    tpu.vector_store %arg15[%c0_78, %c24], %446 {strides = array<i32>} : memref<16x32xf32, #tpu.memory_space<vmem>>, vector<16x8xf32>,
    %448 = vector.extract_strided_slice %445 {offsets = [0, 8], sizes = [16, 8], strides = [1, 1]} : vector<16x16xf32> to vector<16x8xf32>
    %c0_79 = arith.constant 0 : index
    %c24_80 = arith.constant 24 : index
    %449 = vector.load %arg16[%c0_79, %c24_80] : memref<16x32xf32, #tpu.memory_space<vmem>>, vector<16x8xf32>
    tpu.vector_store %arg16[%c0_79, %c24_80], %448 {strides = array<i32>} : memref<16x32xf32, #tpu.memory_space<vmem>>, vector<16x8xf32>,
    %c0_81 = arith.constant 0 : index
    %c0_82 = arith.constant 0 : index
    %450 = vector.load %arg8[%c0_81, %c0_82] : memref<32x64xbf16, #tpu.memory_space<vmem>>, vector<32x64xbf16>
    %c0_83 = arith.constant 0 : index
    %c0_84 = arith.constant 0 : index
    %451 = vector.load %arg15[%c0_83, %c0_84] : memref<16x32xf32, #tpu.memory_space<vmem>>, vector<16x32xf32>
    %452 = arith.truncf %451 : vector<16x32xf32> to vector<16x32xbf16>
    %cst_85 = arith.constant dense<0.000000e+00> : vector<16x64xf32>
    %453 = tpu.matmul %452, %450, %cst_85 {dimension_numbers = #tpu.dot_dimension_numbers<[1], [0], [0], [1], [0, 0, 1, 1], [], []>} : vector<16x32xbf16>, vector<32x64xbf16>, vector<16x64xf32> -> vector<16x64xf32>
    %c0_86 = arith.constant 0 : index
    %c0_87 = arith.constant 0 : index
    %454 = vector.load %arg16[%c0_86, %c0_87] : memref<16x32xf32, #tpu.memory_space<vmem>>, vector<16x32xf32>
    %455 = arith.truncf %454 : vector<16x32xf32> to vector<16x32xbf16>
    %cst_88 = arith.constant dense<0.000000e+00> : vector<16x64xf32>
    %456 = tpu.matmul %455, %450, %cst_88 {dimension_numbers = #tpu.dot_dimension_numbers<[1], [0], [0], [1], [0, 0, 1, 1], [], []>} : vector<16x32xbf16>, vector<32x64xbf16>, vector<16x64xf32> -> vector<16x64xf32>
    %457 = vector.extract_strided_slice %453 {offsets = [0, 0], sizes = [16, 32], strides = [1, 1]} : vector<16x64xf32> to vector<16x32xf32>
    %458 = vector.extract_strided_slice %456 {offsets = [0, 32], sizes = [16, 32], strides = [1, 1]} : vector<16x64xf32> to vector<16x32xf32>
    %459 = vector.broadcast %5 : f32 to vector<16x32xf32>
    %460 = arith.mulf %459, %458 : vector<16x32xf32>
    %461 = arith.addf %457, %460 : vector<16x32xf32>
    %c0_89 = arith.constant 0 : index
    %c0_90 = arith.constant 0 : index
    %462 = vector.load %arg9[%c0_89, %c0_90] : memref<2x32xf32, #tpu.memory_space<vmem>>, vector<1x32xf32>
    %463 = vector.broadcast %462 : vector<1x32xf32> to vector<16x32xf32>
    %464 = arith.addf %461, %463 : vector<16x32xf32>
    %465 = vector.extract_strided_slice %453 {offsets = [0, 32], sizes = [16, 32], strides = [1, 1]} : vector<16x64xf32> to vector<16x32xf32>
    %466 = vector.extract_strided_slice %456 {offsets = [0, 0], sizes = [16, 32], strides = [1, 1]} : vector<16x64xf32> to vector<16x32xf32>
    %467 = arith.addf %465, %466 : vector<16x32xf32>
    %c1_91 = arith.constant 1 : index
    %c0_92 = arith.constant 0 : index
    %468 = vector.load %arg9[%c1_91, %c0_92] : memref<2x32xf32, #tpu.memory_space<vmem>>, vector<1x32xf32>
    %469 = vector.broadcast %468 : vector<1x32xf32> to vector<16x32xf32>
    %470 = arith.addf %467, %469 : vector<16x32xf32>
    %471 = arith.addf %1, %464 : vector<16x32xf32>
    %472 = vector.shape_cast %471 : vector<16x32xf32> to vector<2x8x32xf32>
    %c0_93 = arith.constant 0 : index
    %c0_94 = arith.constant 0 : index
    %c0_95 = arith.constant 0 : index
    %473 = vector.load %arg13[%c0_93, %c0_94, %c0_95] : memref<2x8x32xf32, #tpu.memory_space<vmem>>, vector<2x8x32xf32>
    tpu.vector_store %arg13[%c0_93, %c0_94, %c0_95], %472 {strides = array<i32>} : memref<2x8x32xf32, #tpu.memory_space<vmem>>, vector<2x8x32xf32>,
    %474 = arith.addf %3, %470 : vector<16x32xf32>
    %475 = vector.shape_cast %474 : vector<16x32xf32> to vector<2x8x32xf32>
    %c0_96 = arith.constant 0 : index
    %c0_97 = arith.constant 0 : index
    %c0_98 = arith.constant 0 : index
    %476 = vector.load %arg14[%c0_96, %c0_97, %c0_98] : memref<2x8x32xf32, #tpu.memory_space<vmem>>, vector<2x8x32xf32>
    tpu.vector_store %arg14[%c0_96, %c0_97, %c0_98], %475 {strides = array<i32>} : memref<2x8x32xf32, #tpu.memory_space<vmem>>, vector<2x8x32xf32>,
    return
  }
  func.func @transform_0(%arg0: i32) -> i32 {
    %c0_i32 = arith.constant 0 : i32
    %c0_i32_0 = arith.constant 0 : i32
    return %c0_i32 : i32
  }
  func.func @transform_1(%arg0: i32) -> i32 {
    %c0_i32 = arith.constant 0 : i32
    %c0_i32_0 = arith.constant 0 : i32
    return %c0_i32 : i32
  }
  func.func @transform_2(%arg0: i32) -> (i32, i32, i32) {
    %c0_i32 = arith.constant 0 : i32
    %c0_i32_0 = arith.constant 0 : i32
    %c0_i32_1 = arith.constant 0 : i32
    return %arg0, %c0_i32, %c0_i32_0 : i32, i32, i32
  }
  func.func @transform_3(%arg0: i32) -> (i32, i32, i32) {
    %c0_i32 = arith.constant 0 : i32
    %c0_i32_0 = arith.constant 0 : i32
    %c0_i32_1 = arith.constant 0 : i32
    return %arg0, %c0_i32, %c0_i32_0 : i32, i32, i32
  }
  func.func @transform_4(%arg0: i32) -> (i32, i32) {
    %c0_i32 = arith.constant 0 : i32
    %c0_i32_0 = arith.constant 0 : i32
    %c0_i32_1 = arith.constant 0 : i32
    return %c0_i32, %c0_i32_0 : i32, i32
  }
  func.func @transform_5(%arg0: i32) -> (i32, i32) {
    %c0_i32 = arith.constant 0 : i32
    %c0_i32_0 = arith.constant 0 : i32
    %c0_i32_1 = arith.constant 0 : i32
    return %c0_i32, %c0_i32_0 : i32, i32
  }
  func.func @transform_6(%arg0: i32) -> (i32, i32) {
    %c0_i32 = arith.constant 0 : i32
    %c0_i32_0 = arith.constant 0 : i32
    %c0_i32_1 = arith.constant 0 : i32
    return %c0_i32, %c0_i32_0 : i32, i32
  }
  func.func @transform_7(%arg0: i32) -> (i32, i32) {
    %c0_i32 = arith.constant 0 : i32
    %c0_i32_0 = arith.constant 0 : i32
    %c0_i32_1 = arith.constant 0 : i32
    return %c0_i32, %c0_i32_0 : i32, i32
  }
  func.func @transform_8(%arg0: i32) -> (i32, i32) {
    %c0_i32 = arith.constant 0 : i32
    %c0_i32_0 = arith.constant 0 : i32
    %c0_i32_1 = arith.constant 0 : i32
    return %c0_i32, %c0_i32_0 : i32, i32
  }
  func.func @transform_9(%arg0: i32) -> (i32, i32) {
    %c0_i32 = arith.constant 0 : i32
    %c0_i32_0 = arith.constant 0 : i32
    %c0_i32_1 = arith.constant 0 : i32
    return %c0_i32, %c0_i32_0 : i32, i32
  }
  func.func @transform_10(%arg0: i32) -> (i32, i32) {
    %c0_i32 = arith.constant 0 : i32
    %c0_i32_0 = arith.constant 0 : i32
    %c0_i32_1 = arith.constant 0 : i32
    return %c0_i32, %c0_i32_0 : i32, i32
  }
  func.func @transform_11(%arg0: i32) -> (i32, i32, i32) {
    %c0_i32 = arith.constant 0 : i32
    %c0_i32_0 = arith.constant 0 : i32
    %c0_i32_1 = arith.constant 0 : i32
    return %arg0, %c0_i32, %c0_i32_0 : i32, i32, i32
  }
  func.func @transform_12(%arg0: i32) -> (i32, i32, i32) {
    %c0_i32 = arith.constant 0 : i32
    %c0_i32_0 = arith.constant 0 : i32
    %c0_i32_1 = arith.constant 0 : i32
    return %arg0, %c0_i32, %c0_i32_0 : i32, i32, i32
  }
  func.func @transform_13(%arg0: i32) -> (i32, i32, i32) {
    %c0_i32 = arith.constant 0 : i32
    %c0_i32_0 = arith.constant 0 : i32
    %c0_i32_1 = arith.constant 0 : i32
    return %arg0, %c0_i32, %c0_i32_0 : i32, i32, i32
  }
}

</mosaic_0001>

<bundles_post_ra>
// kernel: forward.9
= control target key start
LH: loop header
LB: loop body
LE: loop exit
PB: predicated region body
PF: predicated region fallthrough
CT: control target
= control target key end

     0   :  { %vm17_vm0 = vcmask 261120   ;;  %v125_v4 = vmov 8.0   ;;  %s174_s0 = inlined_call_operand.vmem [shape: f32[2,8,32], index: 0, kind: input, shape index: {}]   ;;  %s175_s1 = inlined_call_operand.vmem [shape: f32[32,2], index: 1, kind: input, shape index: {}]   ;;  %s176_s2 = inlined_call_operand.vmem [shape: f32[1,2], index: 2, kind: input, shape index: {}]   ;;  %s177_s3 = inlined_call_operand.hbm [shape: f32[2,2], index: 3, kind: output, shape index: {}]  }
   0x1   :  { %v44_v0 = vld [vmem:[%s175_s1 + $0x18] sm:$0xff]  ;;  %v43_v1 = vld [vmem:[%s175_s1 + $0x10] sm:$0xff]  ;;  %v15_v2 = vld [vmem:[%s174_s0] sm:$0xff]  ;;  %97 = vrcp.f32 %v125_v4 }
   0x2   :  { %67 = vmatpush.msra.mxu0 %v44_v0  ;;  %v16_v3 = vld [vmem:[%s174_s0 + $0x8] sm:$0xff]  ;;  %v18_v6 = vsel %vm17_vm0, %v15_v2, 0.0 }
   0x3   :  { %v42_v5 = vld [vmem:[%s175_s1 + $0x8] sm:$0xff]  ;;  %v25_v7 = vsel %vm17_vm0, %v16_v3, 0.0  ;;  %v19_v8 = vrot.slane %v18_v6, 4 }
   0x4   :  { %68 = vmatpush.msra.mxu0 %v43_v1  ;;  %v26_v9 = vrot.slane %v25_v7, 4 }
   0x5   :  { %8 = vsyncpa [#allocation3], 0  ;;  %v41_v10 = vld [vmem:[%s175_s1] sm:$0xff]  ;;  %v20_v11 = vadd.f32 %v19_v8, %v18_v6  ;;  %vm51_vm2 = vcmask 1041409   ;;  %s126_s24 = smov [#allocation2]   ;;  %s84_s28 = sshll.u32 %s177_s3, 4  ;;  %s85_s28 = int_to_ptr.hbm [resolvable:$true] %s84_s28 }
   0x6   :  { %69 = vmatpush.msra.mxu0 %v42_v5  ;;  %v27_v12 = vadd.f32 %v26_v9, %v25_v7  ;;  %v96_v30 = vld [vmem:[%s176_s2] ss:$0 sm:$0xff]  ;;  %s82_s25 = sshll.u32 %s126_s24, 4  ;;  %vm75_vm3 = vcmask 9216   ;;  %s83_s25 = int_to_ptr.vmem [resolvable:$true] %s82_s25 }
   0x7   :  { %v98_v13 = vpop.eup %97  ;;  %v21_v14 = vrot.slane %v20_v11, 2 }
   0x8   :  { %70 = vmatpush.msra.mxu0 %v41_v10  ;;  %v28_v15 = vrot.slane %v27_v12, 2  ;;  %v33_v16 = vmul.f32 8.0, %v98_v13  ;;  %vm37_vm1 = vweird.f32 %v98_v13 }
   0x9   :  { %v22_v17 = vadd.f32 %v21_v14, %v20_v11 }
   0xa   :  { %v29_v18 = vadd.f32 %v28_v15, %v27_v12  ;;  %v34_v19 = vsub.f32 1.0, %v33_v16 }
   0xb   :  { %v23_v20 = vrot.slane %v22_v17, 1 }
   0xc   :  { %v30_v21 = vrot.slane %v29_v18, 1  ;;  %v35_v22 = vmul.f32 %v98_v13, %v34_v19 }
   0xd   :  { %v24_v23 = vadd.f32 %v23_v20, %v22_v17 }
   0xe   :  { %v31_v24 = vadd.f32 %v30_v21, %v29_v18  ;;  %v36_v25 = vadd.f32 %v98_v13, %v35_v22 }
  0x10   :  { %v38_v26 = vsel %vm37_vm1, %v98_v13, %v36_v25 }
  0x11   :  { %v39_v27 = vmul.f32 %v38_v26, %v24_v23  ;;  %v40_v28 = vmul.f32 %v38_v26, %v31_v24 }
  0x13   :  { %v52_v29 = vsel %vm51_vm2, %v40_v28, %v39_v27 }
  0x14   :  { %93 = vmatmul.msk.f32.vlgmr.msra.gmra.mxu0 %vm17_vm0, %v52_v29 }
  0x91   :  { %v72_v31 = vpop.f32.mrf.mxu0 }
  0x92   :  { %v73_v32 = vadd.f32 %v96_v30, %v72_v31 }
  0x94   :  { %76 = vst.msk [vmem:[#allocation2] sm:$0x3] %vm75_vm3, %v73_v32 }
  0x95   :  { %87 = dma.vmem_to_hbm [thread:$0]  %s83_s25, 32, %s85_s28, [#allocation3]  }
  0x96   :  { %123 = dma.done.wait [#allocation3], 32  }
  0x97   :  { %124 = vsyncadd [#allocation3], 4294967264 }
  0x98   :  { %92 = vsyncpa [#allocation3], 1 }

// kernel: forward.8
= control target key start
LH: loop header
LB: loop body
LE: loop exit
PB: predicated region body
PF: predicated region fallthrough
CT: control target
= control target key end

     0   :  { %vm46_vm0 = vcmask 261120   ;;  %s791_s0 = inlined_call_operand.<no memory space> [shape: f32[1], index: 0, kind: input, shape index: {}]   ;;  %s792_s1 = inlined_call_operand.vmem [shape: f32[16,32], index: 1, kind: input, shape index: {}]   ;;  %s793_s2 = inlined_call_operand.vmem [shape: f32[16,32], index: 2, kind: input, shape index: {}]   ;;  %s794_s3 = inlined_call_operand.vmem [shape: f32[1,32], index: 3, kind: input, shape index: {}]   ;;  %s795_s4 = inlined_call_operand.vmem [shape: bf16[32,256], index: 4, kind: input, shape index: {}]   ;;  %s796_s5 = inlined_call_operand.vmem [shape: f32[4,64], index: 5, kind: input, shape index: {}]   ;;  %s797_s6 = inlined_call_operand.vmem [shape: bf16[64,64], index: 6, kind: input, shape index: {}]   ;;  %s798_s7 = inlined_call_operand.vmem [shape: f32[2,32], index: 7, kind: input, shape index: {}]   ;;  %s799_s8 = inlined_call_operand.vmem [shape: f32[16,32], index: 8, kind: output, shape index: {0}]   ;;  %s800_s9 = inlined_call_operand.hbm [shape: f32[16,32], index: 9, kind: output, shape index: {1}]  }
   0x1   :  { %v649_v0 = vld [vmem:[%s792_s1] sm:$0xff]  ;;  %v659_v2 = vld [vmem:[%s792_s1 + $0x8] sm:$0xff] }
   0x2   :  { %v654_v1 = vld [vmem:[%s793_s2] sm:$0xff]  ;;  %v40_v3 = vmul.f32 %v649_v0, %v649_v0  ;;  %v668_v5 = vld [vmem:[%s793_s2 + $0x8] sm:$0xff]  ;;  %v41_v7 = vmul.f32 %v659_v2, %v659_v2 }
   0x3   :  { %v42_v4 = vmul.f32 %v654_v1, %v654_v1  ;;  %v43_v8 = vmul.f32 %v668_v5, %v668_v5 }
   0x5   :  { %v44_v6 = vadd.f32 %v42_v4, %v40_v3 }
   0x6   :  { %16 = vsyncpa [#allocation4], 0  ;;  %v45_v10 = vadd.f32 %v43_v8, %v41_v7  ;;  %v589_v12 = vmov 32.0   ;;  %v493_v18 = vld [vmem:[%s795_s4 + $0x10] sm:$0xf]  ;;  %s590_s12 = smov 64   ;;  %v718_v63 = vstv %s791_s0 }
   0x7   :  { %v47_v9 = vsel %vm46_vm0, %v44_v6, 0.0  ;;  %545 = vrcp.f32 %v589_v12  ;;  %v526_v19 = vld [vmem:[%s795_s4 + $0x14] sm:$0xf0]  ;;  %v525_v20 = vld [vmem:[%s795_s4 + $0x14] sm:$0xf]  ;;  %s591_s26 = smov 32  }
   0x8   :  { %48 = vadd.xlane.f32.xlu0 %v47_v9  ;;  %v50_v11 = vsel %vm46_vm0, %v45_v10, 0.0  ;;  %v494_v21 = vor.u32 %v526_v19, %v493_v18  ;;  %v495_v22 = vld [vmem:[%s795_s4 + $0x18] sm:$0xf0]  ;;  %v485_v25 = vld [vmem:[%s795_s4] sm:$0xf]  ;;  %s592_s27 = smov 96  }
   0x9   :  { %v498_v23 = vor.u32 %v525_v20, %v495_v22  ;;  %v524_v26 = vld [vmem:[%s795_s4 + $0x4] sm:$0xf0]  ;;  %v523_v27 = vld [vmem:[%s795_s4 + $0x4] sm:$0xf]  ;;  %v487_v29 = vld [vmem:[%s795_s4 + $0x8] sm:$0xf0] }
   0xa   :  { %129 = vmatpush.bf16.msra.mxu0 %v494_v21  ;;  %161 = vmatpush.bf16.msra.mxu2 %v494_v21  ;;  %v486_v28 = vor.u32 %v524_v26, %v485_v25  ;;  %v490_v31 = vor.u32 %v523_v27, %v487_v29  ;;  %v538_v51 = vld [vmem:[%s794_s3] ss:$0 sm:$0xff]  ;;  %v539_v62 = vld [vmem:[%s796_s5 + $0x1] ss:$0 sm:$0xff]  ;;  %v541_v20 = vld [vmem:[%s796_s5 + $0x3] ss:$0 sm:$0xff] }
   0xb   :  { %143 = vmatpush.bf16.msra.mxu1 %v498_v23  ;;  %175 = vmatpush.bf16.msra.mxu3 %v498_v23  ;;  %s593_s3 = smov [#allocation3]   ;;  %s469_s14 = sshll.u32 %s800_s9, 4  ;;  %s470_s14 = int_to_ptr.hbm [resolvable:$true] %s469_s14 }
   0xc   :  { %213 = vrot.lane.b32.xlu2 %v539_v62, %s590_s12  ;;  %s467_s11 = sshll.u32 %s593_s3, 4  ;;  %s594_s0 = smov 128   ;;  %s468_s11 = int_to_ptr.vmem [resolvable:$true] %s467_s11 }
   0xd   :  { %v546_v13 = vpop.eup %545 }
   0xe   :  { %v54_v14 = vmul.f32 32.0, %v546_v13  ;;  %vm58_vm1 = vweird.f32 %v546_v13  ;;  %130 = vmatpush.bf16.msra.mxu0 %v486_v28  ;;  %162 = vmatpush.bf16.msra.mxu2 %v486_v28 }
   0xf   :  { %144 = vmatpush.bf16.msra.mxu1 %v490_v31  ;;  %176 = vmatpush.bf16.msra.mxu3 %v490_v31 }
  0x10   :  { %51 = vadd.xlane.f32.xlu0 %v50_v11  ;;  %v55_v15 = vsub.f32 1.0, %v54_v14 }
  0x12   :  { %v56_v16 = vmul.f32 %v546_v13, %v55_v15 }
  0x14   :  { %v57_v17 = vadd.f32 %v546_v13, %v56_v16 }
  0x16   :  { %v59_v24 = vsel %vm58_vm1, %v546_v13, %v57_v17 }
  0x66   :  { %v214_v11 = vpop.permute.xlu2 %213 }
  0x7b   :  { %v49_v30 = vpop.xlane.xlu0 %48 }
  0x7c   :  { %v60_v32 = vmul.f32 %v59_v24, %v49_v30 }
  0x7e   :  { %v62_v33 = vadd.f32 1e-06, %v60_v32 }
  0x80   :  { %547 = vrsqrt.f32 %v62_v33  ;;  %vm70_vm3 = vweird.f32 %v62_v33 }
  0x83   :  { %v52_v34 = vpop.xlane.xlu0 %51 }
  0x84   :  { %v61_v35 = vmul.f32 %v59_v24, %v52_v34  ;;  %v540_v24 = vld [vmem:[%s796_s5] ss:$0 sm:$0xff] }
  0x86   :  { %v548_v36 = vpop.eup %547  ;;  %v63_v37 = vadd.f32 1e-06, %v61_v35 }
  0x87   :  { %v65_v38 = vmul.f32 %v548_v36, %v62_v33  ;;  %vm71_vm2 = vweird.f32 %v548_v36 }
  0x88   :  { %549 = vrsqrt.f32 %v63_v37  ;;  %vm72_vm4 = vmor %vm70_vm3, %vm71_vm2  ;;  %vm80_vm6 = vweird.f32 %v63_v37 }
  0x89   :  { %v66_v39 = vmul.f32 %v548_v36, %v65_v38 }
  0x8b   :  { %v67_v40 = vmul.f32 0.5, %v66_v39 }
  0x8d   :  { %v68_v41 = vsub.f32 1.5, %v67_v40 }
  0x8e   :  { %v550_v42 = vpop.eup %549 }
  0x8f   :  { %v75_v43 = vmul.f32 %v550_v42, %v63_v37  ;;  %v69_v44 = vmul.f32 %v548_v36, %v68_v41  ;;  %vm81_vm5 = vweird.f32 %v550_v42 }
  0x90   :  { %vm82_vm7 = vmor %vm80_vm6, %vm81_vm5  ;;  %vm375_vm5 = vcmask 523264  }
  0x91   :  { %v76_v45 = vmul.f32 %v550_v42, %v75_v43  ;;  %v73_v47 = vsel %vm72_vm4, %v548_v36, %v69_v44 }
  0x92   :  { %v84_v50 = vmul.f32 %v73_v47, %v649_v0  ;;  %v91_v52 = vmul.f32 %v73_v47, %v654_v1 }
  0x93   :  { %v77_v46 = vmul.f32 0.5, %v76_v45 }
  0x94   :  { %v89_v56 = vmul.f32 %v538_v51, %v84_v50  ;;  %v93_v58 = vmul.f32 %v538_v51, %v91_v52 }
  0x95   :  { %v78_v48 = vsub.f32 1.5, %v77_v46 }
  0x97   :  { %v79_v49 = vmul.f32 %v550_v42, %v78_v48 }
  0x99   :  { %v83_v53 = vsel %vm82_vm7, %v550_v42, %v79_v49 }
  0x9a   :  { %v85_v54 = vmul.f32 %v83_v53, %v659_v2  ;;  %v92_v55 = vmul.f32 %v83_v53, %v668_v5 }
  0x9c   :  { %v90_v57 = vmul.f32 %v538_v51, %v85_v54  ;;  %v94_v59 = vmul.f32 %v538_v51, %v92_v55 }
  0x9e   :  { %v99_v60 = vpack.c.bf16 %v90_v57, %v89_v56  ;;  %v151_v61 = vpack.c.bf16 %v94_v59, %v93_v58 }
  0xa0   :  { %499 = vmatmul.msk.bf16.vlgmr.msra.gmra.mxu0 %vm46_vm0, %v99_v60  ;;  %500 = vmatmul.msk.bf16.vlgmr.msra.gmra.mxu1 %vm46_vm0, %v99_v60 }
  0xa1   :  { %501 = vmatmul.msk.bf16.vlgmr.msra.gmra.mxu2 %vm46_vm0, %v151_v61  ;;  %502 = vmatmul.msk.bf16.vlgmr.msra.gmra.mxu3 %vm46_vm0, %v151_v61 }
 0x11d   :  { %v132_v8 = vpop.f32.mrf.mxu0  ;;  %v739_v31 = vpop.f32.mrf.mxu1 }
 0x124   :  { %v164_v3 = vpop.f32.mrf.mxu2  ;;  %v178_v18 = vpop.f32.mrf.mxu3 }
 0x125   :  { %v184_v4 = vmul.f32 %v718_v63, %v164_v3  ;;  %202 = vrot.lane.b32.xlu1 %v164_v3, %s590_s12  ;;  %v134_v14 = vpop.f32.mrf.mxu0  ;;  %v218_v22 = vmul.f32 %v718_v63, %v178_v18  ;;  %v741_v34 = vpop.f32.mrf.mxu1 }
 0x127   :  { %188 = vrot.lane.b32.xlu2 %v184_v4, %s590_s12 }
 0x12c   :  { %v166_v6 = vpop.f32.mrf.mxu2  ;;  %v180_v21 = vpop.f32.mrf.mxu3 }
 0x12d   :  { %v185_v7 = vmul.f32 %v718_v63, %v166_v6  ;;  %204 = vrot.lane.b32.xlu1 %v166_v6, %s590_s12  ;;  %v219_v43 = vmul.f32 %v718_v63, %v180_v21 }
 0x12f   :  { %190 = vrot.lane.b32.xlu0 %v185_v7, %s590_s12 }
 0x181   :  { %v189_v23 = vpop.permute.xlu2 %188 }
 0x182   :  { %v194_v25 = vadd.f32 %v189_v23, %v132_v8 }
 0x184   :  { %v198_v26 = vadd.f32 %v540_v24, %v194_v25 }
 0x186   :  { %v252_v27 = vmul.f32 %v198_v26, %v198_v26 }
 0x197   :  { %v203_v9 = vpop.permute.xlu1 %202 }
 0x198   :  { %v208_v10 = vadd.f32 %v203_v9, %v132_v8  ;;  %v530_v9 = vld [vmem:[%s797_s6 + $0x18] sm:$0xff] }
 0x199   :  { %383 = vmatpush.bf16.msrb.mxu0 %v530_v9  ;;  %401 = vmatpush.bf16.msrb.mxu1 %v530_v9 }
 0x19a   :  { %v216_v12 = vadd.f32 %v214_v11, %v208_v10  ;;  %v529_v10 = vld [vmem:[%s797_s6 + $0x10] sm:$0xff] }
 0x19c   :  { %v254_v13 = vmul.f32 %v216_v12, %v216_v12 }
 0x19d   :  { %384 = vmatpush.bf16.msrb.mxu0 %v529_v10  ;;  %402 = vmatpush.bf16.msrb.mxu1 %v529_v10 }
 0x19e   :  { %258 = vrot.lane.b32.xlu1 %v254_v13, %s590_s12 }
 0x19f   :  { %v205_v15 = vpop.permute.xlu1 %204 }
 0x1a0   :  { %v209_v16 = vadd.f32 %v205_v15, %v134_v14  ;;  %v528_v15 = vld [vmem:[%s797_s6 + $0x8] sm:$0xff] }
 0x1a1   :  { %v191_v37 = vpop.permute.xlu0 %190  ;;  %385 = vmatpush.bf16.msrb.mxu0 %v528_v15  ;;  %403 = vmatpush.bf16.msrb.mxu1 %v528_v15 }
 0x1a2   :  { %v217_v17 = vadd.f32 %v214_v11, %v209_v16  ;;  %v195_v41 = vadd.f32 %v191_v37, %v134_v14  ;;  %v527_v16 = vld [vmem:[%s797_s6] sm:$0xff] }
 0x1a4   :  { %v255_v19 = vmul.f32 %v217_v17, %v217_v17  ;;  %v199_v42 = vadd.f32 %v540_v24, %v195_v41 }
 0x1a5   :  { %386 = vmatpush.bf16.msrb.mxu0 %v527_v16  ;;  %404 = vmatpush.bf16.msrb.mxu1 %v527_v16 }
 0x1a6   :  { %236 = vrot.lane.b32.xlu1 %v178_v18, %s590_s12  ;;  %260 = vrot.lane.b32.xlu2 %v255_v19, %s590_s12  ;;  %v253_v44 = vmul.f32 %v199_v42, %v199_v42 }
 0x1ae   :  { %247 = vrot.lane.b32.xlu1 %v541_v20, %s590_s12  ;;  %238 = vrot.lane.b32.xlu2 %v180_v21, %s590_s12 }
 0x1b6   :  { %222 = vrot.lane.b32.xlu1 %v218_v22, %s590_s12 }
 0x200   :  { %v261_v30 = vpop.permute.xlu2 %260 }
 0x201   :  { %v265_v45 = vadd.f32 %v261_v30, %v253_v44 }
 0x203   :  { %vm285_vm9 = vcmp.eq.f32.partialorder %v265_v45, inf  ;;  %v288_v4 = vand.u32 2147483648, %v265_v45  ;;  %vm287_vm11 = vcmp.eq.f32.partialorder %v265_v45, 0.0 }
 0x208   :  { %v239_v33 = vpop.permute.xlu2 %238 }
 0x209   :  { %v243_v35 = vadd.f32 %v239_v33, %v741_v34 }
 0x210   :  { %v259_v28 = vpop.permute.xlu1 %258 }
 0x211   :  { %v264_v29 = vadd.f32 %v259_v28, %v252_v27 }
 0x213   :  { %551 = vrsqrt.f32 %v264_v29  ;;  %vm273_vm8 = vcmp.eq.f32.partialorder %v264_v29, inf  ;;  %v276_v61 = vand.u32 2147483648, %v264_v29  ;;  %vm275_vm10 = vcmp.eq.f32.partialorder %v264_v29, 0.0 }
 0x214   :  { %553 = vrsqrt.f32 %v265_v45 }
 0x218   :  { %v237_v32 = vpop.permute.xlu1 %236 }
 0x219   :  { %v242_v36 = vadd.f32 %v237_v32, %v739_v31  ;;  %v552_v46 = vpop.eup %551 }
 0x21a   :  { %v554_v47 = vpop.eup %553  ;;  %v267_v48 = vmul.f32 %v552_v46, %v264_v29 }
 0x21b   :  { %v279_v49 = vmul.f32 %v554_v47, %v265_v45 }
 0x21c   :  { %v268_v50 = vmul.f32 %v552_v46, %v267_v48 }
 0x21d   :  { %v280_v51 = vmul.f32 %v554_v47, %v279_v49 }
 0x21e   :  { %v269_v52 = vmul.f32 0.5, %v268_v50 }
 0x21f   :  { %v281_v53 = vmul.f32 0.5, %v280_v51 }
 0x220   :  { %v248_v38 = vpop.permute.xlu1 %247  ;;  %v270_v54 = vsub.f32 1.5, %v269_v52 }
 0x221   :  { %v250_v39 = vadd.f32 %v248_v38, %v242_v36  ;;  %v251_v40 = vadd.f32 %v248_v38, %v243_v35  ;;  %v282_v55 = vsub.f32 1.5, %v281_v53 }
 0x222   :  { %v271_v56 = vmul.f32 %v552_v46, %v270_v54 }
 0x223   :  { %334 = vrot.lane.b32.xlu2 %v250_v39, %s590_s12  ;;  %336 = vrot.lane.b32.xlu0 %v251_v40, %s590_s12  ;;  %v283_v57 = vmul.f32 %v554_v47, %v282_v55  ;;  %v542_v40 = vld [vmem:[%s796_s5 + $0x2] ss:$0 sm:$0xff] }
 0x224   :  { %v272_v58 = vmul.f32 %v271_v56, %v264_v29 }
 0x225   :  { %v284_v59 = vmul.f32 %v283_v57, %v265_v45 }
 0x226   :  { %v274_v60 = vsel %vm273_vm8, %v264_v29, %v272_v58 }
 0x227   :  { %v286_v62 = vsel %vm285_vm9, %v265_v45, %v284_v59  ;;  %v277_v3 = vsel %vm275_vm10, %v276_v61, %v274_v60 }
 0x228   :  { %v289_v6 = vsel %vm287_vm11, %v288_v4, %v286_v62  ;;  %v503_v7 = vmul.f32 -1.442695, %v277_v3  ;;  %v223_v35 = vpop.permute.xlu1 %222 }
 0x229   :  { %v504_v8 = vmul.f32 -1.442695, %v289_v6  ;;  %v228_v41 = vadd.f32 %v223_v35, %v739_v31  ;;  %v543_v31 = vld [vmem:[%s798_s7 + $0x1] ss:$0 sm:$0xff] }
 0x22a   :  { %555 = vpow2.f32 %v503_v7 }
 0x22b   :  { %224 = vrot.lane.b32.xlu2 %v219_v43, %s590_s12  ;;  %557 = vpow2.f32 %v504_v8  ;;  %v232_v46 = vadd.f32 %v542_v40, %v228_v41 }
 0x230   :  { %v556_v11 = vpop.eup %555 }
 0x231   :  { %v558_v12 = vpop.eup %557  ;;  %v296_v13 = vadd.f32 1.0, %v556_v11 }
 0x232   :  { %v297_v14 = vadd.f32 1.0, %v558_v12 }
 0x233   :  { %559 = vrcp.f32 %v296_v13  ;;  %v309_v26 = vand.u32 2147483648, %v296_v13  ;;  %vm303_vm13 = vweird.f32 %v296_v13  ;;  %v307_v28 = vand.u32 2147483647, %v296_v13  ;;  %440 = vrot.lane.b32.xlu2 %v543_v31, %s591_s26 }
 0x234   :  { %561 = vrcp.f32 %v297_v14  ;;  %v324_v30 = vand.u32 2147483648, %v297_v14  ;;  %vm318_vm1 = vweird.f32 %v297_v14  ;;  %v322_v33 = vand.u32 2147483647, %v297_v14 }
 0x235   :  { %v310_v36 = vor.u32 1.1754944e-38, %v309_v26  ;;  %vm308_vm3 = vcmp.eq.f32.partialorder %v307_v28, 8.507059e+37 }
 0x236   :  { %v325_v39 = vor.u32 1.1754944e-38, %v324_v30  ;;  %vm323_vm4 = vcmp.eq.f32.partialorder %v322_v33, 8.507059e+37 }
 0x239   :  { %v560_v17 = vpop.eup %559 }
 0x23a   :  { %v562_v18 = vpop.eup %561  ;;  %v299_v19 = vmul.f32 %v560_v17, %v296_v13  ;;  %vm304_vm12 = vweird.f32 %v560_v17 }
 0x23b   :  { %v314_v20 = vmul.f32 %v562_v18, %v297_v14  ;;  %vm319_vm14 = vweird.f32 %v562_v18  ;;  %vm305_vm15 = vmor %vm303_vm13, %vm304_vm12 }
 0x23c   :  { %v300_v21 = vsub.f32 1.0, %v299_v19  ;;  %vm320_vm2 = vmor %vm318_vm1, %vm319_vm14 }
 0x23d   :  { %v315_v22 = vsub.f32 1.0, %v314_v20 }
 0x23e   :  { %v301_v23 = vmul.f32 %v560_v17, %v300_v21 }
 0x23f   :  { %v316_v24 = vmul.f32 %v562_v18, %v315_v22 }
 0x240   :  { %v302_v25 = vadd.f32 %v560_v17, %v301_v23 }
 0x241   :  { %v317_v29 = vadd.f32 %v562_v18, %v316_v24 }
 0x242   :  { %v306_v32 = vsel %vm305_vm15, %v560_v17, %v302_v25 }
 0x243   :  { %v321_v37 = vsel %vm320_vm2, %v562_v18, %v317_v29  ;;  %v311_v38 = vsel %vm308_vm3, %v310_v36, %v306_v32 }
 0x244   :  { %v326_v43 = vsel %vm323_vm4, %v325_v39, %v321_v37  ;;  %v328_v44 = vmul.f32 %v311_v38, %v277_v3 }
 0x245   :  { %v329_v48 = vmul.f32 %v326_v43, %v289_v6  ;;  %v544_v6 = vld [vmem:[%s798_s7] ss:$0 sm:$0xff] }
 0x246   :  { %v330_v49 = vmul.f32 %v328_v44, %v232_v46 }
 0x27d   :  { %v335_v27 = vpop.permute.xlu2 %334 }
 0x27e   :  { %v340_v53 = vmul.f32 %v335_v27, %v328_v44 }
 0x285   :  { %v225_v42 = vpop.permute.xlu2 %224 }
 0x286   :  { %v229_v45 = vadd.f32 %v225_v42, %v741_v34 }
 0x288   :  { %v233_v47 = vadd.f32 %v542_v40, %v229_v45 }
 0x28a   :  { %v331_v50 = vmul.f32 %v329_v48, %v233_v47 }
 0x28c   :  { %v350_v51 = vpack.c.bf16 %v331_v50, %v330_v49 }
 0x28d   :  { %v441_v61 = vpop.permute.xlu2 %440 }
 0x28e   :  { %521 = vmatmul.msk.bf16.vlgmr.msrb.gmra.mxu0 %vm375_vm5, %v350_v51 }
 0x295   :  { %v337_v52 = vpop.permute.xlu0 %336 }
 0x296   :  { %v341_v54 = vmul.f32 %v337_v52, %v329_v48 }
 0x298   :  { %v393_v55 = vpack.c.bf16 %v341_v54, %v340_v53 }
 0x29a   :  { %522 = vmatmul.msk.bf16.vlgmr.msrb.gmra.mxu1 %vm375_vm5, %v393_v55 }
 0x30b   :  { %v388_v59 = vpop.f32.mrf.mxu0 }
 0x313   :  { %v390_v4 = vpop.f32.mrf.mxu0 }
 0x317   :  { %v406_v34 = vpop.f32.mrf.mxu1 }
 0x318   :  { %429 = vrot.lane.b32.xlu0 %v406_v34, %s591_s26  ;;  %v411_v56 = vmul.f32 %v406_v34, %v718_v63 }
 0x31f   :  { %v408_v57 = vpop.f32.mrf.mxu1 }
 0x320   :  { %415 = vrot.lane.b32.xlu0 %v411_v56, %s592_s27  ;;  %431 = vrot.lane.b32.xlu1 %v408_v57, %s591_s26  ;;  %v412_v58 = vmul.f32 %v408_v57, %v718_v63 }
 0x328   :  { %417 = vrot.lane.b32.xlu1 %v412_v58, %s592_s27 }
 0x38a   :  { %v430_v60 = vpop.permute.xlu0 %429 }
 0x38b   :  { %v435_v62 = vadd.f32 %v430_v60, %v388_v59 }
 0x38d   :  { %v443_v3 = vadd.f32 %v441_v61, %v435_v62 }
 0x38f   :  { %451 = vrot.lane.b32.xlu2 %v443_v3, %s592_s27 }
 0x392   :  { %v416_v7 = vpop.permute.xlu0 %415  ;;  %v432_v8 = vpop.permute.xlu1 %431 }
 0x393   :  { %v421_v9 = vadd.f32 %v416_v7, %v388_v59  ;;  %v436_v10 = vadd.f32 %v432_v8, %v390_v4 }
 0x395   :  { %v425_v11 = vadd.f32 %v544_v6, %v421_v9  ;;  %v444_v12 = vadd.f32 %v441_v61, %v436_v10 }
 0x397   :  { %v445_v63 = vadd.f32 %v425_v11, %v649_v0  ;;  %453 = vrot.lane.b32.xlu0 %v444_v12, %s592_s27 }
 0x399   :  { %447 = vst.msk [vmem:[%s799_s8] sm:$0xff] %vm46_vm0, %v445_v63 }
 0x39a   :  { %v418_v13 = vpop.permute.xlu1 %417 }
 0x39b   :  { %v422_v14 = vadd.f32 %v418_v13, %v390_v4 }
 0x39d   :  { %v426_v15 = vadd.f32 %v544_v6, %v422_v14 }
 0x39f   :  { %v446_v16 = vadd.f32 %v426_v15, %v659_v2 }
 0x3a1   :  { %448 = vst.msk [vmem:[%s799_s8 + $0x8] sm:$0xff] %vm46_vm0, %v446_v16  ;;  %s595_s8 = smov 8  }
 0x3e9   :  { %v452_v17 = vpop.permute.xlu2 %451 }
 0x3ea   :  { %v457_v18 = vadd.f32 %v452_v17, %v654_v1 }
 0x3ec   :  { %459 = vst.msk [vmem:[#allocation3] sm:$0xff] %vm46_vm0, %v457_v18 }
 0x409   :  { %v454_v0 = vpop.permute.xlu0 %453 }
 0x40a   :  { %v458_v2 = vadd.f32 %v454_v0, %v668_v5 }
 0x40c   :  { %460 = vst.msk [vmem:[#allocation3 + $0x8] sm:$0xff] %vm46_vm0, %v458_v2 }
 0x40d   :  { %475 = dma.vmem_to_hbm [thread:$0]  %s468_s11, 256, %s470_s14, [#allocation4], %s594_s0, %s594_s0, %s595_s8  }
 0x40e   :  { %587 = dma.done.wait [#allocation4], 256  }
 0x40f   :  { %588 = vsyncadd [#allocation4], 4294967040 }
 0x410   :  { %482 = vsyncpa [#allocation4], 1 }

// kernel: forward.6
= control target key start
LH: loop header
LB: loop body
LE: loop exit
PB: predicated region body
PF: predicated region fallthrough
CT: control target
= control target key end

     0   :  { %vm45_vm0 = vcmask 261120   ;;  %v545_v12 = vmov 32.0   ;;  %s546_s12 = smov 64   ;;  %s547_s26 = smov 32   ;;  %s747_s1 = inlined_call_operand.vmem [shape: f32[16,32], index: 1, kind: input, shape index: {}]   ;;  %s748_s2 = inlined_call_operand.vmem [shape: f32[16,32], index: 2, kind: input, shape index: {}]   ;;  %s749_s3 = inlined_call_operand.vmem [shape: f32[1,32], index: 3, kind: input, shape index: {}]   ;;  %s750_s4 = inlined_call_operand.vmem [shape: bf16[32,256], index: 4, kind: input, shape index: {}]   ;;  %s751_s5 = inlined_call_operand.vmem [shape: f32[4,64], index: 5, kind: input, shape index: {}]   ;;  %s752_s0 = inlined_call_operand.<no memory space> [shape: f32[1], index: 0, kind: input, shape index: {}]   ;;  %s753_s6 = inlined_call_operand.vmem [shape: bf16[64,64], index: 6, kind: input, shape index: {}]   ;;  %s754_s7 = inlined_call_operand.vmem [shape: f32[2,32], index: 7, kind: input, shape index: {}]   ;;  %s755_s8 = inlined_call_operand.vmem [shape: f32[16,32], index: 8, kind: output, shape index: {0}]   ;;  %s756_s9 = inlined_call_operand.vmem [shape: f32[16,32], index: 9, kind: output, shape index: {1}]  }
   0x1   :  { %v602_v0 = vld [vmem:[%s747_s1] sm:$0xff]  ;;  %v612_v2 = vld [vmem:[%s747_s1 + $0x8] sm:$0xff]  ;;  %527 = vrcp.f32 %v545_v12  ;;  %v478_v18 = vld [vmem:[%s750_s4 + $0x10] sm:$0xf]  ;;  %v671_v63 = vstv %s752_s0  ;;  %s548_s27 = smov 96  }
   0x2   :  { %v607_v1 = vld [vmem:[%s748_s2] sm:$0xff]  ;;  %v39_v3 = vmul.f32 %v602_v0, %v602_v0  ;;  %v621_v5 = vld [vmem:[%s748_s2 + $0x8] sm:$0xff]  ;;  %v40_v7 = vmul.f32 %v612_v2, %v612_v2  ;;  %v511_v19 = vld [vmem:[%s750_s4 + $0x14] sm:$0xf0] }
   0x3   :  { %v41_v4 = vmul.f32 %v607_v1, %v607_v1  ;;  %v42_v8 = vmul.f32 %v621_v5, %v621_v5  ;;  %v510_v20 = vld [vmem:[%s750_s4 + $0x14] sm:$0xf]  ;;  %v479_v21 = vor.u32 %v511_v19, %v478_v18  ;;  %v480_v22 = vld [vmem:[%s750_s4 + $0x18] sm:$0xf0]  ;;  %v470_v25 = vld [vmem:[%s750_s4] sm:$0xf] }
   0x4   :  { %v483_v23 = vor.u32 %v510_v20, %v480_v22  ;;  %v509_v26 = vld [vmem:[%s750_s4 + $0x4] sm:$0xf0]  ;;  %v508_v27 = vld [vmem:[%s750_s4 + $0x4] sm:$0xf]  ;;  %v472_v29 = vld [vmem:[%s750_s4 + $0x8] sm:$0xf0] }
   0x5   :  { %v43_v6 = vadd.f32 %v41_v4, %v39_v3  ;;  %v44_v10 = vadd.f32 %v42_v8, %v40_v7  ;;  %128 = vmatpush.bf16.msra.mxu0 %v479_v21  ;;  %160 = vmatpush.bf16.msra.mxu2 %v479_v21  ;;  %v471_v28 = vor.u32 %v509_v26, %v470_v25  ;;  %v520_v51 = vld [vmem:[%s749_s3] ss:$0 sm:$0xff]  ;;  %v521_v62 = vld [vmem:[%s751_s5 + $0x1] ss:$0 sm:$0xff]  ;;  %v523_v20 = vld [vmem:[%s751_s5 + $0x3] ss:$0 sm:$0xff] }
   0x6   :  { %142 = vmatpush.bf16.msra.mxu1 %v483_v23  ;;  %174 = vmatpush.bf16.msra.mxu3 %v483_v23  ;;  %v475_v31 = vor.u32 %v508_v27, %v472_v29 }
   0x7   :  { %v46_v9 = vsel %vm45_vm0, %v43_v6, 0.0  ;;  %v49_v11 = vsel %vm45_vm0, %v44_v10, 0.0  ;;  %v528_v13 = vpop.eup %527  ;;  %212 = vrot.lane.b32.xlu2 %v521_v62, %s546_s12 }
   0x8   :  { %47 = vadd.xlane.f32.xlu0 %v46_v9  ;;  %v53_v14 = vmul.f32 32.0, %v528_v13  ;;  %vm57_vm1 = vweird.f32 %v528_v13 }
   0x9   :  { %129 = vmatpush.bf16.msra.mxu0 %v471_v28  ;;  %161 = vmatpush.bf16.msra.mxu2 %v471_v28 }
   0xa   :  { %v54_v15 = vsub.f32 1.0, %v53_v14  ;;  %143 = vmatpush.bf16.msra.mxu1 %v475_v31  ;;  %175 = vmatpush.bf16.msra.mxu3 %v475_v31 }
   0xc   :  { %v55_v16 = vmul.f32 %v528_v13, %v54_v15 }
   0xe   :  { %v56_v17 = vadd.f32 %v528_v13, %v55_v16 }
  0x10   :  { %50 = vadd.xlane.f32.xlu0 %v49_v11  ;;  %v58_v24 = vsel %vm57_vm1, %v528_v13, %v56_v17 }
  0x61   :  { %v213_v11 = vpop.permute.xlu2 %212 }
  0x7b   :  { %v48_v30 = vpop.xlane.xlu0 %47 }
  0x7c   :  { %v59_v32 = vmul.f32 %v58_v24, %v48_v30 }
  0x7e   :  { %v61_v33 = vadd.f32 1e-06, %v59_v32 }
  0x80   :  { %529 = vrsqrt.f32 %v61_v33  ;;  %vm69_vm3 = vweird.f32 %v61_v33 }
  0x83   :  { %v51_v34 = vpop.xlane.xlu0 %50 }
  0x84   :  { %v60_v35 = vmul.f32 %v58_v24, %v51_v34  ;;  %v522_v24 = vld [vmem:[%s751_s5] ss:$0 sm:$0xff] }
  0x86   :  { %v530_v36 = vpop.eup %529  ;;  %v62_v37 = vadd.f32 1e-06, %v60_v35 }
  0x87   :  { %v64_v38 = vmul.f32 %v530_v36, %v61_v33  ;;  %vm70_vm2 = vweird.f32 %v530_v36 }
  0x88   :  { %531 = vrsqrt.f32 %v62_v37  ;;  %vm71_vm4 = vmor %vm69_vm3, %vm70_vm2  ;;  %vm79_vm6 = vweird.f32 %v62_v37 }
  0x89   :  { %v65_v39 = vmul.f32 %v530_v36, %v64_v38 }
  0x8b   :  { %v66_v40 = vmul.f32 0.5, %v65_v39 }
  0x8d   :  { %v67_v41 = vsub.f32 1.5, %v66_v40 }
  0x8e   :  { %v532_v42 = vpop.eup %531 }
  0x8f   :  { %v74_v43 = vmul.f32 %v532_v42, %v62_v37  ;;  %v68_v44 = vmul.f32 %v530_v36, %v67_v41  ;;  %vm80_vm5 = vweird.f32 %v532_v42 }
  0x90   :  { %vm81_vm7 = vmor %vm79_vm6, %vm80_vm5  ;;  %vm374_vm5 = vcmask 523264  }
  0x91   :  { %v75_v45 = vmul.f32 %v532_v42, %v74_v43  ;;  %v72_v47 = vsel %vm71_vm4, %v530_v36, %v68_v44 }
  0x92   :  { %v83_v50 = vmul.f32 %v72_v47, %v602_v0  ;;  %v90_v52 = vmul.f32 %v72_v47, %v607_v1 }
  0x93   :  { %v76_v46 = vmul.f32 0.5, %v75_v45 }
  0x94   :  { %v88_v56 = vmul.f32 %v520_v51, %v83_v50  ;;  %v92_v58 = vmul.f32 %v520_v51, %v90_v52 }
  0x95   :  { %v77_v48 = vsub.f32 1.5, %v76_v46 }
  0x97   :  { %v78_v49 = vmul.f32 %v532_v42, %v77_v48 }
  0x99   :  { %v82_v53 = vsel %vm81_vm7, %v532_v42, %v78_v49 }
  0x9a   :  { %v84_v54 = vmul.f32 %v82_v53, %v612_v2  ;;  %v91_v55 = vmul.f32 %v82_v53, %v621_v5 }
  0x9c   :  { %v89_v57 = vmul.f32 %v520_v51, %v84_v54  ;;  %v93_v59 = vmul.f32 %v520_v51, %v91_v55 }
  0x9e   :  { %v98_v60 = vpack.c.bf16 %v89_v57, %v88_v56  ;;  %v150_v61 = vpack.c.bf16 %v93_v59, %v92_v58 }
  0xa0   :  { %484 = vmatmul.msk.bf16.vlgmr.msra.gmra.mxu0 %vm45_vm0, %v98_v60  ;;  %485 = vmatmul.msk.bf16.vlgmr.msra.gmra.mxu1 %vm45_vm0, %v98_v60 }
  0xa1   :  { %486 = vmatmul.msk.bf16.vlgmr.msra.gmra.mxu2 %vm45_vm0, %v150_v61  ;;  %487 = vmatmul.msk.bf16.vlgmr.msra.gmra.mxu3 %vm45_vm0, %v150_v61 }
 0x11d   :  { %v131_v8 = vpop.f32.mrf.mxu0  ;;  %v692_v31 = vpop.f32.mrf.mxu1 }
 0x124   :  { %v163_v3 = vpop.f32.mrf.mxu2  ;;  %v177_v18 = vpop.f32.mrf.mxu3 }
 0x125   :  { %v183_v4 = vmul.f32 %v671_v63, %v163_v3  ;;  %201 = vrot.lane.b32.xlu1 %v163_v3, %s546_s12  ;;  %v133_v14 = vpop.f32.mrf.mxu0  ;;  %v217_v22 = vmul.f32 %v671_v63, %v177_v18  ;;  %v694_v34 = vpop.f32.mrf.mxu1 }
 0x127   :  { %187 = vrot.lane.b32.xlu2 %v183_v4, %s546_s12 }
 0x12c   :  { %v165_v6 = vpop.f32.mrf.mxu2  ;;  %v179_v21 = vpop.f32.mrf.mxu3 }
 0x12d   :  { %v184_v7 = vmul.f32 %v671_v63, %v165_v6  ;;  %203 = vrot.lane.b32.xlu1 %v165_v6, %s546_s12  ;;  %v218_v43 = vmul.f32 %v671_v63, %v179_v21 }
 0x12f   :  { %189 = vrot.lane.b32.xlu0 %v184_v7, %s546_s12 }
 0x181   :  { %v188_v23 = vpop.permute.xlu2 %187 }
 0x182   :  { %v193_v25 = vadd.f32 %v188_v23, %v131_v8 }
 0x184   :  { %v197_v26 = vadd.f32 %v522_v24, %v193_v25 }
 0x186   :  { %v251_v27 = vmul.f32 %v197_v26, %v197_v26 }
 0x197   :  { %v202_v9 = vpop.permute.xlu1 %201 }
 0x198   :  { %v207_v10 = vadd.f32 %v202_v9, %v131_v8  ;;  %v515_v9 = vld [vmem:[%s753_s6 + $0x18] sm:$0xff] }
 0x199   :  { %382 = vmatpush.bf16.msrb.mxu0 %v515_v9  ;;  %400 = vmatpush.bf16.msrb.mxu1 %v515_v9 }
 0x19a   :  { %v215_v12 = vadd.f32 %v213_v11, %v207_v10  ;;  %v514_v10 = vld [vmem:[%s753_s6 + $0x10] sm:$0xff] }
 0x19c   :  { %v253_v13 = vmul.f32 %v215_v12, %v215_v12 }
 0x19d   :  { %383 = vmatpush.bf16.msrb.mxu0 %v514_v10  ;;  %401 = vmatpush.bf16.msrb.mxu1 %v514_v10 }
 0x19e   :  { %257 = vrot.lane.b32.xlu1 %v253_v13, %s546_s12 }
 0x19f   :  { %v204_v15 = vpop.permute.xlu1 %203 }
 0x1a0   :  { %v208_v16 = vadd.f32 %v204_v15, %v133_v14  ;;  %v513_v15 = vld [vmem:[%s753_s6 + $0x8] sm:$0xff] }
 0x1a1   :  { %v190_v37 = vpop.permute.xlu0 %189  ;;  %384 = vmatpush.bf16.msrb.mxu0 %v513_v15  ;;  %402 = vmatpush.bf16.msrb.mxu1 %v513_v15 }
 0x1a2   :  { %v216_v17 = vadd.f32 %v213_v11, %v208_v16  ;;  %v194_v41 = vadd.f32 %v190_v37, %v133_v14  ;;  %v512_v16 = vld [vmem:[%s753_s6] sm:$0xff] }
 0x1a4   :  { %v254_v19 = vmul.f32 %v216_v17, %v216_v17  ;;  %v198_v42 = vadd.f32 %v522_v24, %v194_v41 }
 0x1a5   :  { %385 = vmatpush.bf16.msrb.mxu0 %v512_v16  ;;  %403 = vmatpush.bf16.msrb.mxu1 %v512_v16 }
 0x1a6   :  { %235 = vrot.lane.b32.xlu1 %v177_v18, %s546_s12  ;;  %259 = vrot.lane.b32.xlu2 %v254_v19, %s546_s12  ;;  %v252_v44 = vmul.f32 %v198_v42, %v198_v42 }
 0x1ae   :  { %246 = vrot.lane.b32.xlu1 %v523_v20, %s546_s12  ;;  %237 = vrot.lane.b32.xlu2 %v179_v21, %s546_s12 }
 0x1b6   :  { %221 = vrot.lane.b32.xlu1 %v217_v22, %s546_s12 }
 0x200   :  { %v260_v30 = vpop.permute.xlu2 %259 }
 0x201   :  { %v264_v45 = vadd.f32 %v260_v30, %v252_v44 }
 0x203   :  { %vm284_vm9 = vcmp.eq.f32.partialorder %v264_v45, inf  ;;  %v287_v4 = vand.u32 2147483648, %v264_v45  ;;  %vm286_vm11 = vcmp.eq.f32.partialorder %v264_v45, 0.0 }
 0x208   :  { %v238_v33 = vpop.permute.xlu2 %237 }
 0x209   :  { %v242_v35 = vadd.f32 %v238_v33, %v694_v34 }
 0x210   :  { %v258_v28 = vpop.permute.xlu1 %257 }
 0x211   :  { %v263_v29 = vadd.f32 %v258_v28, %v251_v27 }
 0x213   :  { %533 = vrsqrt.f32 %v263_v29  ;;  %vm272_vm8 = vcmp.eq.f32.partialorder %v263_v29, inf  ;;  %v275_v61 = vand.u32 2147483648, %v263_v29  ;;  %vm274_vm10 = vcmp.eq.f32.partialorder %v263_v29, 0.0 }
 0x214   :  { %535 = vrsqrt.f32 %v264_v45 }
 0x218   :  { %v236_v32 = vpop.permute.xlu1 %235 }
 0x219   :  { %v241_v36 = vadd.f32 %v236_v32, %v692_v31  ;;  %v534_v46 = vpop.eup %533 }
 0x21a   :  { %v536_v47 = vpop.eup %535  ;;  %v266_v48 = vmul.f32 %v534_v46, %v263_v29 }
 0x21b   :  { %v278_v49 = vmul.f32 %v536_v47, %v264_v45 }
 0x21c   :  { %v267_v50 = vmul.f32 %v534_v46, %v266_v48 }
 0x21d   :  { %v279_v51 = vmul.f32 %v536_v47, %v278_v49 }
 0x21e   :  { %v268_v52 = vmul.f32 0.5, %v267_v50 }
 0x21f   :  { %v280_v53 = vmul.f32 0.5, %v279_v51 }
 0x220   :  { %v247_v38 = vpop.permute.xlu1 %246  ;;  %v269_v54 = vsub.f32 1.5, %v268_v52 }
 0x221   :  { %v249_v39 = vadd.f32 %v247_v38, %v241_v36  ;;  %v250_v40 = vadd.f32 %v247_v38, %v242_v35  ;;  %v281_v55 = vsub.f32 1.5, %v280_v53 }
 0x222   :  { %v270_v56 = vmul.f32 %v534_v46, %v269_v54 }
 0x223   :  { %333 = vrot.lane.b32.xlu2 %v249_v39, %s546_s12  ;;  %335 = vrot.lane.b32.xlu0 %v250_v40, %s546_s12  ;;  %v282_v57 = vmul.f32 %v536_v47, %v281_v55  ;;  %v524_v40 = vld [vmem:[%s751_s5 + $0x2] ss:$0 sm:$0xff] }
 0x224   :  { %v271_v58 = vmul.f32 %v270_v56, %v263_v29 }
 0x225   :  { %v283_v59 = vmul.f32 %v282_v57, %v264_v45 }
 0x226   :  { %v273_v60 = vsel %vm272_vm8, %v263_v29, %v271_v58 }
 0x227   :  { %v285_v62 = vsel %vm284_vm9, %v264_v45, %v283_v59  ;;  %v276_v3 = vsel %vm274_vm10, %v275_v61, %v273_v60 }
 0x228   :  { %v288_v6 = vsel %vm286_vm11, %v287_v4, %v285_v62  ;;  %v488_v7 = vmul.f32 -1.442695, %v276_v3  ;;  %v222_v35 = vpop.permute.xlu1 %221 }
 0x229   :  { %v489_v8 = vmul.f32 -1.442695, %v288_v6  ;;  %v227_v41 = vadd.f32 %v222_v35, %v692_v31  ;;  %v525_v31 = vld [vmem:[%s754_s7 + $0x1] ss:$0 sm:$0xff] }
 0x22a   :  { %537 = vpow2.f32 %v488_v7 }
 0x22b   :  { %223 = vrot.lane.b32.xlu2 %v218_v43, %s546_s12  ;;  %539 = vpow2.f32 %v489_v8  ;;  %v231_v46 = vadd.f32 %v524_v40, %v227_v41 }
 0x230   :  { %v538_v11 = vpop.eup %537 }
 0x231   :  { %v540_v12 = vpop.eup %539  ;;  %v295_v13 = vadd.f32 1.0, %v538_v11 }
 0x232   :  { %v296_v14 = vadd.f32 1.0, %v540_v12 }
 0x233   :  { %541 = vrcp.f32 %v295_v13  ;;  %v308_v26 = vand.u32 2147483648, %v295_v13  ;;  %vm302_vm13 = vweird.f32 %v295_v13  ;;  %v306_v28 = vand.u32 2147483647, %v295_v13  ;;  %439 = vrot.lane.b32.xlu2 %v525_v31, %s547_s26 }
 0x234   :  { %543 = vrcp.f32 %v296_v14  ;;  %v323_v30 = vand.u32 2147483648, %v296_v14  ;;  %vm317_vm1 = vweird.f32 %v296_v14  ;;  %v321_v33 = vand.u32 2147483647, %v296_v14 }
 0x235   :  { %v309_v36 = vor.u32 1.1754944e-38, %v308_v26  ;;  %vm307_vm3 = vcmp.eq.f32.partialorder %v306_v28, 8.507059e+37 }
 0x236   :  { %v324_v39 = vor.u32 1.1754944e-38, %v323_v30  ;;  %vm322_vm4 = vcmp.eq.f32.partialorder %v321_v33, 8.507059e+37 }
 0x239   :  { %v542_v17 = vpop.eup %541 }
 0x23a   :  { %v544_v18 = vpop.eup %543  ;;  %v298_v19 = vmul.f32 %v542_v17, %v295_v13  ;;  %vm303_vm12 = vweird.f32 %v542_v17 }
 0x23b   :  { %v313_v20 = vmul.f32 %v544_v18, %v296_v14  ;;  %vm318_vm14 = vweird.f32 %v544_v18  ;;  %vm304_vm15 = vmor %vm302_vm13, %vm303_vm12 }
 0x23c   :  { %v299_v21 = vsub.f32 1.0, %v298_v19  ;;  %vm319_vm2 = vmor %vm317_vm1, %vm318_vm14 }
 0x23d   :  { %v314_v22 = vsub.f32 1.0, %v313_v20 }
 0x23e   :  { %v300_v23 = vmul.f32 %v542_v17, %v299_v21 }
 0x23f   :  { %v315_v24 = vmul.f32 %v544_v18, %v314_v22 }
 0x240   :  { %v301_v25 = vadd.f32 %v542_v17, %v300_v23 }
 0x241   :  { %v316_v29 = vadd.f32 %v544_v18, %v315_v24 }
 0x242   :  { %v305_v32 = vsel %vm304_vm15, %v542_v17, %v301_v25 }
 0x243   :  { %v320_v37 = vsel %vm319_vm2, %v544_v18, %v316_v29  ;;  %v310_v38 = vsel %vm307_vm3, %v309_v36, %v305_v32 }
 0x244   :  { %v325_v42 = vsel %vm322_vm4, %v324_v39, %v320_v37  ;;  %v327_v44 = vmul.f32 %v310_v38, %v276_v3 }
 0x245   :  { %v328_v47 = vmul.f32 %v325_v42, %v288_v6  ;;  %v526_v6 = vld [vmem:[%s754_s7] ss:$0 sm:$0xff] }
 0x246   :  { %v329_v49 = vmul.f32 %v327_v44, %v231_v46 }
 0x27d   :  { %v334_v27 = vpop.permute.xlu2 %333 }
 0x27e   :  { %v339_v53 = vmul.f32 %v334_v27, %v327_v44 }
 0x285   :  { %v224_v43 = vpop.permute.xlu2 %223 }
 0x286   :  { %v228_v45 = vadd.f32 %v224_v43, %v694_v34 }
 0x288   :  { %v232_v48 = vadd.f32 %v524_v40, %v228_v45 }
 0x28a   :  { %v330_v50 = vmul.f32 %v328_v47, %v232_v48 }
 0x28c   :  { %v349_v51 = vpack.c.bf16 %v330_v50, %v329_v49 }
 0x28d   :  { %v440_v61 = vpop.permute.xlu2 %439 }
 0x28e   :  { %506 = vmatmul.msk.bf16.vlgmr.msrb.gmra.mxu0 %vm374_vm5, %v349_v51 }
 0x295   :  { %v336_v52 = vpop.permute.xlu0 %335 }
 0x296   :  { %v340_v54 = vmul.f32 %v336_v52, %v328_v47 }
 0x298   :  { %v392_v55 = vpack.c.bf16 %v340_v54, %v339_v53 }
 0x29a   :  { %507 = vmatmul.msk.bf16.vlgmr.msrb.gmra.mxu1 %vm374_vm5, %v392_v55 }
 0x30b   :  { %v387_v59 = vpop.f32.mrf.mxu0 }
 0x313   :  { %v389_v4 = vpop.f32.mrf.mxu0 }
 0x317   :  { %v405_v34 = vpop.f32.mrf.mxu1 }
 0x318   :  { %428 = vrot.lane.b32.xlu0 %v405_v34, %s547_s26  ;;  %v410_v56 = vmul.f32 %v405_v34, %v671_v63 }
 0x31f   :  { %v407_v57 = vpop.f32.mrf.mxu1 }
 0x320   :  { %414 = vrot.lane.b32.xlu0 %v410_v56, %s548_s27  ;;  %430 = vrot.lane.b32.xlu1 %v407_v57, %s547_s26  ;;  %v411_v58 = vmul.f32 %v407_v57, %v671_v63 }
 0x328   :  { %416 = vrot.lane.b32.xlu1 %v411_v58, %s548_s27 }
 0x38a   :  { %v429_v60 = vpop.permute.xlu0 %428 }
 0x38b   :  { %v434_v62 = vadd.f32 %v429_v60, %v387_v59 }
 0x38d   :  { %v442_v3 = vadd.f32 %v440_v61, %v434_v62 }
 0x38f   :  { %450 = vrot.lane.b32.xlu2 %v442_v3, %s548_s27 }
 0x392   :  { %v415_v7 = vpop.permute.xlu0 %414  ;;  %v431_v8 = vpop.permute.xlu1 %430 }
 0x393   :  { %v420_v9 = vadd.f32 %v415_v7, %v387_v59  ;;  %v435_v10 = vadd.f32 %v431_v8, %v389_v4 }
 0x395   :  { %v424_v11 = vadd.f32 %v526_v6, %v420_v9  ;;  %v443_v12 = vadd.f32 %v440_v61, %v435_v10 }
 0x397   :  { %v444_v63 = vadd.f32 %v424_v11, %v602_v0  ;;  %452 = vrot.lane.b32.xlu0 %v443_v12, %s548_s27 }
 0x399   :  { %446 = vst.msk [vmem:[%s755_s8] sm:$0xff] %vm45_vm0, %v444_v63 }
 0x39a   :  { %v417_v13 = vpop.permute.xlu1 %416 }
 0x39b   :  { %v421_v14 = vadd.f32 %v417_v13, %v389_v4 }
 0x39d   :  { %v425_v15 = vadd.f32 %v526_v6, %v421_v14 }
 0x39f   :  { %v445_v16 = vadd.f32 %v425_v15, %v612_v2 }
 0x3a1   :  { %447 = vst.msk [vmem:[%s755_s8 + $0x8] sm:$0xff] %vm45_vm0, %v445_v16 }
 0x3e9   :  { %v451_v17 = vpop.permute.xlu2 %450 }
 0x3ea   :  { %v456_v18 = vadd.f32 %v451_v17, %v607_v1 }
 0x3ec   :  { %458 = vst.msk [vmem:[%s756_s9] sm:$0xff] %vm45_vm0, %v456_v18 }
 0x409   :  { %v453_v0 = vpop.permute.xlu0 %452 }
 0x40a   :  { %v457_v19 = vadd.f32 %v453_v0, %v621_v5 }
 0x40c   :  { %459 = vst.msk [vmem:[%s756_s9 + $0x8] sm:$0xff] %vm45_vm0, %v457_v19 }

// kernel: forward.5
= control target key start
LH: loop header
LB: loop body
LE: loop exit
PB: predicated region body
PF: predicated region fallthrough
CT: control target
= control target key end

     0   :  { %20 = vsyncpa [#allocation6], 0  ;;  %s2205_s28 = smov [#allocation5]   ;;  %s3102_s0 = inlined_call_operand.<no memory space> [shape: f32[1], index: 0, kind: input, shape index: {}]   ;;  %s3103_s1 = inlined_call_operand.vmem [shape: f32[4], index: 1, kind: input, shape index: {}]   ;;  %s3104_s2 = inlined_call_operand.vmem [shape: f32[2,8,32], index: 2, kind: input, shape index: {}]   ;;  %s3105_s3 = inlined_call_operand.vmem [shape: f32[2,8,32], index: 3, kind: input, shape index: {}]   ;;  %s3106_s4 = inlined_call_operand.vmem [shape: f32[1,32], index: 4, kind: input, shape index: {}]   ;;  %s3107_s5 = inlined_call_operand.vmem [shape: bf16[32,192], index: 5, kind: input, shape index: {}]   ;;  %s3108_s6 = inlined_call_operand.vmem [shape: f32[6,32], index: 6, kind: input, shape index: {}]   ;;  %s3109_s7 = inlined_call_operand.vmem [shape: bf16[32,64], index: 7, kind: input, shape index: {}]   ;;  %s3110_s8 = inlined_call_operand.vmem [shape: f32[2,32], index: 8, kind: input, shape index: {}]   ;;  %s3111_s9 = inlined_call_operand.vmem [shape: f32[8,8], index: 9, kind: input, shape index: {}]   ;;  %s3112_s10 = inlined_call_operand.vmem [shape: f32[8,8], index: 10, kind: input, shape index: {}]   ;;  %s3113_s11 = inlined_call_operand.vmem [shape: f32[2,8,8], index: 11, kind: input, shape index: {}]   ;;  %s3114_s12 = inlined_call_operand.vmem [shape: f32[2,8,32], index: 12, kind: output, shape index: {0}]   ;;  %s3115_s13 = inlined_call_operand.vmem [shape: f32[2,8,32], index: 13, kind: output, shape index: {1}]  }
   0x1   :  { %s28_s27 = sshll.u32 %s3103_s1, 4  ;;  %s29_s27 = int_to_ptr.vmem [resolvable:$true] %s28_s27 }
   0x2   :  { %31 = dma.vmem_to_smem %s29_s27, 16, %s2205_s28, [#allocation6]  }
   0x3   :  { %2203 = dma.done.wait [#allocation6], 16  }
   0x4   :  { %2204 = vsyncadd [#allocation6], 4294967280 }
   0x5   :  { %56 = sfence }
   0x6   :  { %v2314_v0 = vld [vmem:[%s3104_s2] sm:$0xff]  ;;  %v2324_v2 = vld [vmem:[%s3104_s2 + $0x8] sm:$0xff]  ;;  %vm70_vm0 = vcmask 261120   ;;  %v2206_v12 = vmov 32.0   ;;  %v1886_v18 = vld [vmem:[%s3107_s5 + $0x10] sm:$0xf]  ;;  %v2383_v63 = vstv %s3102_s0 }
   0x7   :  { %v2319_v1 = vld [vmem:[%s3105_s3] sm:$0xff]  ;;  %v64_v3 = vmul.f32 %v2314_v0, %v2314_v0  ;;  %v2333_v5 = vld [vmem:[%s3105_s3 + $0x8] sm:$0xff]  ;;  %v65_v7 = vmul.f32 %v2324_v2, %v2324_v2  ;;  %2131 = vrcp.f32 %v2206_v12  ;;  %v1936_v19 = vld [vmem:[%s3107_s5 + $0x14] sm:$0xf0]  ;;  %s2207_s19 = smov 64   ;;  %s2208_s22 = smov 32  }
   0x8   :  { %v66_v4 = vmul.f32 %v2319_v1, %v2319_v1  ;;  %v67_v8 = vmul.f32 %v2333_v5, %v2333_v5  ;;  %v1935_v20 = vld [vmem:[%s3107_s5 + $0x14] sm:$0xf]  ;;  %v1887_v21 = vor.u32 %v1936_v19, %v1886_v18  ;;  %v1888_v22 = vld [vmem:[%s3107_s5 + $0x18] sm:$0xf0]  ;;  %v1878_v25 = vld [vmem:[%s3107_s5] sm:$0xf] }
   0x9   :  { %v1891_v23 = vor.u32 %v1935_v20, %v1888_v22  ;;  %v1934_v26 = vld [vmem:[%s3107_s5 + $0x4] sm:$0xf0]  ;;  %v1933_v27 = vld [vmem:[%s3107_s5 + $0x4] sm:$0xf]  ;;  %v1880_v29 = vld [vmem:[%s3107_s5 + $0x8] sm:$0xf0] }
   0xa   :  { %v68_v6 = vadd.f32 %v66_v4, %v64_v3  ;;  %v69_v10 = vadd.f32 %v67_v8, %v65_v7  ;;  %153 = vmatpush.bf16.msra.mxu0 %v1887_v21  ;;  %185 = vmatpush.bf16.msra.mxu2 %v1887_v21  ;;  %v1879_v28 = vor.u32 %v1934_v26, %v1878_v25  ;;  %v2122_v51 = vld [vmem:[%s3106_s4] ss:$0 sm:$0xff]  ;;  %v2123_v62 = vld [vmem:[%s3108_s6 + $0x2] ss:$0 sm:$0xff]  ;;  %s2209_s23 = smov 96   ;;  %s2210_s27 = smov 92  }
   0xb   :  { %167 = vmatpush.bf16.msra.mxu1 %v1891_v23  ;;  %199 = vmatpush.bf16.msra.mxu3 %v1891_v23  ;;  %v1883_v31 = vor.u32 %v1933_v27, %v1880_v29  ;;  %v2124_v4 = vld [vmem:[%s3108_s6 + $0x1] ss:$0 sm:$0xff]  ;;  %s2211_s28 = smov 60   ;;  %s2212_s29 = smov 68   ;;  %vm310_vm8 = vcmask 31744   ;;  %vm428_vm9 = vcmask 64512  }
   0xc   :  { %v71_v9 = vsel %vm70_vm0, %v68_v6, 0.0  ;;  %v74_v11 = vsel %vm70_vm0, %v69_v10, 0.0  ;;  %s2213_s30 = smov 36   ;;  %s2214_s14 = smov 28   ;;  %v2435_v25 = vld [vmem:[%s3111_s9] sm:$0xff]  ;;  %vm474_vm10 = vcmask 130048  }
   0xd   :  { %72 = vadd.xlane.f32.xlu0 %v71_v9  ;;  %v2132_v13 = vpop.eup %2131  ;;  %s2215_s15 = smov 100   ;;  %s2216_s20 = smov 124  }
   0xe   :  { %v78_v14 = vmul.f32 32.0, %v2132_v13  ;;  %vm82_vm1 = vweird.f32 %v2132_v13  ;;  %154 = vmatpush.bf16.msra.mxu0 %v1879_v28  ;;  %186 = vmatpush.bf16.msra.mxu2 %v1879_v28  ;;  %s2217_s21 = smov 4   ;;  %s2218_s24 = smov 72  }
   0xf   :  { %168 = vmatpush.bf16.msra.mxu1 %v1883_v31  ;;  %200 = vmatpush.bf16.msra.mxu3 %v1883_v31  ;;  %s419_s25 = sld [smem:[#allocation5]]  ;;  %s2219_s0 = smov 40  }
  0x10   :  { %v79_v15 = vsub.f32 1.0, %v78_v14  ;;  %s2220_s26 = smov 104   ;;  %s2224_s16 = smov 84  }
  0x11   :  { %s2225_s1 = smov 8   ;;  %s2230_s5 = smov 108  }
  0x12   :  { %v80_v16 = vmul.f32 %v2132_v13, %v79_v15  ;;  %s2231_s4 = smov 12   ;;  %s2234_s18 = smov 112  }
  0x14   :  { %v81_v17 = vadd.f32 %v2132_v13, %v80_v16 }
  0x15   :  { %75 = vadd.xlane.f32.xlu0 %v74_v11 }
  0x16   :  { %v83_v24 = vsel %vm82_vm1, %v2132_v13, %v81_v17 }
  0x29   :  { %246 = vrot.lane.b32.xlu0 %v2123_v62, %s2207_s19 }
  0x80   :  { %v73_v30 = vpop.xlane.xlu0 %72 }
  0x81   :  { %v84_v32 = vmul.f32 %v83_v24, %v73_v30  ;;  %v2452_v30 = vld [vmem:[%s3112_s10] sm:$0xff] }
  0x83   :  { %v86_v33 = vadd.f32 1e-06, %v84_v32 }
  0x85   :  { %2133 = vrsqrt.f32 %v86_v33  ;;  %vm94_vm3 = vweird.f32 %v86_v33 }
  0x88   :  { %v76_v34 = vpop.xlane.xlu0 %75 }
  0x89   :  { %v85_v35 = vmul.f32 %v83_v24, %v76_v34 }
  0x8b   :  { %v2134_v36 = vpop.eup %2133  ;;  %v87_v37 = vadd.f32 1e-06, %v85_v35 }
  0x8c   :  { %v89_v38 = vmul.f32 %v2134_v36, %v86_v33  ;;  %vm95_vm2 = vweird.f32 %v2134_v36 }
  0x8d   :  { %2135 = vrsqrt.f32 %v87_v37  ;;  %vm96_vm4 = vmor %vm94_vm3, %vm95_vm2  ;;  %vm104_vm6 = vweird.f32 %v87_v37  ;;  %vm622_vm2 = vcmask 1043456  }
  0x8e   :  { %v90_v39 = vmul.f32 %v2134_v36, %v89_v38 }
  0x90   :  { %v91_v40 = vmul.f32 0.5, %v90_v39 }
  0x92   :  { %v92_v41 = vsub.f32 1.5, %v91_v40 }
  0x93   :  { %v2136_v42 = vpop.eup %2135 }
  0x94   :  { %v99_v43 = vmul.f32 %v2136_v42, %v87_v37  ;;  %v93_v44 = vmul.f32 %v2134_v36, %v92_v41  ;;  %vm105_vm5 = vweird.f32 %v2136_v42  ;;  %v2126_v41 = vld [vmem:[%s3108_s6] ss:$0 sm:$0xff] }
  0x95   :  { %vm106_vm7 = vmor %vm104_vm6, %vm105_vm5 }
  0x96   :  { %v100_v45 = vmul.f32 %v2136_v42, %v99_v43  ;;  %v97_v47 = vsel %vm96_vm4, %v2134_v36, %v93_v44 }
  0x97   :  { %v108_v50 = vmul.f32 %v97_v47, %v2314_v0  ;;  %v115_v52 = vmul.f32 %v97_v47, %v2319_v1 }
  0x98   :  { %v101_v46 = vmul.f32 0.5, %v100_v45 }
  0x99   :  { %v113_v56 = vmul.f32 %v2122_v51, %v108_v50  ;;  %v117_v58 = vmul.f32 %v2122_v51, %v115_v52 }
  0x9a   :  { %v102_v48 = vsub.f32 1.5, %v101_v46 }
  0x9b   :  { %v247_v13 = vpop.permute.xlu0 %246 }
  0x9c   :  { %v103_v49 = vmul.f32 %v2136_v42, %v102_v48 }
  0x9e   :  { %v107_v53 = vsel %vm106_vm7, %v2136_v42, %v103_v49 }
  0x9f   :  { %v109_v54 = vmul.f32 %v107_v53, %v2324_v2  ;;  %v116_v55 = vmul.f32 %v107_v53, %v2333_v5  ;;  %v2125_v5 = vld [vmem:[%s3108_s6 + $0x3] ss:$0 sm:$0xff] }
  0xa1   :  { %v114_v57 = vmul.f32 %v2122_v51, %v109_v54  ;;  %v118_v59 = vmul.f32 %v2122_v51, %v116_v55 }
  0xa3   :  { %v123_v60 = vpack.c.bf16 %v114_v57, %v113_v56  ;;  %v175_v61 = vpack.c.bf16 %v118_v59, %v117_v58 }
  0xa5   :  { %1892 = vmatmul.msk.bf16.vlgmr.msra.gmra.mxu0 %vm70_vm0, %v123_v60  ;;  %1893 = vmatmul.msk.bf16.vlgmr.msra.gmra.mxu1 %vm70_vm0, %v123_v60 }
  0xa6   :  { %1894 = vmatmul.msk.bf16.vlgmr.msra.gmra.mxu2 %vm70_vm0, %v175_v61  ;;  %1895 = vmatmul.msk.bf16.vlgmr.msra.gmra.mxu3 %vm70_vm0, %v175_v61 }
 0x122   :  { %v156_v8 = vpop.f32.mrf.mxu0 }
 0x129   :  { %v188_v0 = vpop.f32.mrf.mxu2 }
 0x12a   :  { %227 = vrot.lane.b32.xlu2 %v188_v0, %s2208_s22  ;;  %v210_v1 = vmul.f32 %v2383_v63, %v188_v0  ;;  %v158_v17 = vpop.f32.mrf.mxu0 }
 0x12c   :  { %214 = vrot.lane.b32.xlu1 %v210_v1, %s2209_s23 }
 0x131   :  { %v190_v2 = vpop.f32.mrf.mxu2 }
 0x132   :  { %v211_v3 = vmul.f32 %v2383_v63, %v190_v2  ;;  %229 = vrot.lane.b32.xlu2 %v190_v2, %s2208_s22 }
 0x134   :  { %216 = vrot.lane.b32.xlu1 %v211_v3, %s2209_s23 }
 0x13a   :  { %237 = vrot.lane.b32.xlu2 %v2124_v4, %s2208_s22  ;;  %v433_v4 = vstv %s419_s25  ;;  %s2226_s25 = smov 56  }
 0x13c   :  { %253 = vrot.lane.b32.xlu1 %v2125_v5, %s2209_s23 }
 0x184   :  { %v228_v6 = vpop.permute.xlu2 %227 }
 0x185   :  { %v233_v9 = vadd.f32 %v228_v6, %v156_v8 }
 0x18c   :  { %v230_v7 = vpop.permute.xlu2 %229 }
 0x18d   :  { %v234_v19 = vadd.f32 %v230_v7, %v158_v17 }
 0x194   :  { %v238_v10 = vpop.permute.xlu2 %237 }
 0x195   :  { %v2399_v11 = vadd.f32 %v238_v10, %v233_v9  ;;  %v2421_v24 = vadd.f32 %v238_v10, %v234_v19 }
 0x197   :  { %321 = vrot.lane.b32.xlu1 %v2399_v11, %s2210_s27 }
 0x19e   :  { %v215_v12 = vpop.permute.xlu1 %214 }
 0x19f   :  { %v2403_v14 = vadd.f32 %v215_v12, %v156_v8 }
 0x1a1   :  { %v2406_v15 = vadd.f32 %v247_v13, %v2403_v14  ;;  %v2493_v53 = vadd.f32 %v2126_v41, %v2403_v14 }
 0x1a3   :  { %355 = vrot.lane.b32.xlu1 %v2406_v15, %s2211_s28 }
 0x1a6   :  { %v217_v16 = vpop.permute.xlu1 %216 }
 0x1a7   :  { %v221_v22 = vadd.f32 %v217_v16, %v158_v17 }
 0x1a9   :  { %v2419_v23 = vadd.f32 %v247_v13, %v221_v22  ;;  %v2477_v44 = vadd.f32 %v2126_v41, %v221_v22 }
 0x1ab   :  { %361 = vrot.lane.b32.xlu1 %v2406_v15, %s2212_s29 }
 0x1ae   :  { %v254_v18 = vpop.permute.xlu1 %253 }
 0x1af   :  { %v2411_v20 = vadd.f32 %v254_v18, %v233_v9  ;;  %v2413_v21 = vadd.f32 %v254_v18, %v234_v19 }
 0x1b1   :  { %394 = vrot.lane.b32.xlu2 %v2411_v20, %s2213_s30  ;;  %388 = vrot.lane.b32.xlu0 %v2411_v20, %s2214_s14 }
 0x1b3   :  { %390 = vrot.lane.b32.xlu1 %v2413_v21, %s2214_s14  ;;  %s2223_s14 = smov 116  }
 0x1b9   :  { %396 = vrot.lane.b32.xlu0 %v2413_v21, %s2213_s30  ;;  %357 = vrot.lane.b32.xlu2 %v2419_v23, %s2211_s28  ;;  %s2222_s28 = smov 52  }
 0x1bb   :  { %329 = vrot.lane.b32.xlu1 %v2421_v24, %s2215_s15 }
 0x1c1   :  { %327 = vrot.lane.b32.xlu0 %v2399_v11, %s2215_s15  ;;  %363 = vrot.lane.b32.xlu2 %v2419_v23, %s2212_s29 }
 0x1c9   :  { %402 = vrot.lane.b32.xlu0 %v2435_v25, %s2209_s23  ;;  %323 = vrot.lane.b32.xlu2 %v2421_v24, %s2210_s27  ;;  %s2221_s27 = smov 20  }
 0x1d1   :  { %369 = vrot.lane.b32.xlu2 %v2435_v25, %s2207_s19 }
 0x209   :  { %v2443_v27 = vpop.permute.xlu1 %321 }
 0x20b   :  { %v395_v26 = vpop.permute.xlu2 %394 }
 0x213   :  { %v2445_v28 = vpop.permute.xlu2 %357 }
 0x215   :  { %v2447_v29 = vpop.permute.xlu1 %355 }
 0x21b   :  { %v364_v31 = vpop.permute.xlu2 %363 }
 0x21c   :  { %v368_v32 = vsel %vm310_vm8, %v2445_v28, %v364_v31 }
 0x21d   :  { %v375_v33 = vmul.f32 %v368_v32, %v2452_v30  ;;  %v362_v34 = vpop.permute.xlu1 %361  ;;  %v2127_v32 = vld [vmem:[%s3108_s6 + $0x5] ss:$0 sm:$0xff] }
 0x21e   :  { %v367_v35 = vsel %vm310_vm8, %v2447_v29, %v362_v34 }
 0x21f   :  { %v374_v36 = vmul.f32 %v367_v35, %v2452_v30  ;;  %380 = vrot.lane.b32.xlu2 %v375_v33, %s2207_s19 }
 0x221   :  { %378 = vrot.lane.b32.xlu1 %v374_v36, %s2207_s19 }
 0x223   :  { %v2462_v37 = vpop.permute.xlu0 %388  ;;  %v2482_v47 = vpop.permute.xlu2 %323 }
 0x224   :  { %v400_v38 = vsel %vm310_vm8, %v2462_v37, %v395_v26  ;;  %v2518_v26 = vpop.f32.mrf.mxu3 }
 0x225   :  { %v407_v39 = vmul.f32 %v400_v38, %v2452_v30  ;;  %v2467_v40 = vpop.permute.xlu1 %390 }
 0x227   :  { %336 = vrot.lane.b32.xlu2 %v2435_v25, %s2208_s22  ;;  %411 = vrot.lane.b32.xlu0 %v407_v39, %s2209_s23 }
 0x22b   :  { %v397_v42 = vpop.permute.xlu0 %396  ;;  %v370_v54 = vpop.permute.xlu2 %369 }
 0x22c   :  { %v401_v43 = vsel %vm310_vm8, %v2467_v40, %v397_v42  ;;  %v372_v56 = vmul.f32 %v370_v54, %v2406_v15  ;;  %v373_v57 = vmul.f32 %v370_v54, %v2419_v23  ;;  %v2523_v31 = vpop.f32.mrf.mxu3 }
 0x22d   :  { %v408_v45 = vmul.f32 %v401_v43, %v2452_v30  ;;  %v330_v46 = vpop.permute.xlu1 %329 }
 0x22e   :  { %v334_v48 = vsel %vm310_vm8, %v2482_v47, %v330_v46 }
 0x22f   :  { %300 = vrot.lane.b32.xlu2 %v2477_v44, %s2216_s20  ;;  %413 = vrot.lane.b32.xlu1 %v408_v45, %s2209_s23  ;;  %v342_v51 = vmul.f32 %v334_v48, %v2452_v30 }
 0x233   :  { %v328_v49 = vpop.permute.xlu0 %327 }
 0x234   :  { %v333_v50 = vsel %vm310_vm8, %v2443_v27, %v328_v49 }
 0x235   :  { %v341_v52 = vmul.f32 %v333_v50, %v2452_v30 }
 0x237   :  { %347 = vrot.lane.b32.xlu1 %v342_v51, %s2208_s22  ;;  %345 = vrot.lane.b32.xlu0 %v341_v52, %s2208_s22 }
 0x23b   :  { %v403_v61 = vpop.permute.xlu0 %402 }
 0x23c   :  { %v405_v1 = vmul.f32 %v403_v61, %v2411_v20  ;;  %v406_v2 = vmul.f32 %v403_v61, %v2413_v21 }
 0x23f   :  { %298 = vrot.lane.b32.xlu1 %v2493_v53, %s2216_s20  ;;  %304 = vrot.lane.b32.xlu0 %v2493_v53, %s2217_s21  ;;  %s2235_s20 = smov 16  }
 0x247   :  { %306 = vrot.lane.b32.xlu1 %v2477_v44, %s2217_s21 }
 0x279   :  { %v381_v55 = vpop.permute.xlu2 %380 }
 0x27a   :  { %v385_v59 = vadd.f32 %v381_v55, %v373_v57 }
 0x281   :  { %v337_v10 = vpop.permute.xlu2 %336 }
 0x282   :  { %v339_v13 = vmul.f32 %v337_v10, %v2399_v11  ;;  %v340_v14 = vmul.f32 %v337_v10, %v2421_v24 }
 0x289   :  { %v2535_v33 = vpop.permute.xlu2 %300 }
 0x293   :  { %v379_v58 = vpop.permute.xlu1 %378 }
 0x294   :  { %v384_v60 = vadd.f32 %v379_v58, %v372_v56 }
 0x296   :  { %v1977_v62 = vpack.i.bf16 %v385_v59, %v384_v60 }
 0x298   :  { %1978 = vrot.lane.b32.xlu0 %v1977_v62, %s2218_s24 }
 0x299   :  { %v412_v0 = vpop.permute.xlu0 %411 }
 0x29a   :  { %v417_v3 = vadd.f32 %v412_v0, %v405_v1 }
 0x29c   :  { %v434_v7 = vmul.f32 %v433_v4, %v417_v3 }
 0x2a1   :  { %v414_v5 = vpop.permute.xlu1 %413 }
 0x2a2   :  { %v418_v6 = vadd.f32 %v414_v5, %v406_v2 }
 0x2a4   :  { %v435_v8 = vmul.f32 %v433_v4, %v418_v6  ;;  %v1972_v9 = vpack.i.bf16 %v418_v6, %v417_v3 }
 0x2a6   :  { %1973 = vrot.lane.b32.xlu2 %v1972_v9, %s2208_s22  ;;  %v1987_v12 = vpack.i.bf16 %v435_v8, %v434_v7  ;;  %v313_v7 = vmul.f32 %v2435_v25, %v2493_v53  ;;  %v314_v8 = vmul.f32 %v2435_v25, %v2477_v44 }
 0x2a8   :  { %1988 = vrot.lane.b32.xlu0 %v1987_v12, %s2219_s0 }
 0x2a9   :  { %v348_v16 = vpop.permute.xlu1 %347  ;;  %v346_v17 = vpop.permute.xlu0 %345 }
 0x2aa   :  { %v352_v18 = vadd.f32 %v348_v16, %v340_v14  ;;  %v351_v19 = vadd.f32 %v346_v17, %v339_v13 }
 0x2ac   :  { %v1992_v22 = vpack.i.bf16 %v352_v18, %v351_v19 }
 0x2ae   :  { %1983 = vrot.lane.b32.xlu2 %v1977_v62, %s2207_s19  ;;  %1993 = vrot.lane.b32.xlu1 %v1992_v22, %s2220_s26 }
 0x2b0   :  { %747 = vrot.lane.b32.xlu0 %v2413_v21, %s2221_s27 }
 0x2b1   :  { %v305_v35 = vpop.permute.xlu0 %304  ;;  %v299_v45 = vpop.permute.xlu1 %298 }
 0x2b2   :  { %v311_v58 = vsel %vm310_vm8, %v299_v45, %v305_v35 }
 0x2b6   :  { %745 = vrot.lane.b32.xlu2 %v2411_v20, %s2221_s27  ;;  %720 = vrot.lane.b32.xlu1 %v2406_v15, %s2222_s28  ;;  %s2227_s27 = smov 120  }
 0x2b8   :  { %670 = vrot.lane.b32.xlu0 %v2493_v53, %s2223_s14 }
 0x2b9   :  { %v307_v57 = vpop.permute.xlu1 %306 }
 0x2ba   :  { %v312_v59 = vsel %vm310_vm8, %v2535_v33, %v307_v57 }
 0x2bb   :  { %v316_v2 = vmul.f32 %v312_v59, %v2452_v30 }
 0x2bd   :  { %v318_v14 = vadd.f32 %v316_v2, %v314_v8 }
 0x2be   :  { %722 = vrot.lane.b32.xlu2 %v2419_v23, %s2222_s28  ;;  %672 = vrot.lane.b32.xlu1 %v2477_v44, %s2223_s14  ;;  %s2228_s28 = smov 24   ;;  %s2229_s14 = smov 44  }
 0x2c0   :  { %697 = vrot.lane.b32.xlu0 %v2421_v24, %s2224_s16 }
 0x2c6   :  { %695 = vrot.lane.b32.xlu2 %v2399_v11, %s2224_s16 }
 0x2c8   :  { %277 = vrot.lane.b32.xlu0 %v2518_v26, %s2208_s22 }
 0x2d0   :  { %279 = vrot.lane.b32.xlu0 %v2523_v31, %s2208_s22 }
 0x2d8   :  { %287 = vrot.lane.b32.xlu0 %v2127_v32, %s2208_s22 }
 0x2e0   :  { %753 = vrot.lane.b32.xlu0 %v2435_v25, %s2220_s26 }
 0x2e8   :  { %728 = vrot.lane.b32.xlu0 %v2435_v25, %s2218_s24 }
 0x300   :  { %v1974_v34 = vpop.permute.xlu2 %1973 }
 0x301   :  { %v1976_v39 = vunpack.i.h.bf16 %v1974_v34  ;;  %v1975_v41 = vunpack.i.l.bf16 %v1974_v34 }
 0x308   :  { %v1984_v36 = vpop.permute.xlu2 %1983 }
 0x309   :  { %v1986_v61 = vunpack.i.h.bf16 %v1984_v36  ;;  %v1985_v62 = vunpack.i.l.bf16 %v1984_v36 }
 0x30a   :  { %v1979_v38 = vpop.permute.xlu0 %1978 }
 0x30b   :  { %v1981_v42 = vunpack.i.h.bf16 %v1979_v38  ;;  %v1980_v43 = vunpack.i.l.bf16 %v1979_v38 }
 0x30d   :  { %v470_v46 = vsel %vm428_vm9, %v1975_v41, %v1980_v43  ;;  %v471_v48 = vsel %vm428_vm9, %v1976_v39, %v1981_v42 }
 0x30e   :  { %v472_v49 = vpack.c.bf16 %v470_v46, %v470_v46  ;;  %v473_v50 = vpack.c.bf16 %v471_v48, %v471_v48 }
 0x310   :  { %v2539_v51 = vpop.permute.xlu2 %745  ;;  %v514_v52 = vsel %vm474_vm10, %v472_v49, 0  ;;  %v530_v54 = vsel %vm474_vm10, %v473_v50, 0 }
 0x311   :  { %v751_v55 = vsel %vm310_vm8, %v2539_v51, %v2462_v37  ;;  %523 = vmatpush.bf16.xpose.msrb.mxu2 %v514_v52  ;;  %539 = vmatpush.bf16.xpose.msrb.mxu3 %v530_v54  ;;  %v315_v37 = vmul.f32 %v311_v58, %v2452_v30  ;;  %v2602_v52 = vpop.f32.mrf.mxu1 }
 0x312   :  { %v758_v56 = vmul.f32 %v751_v55, %v2452_v30 }
 0x313   :  { %v317_v13 = vadd.f32 %v315_v37, %v313_v7 }
 0x314   :  { %762 = vrot.lane.b32.xlu2 %v758_v56, %s2220_s26 }
 0x318   :  { %v2586_v43 = vpop.permute.xlu2 %722 }
 0x319   :  { %v2609_v56 = vpop.f32.mrf.mxu1 }
 0x31a   :  { %v1989_v60 = vpop.permute.xlu0 %1988 }
 0x31b   :  { %v1991_v0 = vunpack.i.h.bf16 %v1989_v60  ;;  %v1990_v1 = vunpack.i.l.bf16 %v1989_v60 }
 0x31c   :  { %703 = vrot.lane.b32.xlu2 %v2435_v25, %s2219_s0 }
 0x31d   :  { %v452_v3 = vsel %vm428_vm9, %v1985_v62, %v1990_v1  ;;  %v453_v4 = vsel %vm428_vm9, %v1986_v61, %v1991_v0 }
 0x31e   :  { %v454_v5 = vpack.c.bf16 %v452_v3, %v452_v3  ;;  %v455_v6 = vpack.c.bf16 %v453_v4, %v453_v4 }
 0x320   :  { %v1994_v9 = vpop.permute.xlu1 %1993  ;;  %v479_v10 = vsel %vm474_vm10, %v454_v5, 0  ;;  %v498_v12 = vsel %vm474_vm10, %v455_v6, 0  ;;  %v2615_v1 = vpop.permute.xlu2 %695 }
 0x321   :  { %v1996_v16 = vunpack.i.h.bf16 %v1994_v9  ;;  %v1995_v17 = vunpack.i.l.bf16 %v1994_v9  ;;  %488 = vmatpush.bf16.xpose.msrb.mxu0 %v479_v10  ;;  %507 = vmatpush.bf16.xpose.msrb.mxu1 %v498_v12 }
 0x322   :  { %v2563_v18 = vpop.permute.xlu0 %747 }
 0x323   :  { %v752_v19 = vsel %vm310_vm8, %v2563_v18, %v2467_v40  ;;  %v429_v22 = vsel %vm428_vm9, %v317_v13, %v1995_v17  ;;  %v430_v32 = vsel %vm428_vm9, %v318_v14, %v1996_v16 }
 0x324   :  { %v759_v34 = vmul.f32 %v752_v19, %v2452_v30  ;;  %v431_v35 = vpack.c.bf16 %v429_v22, %v429_v22  ;;  %v432_v36 = vpack.c.bf16 %v430_v32, %v430_v32 }
 0x326   :  { %764 = vrot.lane.b32.xlu1 %v759_v34, %s2220_s26  ;;  %1898 = vmatmul.msk.bf16.vlgmr.msrb.gmra.mxu2 %vm474_vm10, %v431_v35 }
 0x327   :  { %1899 = vmatmul.msk.bf16.vlgmr.msrb.gmra.mxu3 %vm474_vm10, %v432_v36 }
 0x328   :  { %v2574_v38 = vpop.permute.xlu1 %720  ;;  %1896 = vmatmul.msk.bf16.vlgmr.msrb.gmra.mxu0 %vm474_vm10, %v431_v35  ;;  %1897 = vmatmul.msk.bf16.vlgmr.msrb.gmra.mxu1 %vm474_vm10, %v432_v36 }
 0x329   :  { %v726_v40 = vsel %vm310_vm8, %v2574_v38, %v2447_v29  ;;  %v727_v29 = vsel %vm310_vm8, %v2586_v43, %v2445_v28 }
 0x32a   :  { %v2581_v39 = vpop.permute.xlu0 %670  ;;  %v733_v41 = vmul.f32 %v726_v40, %v2452_v30  ;;  %v734_v48 = vmul.f32 %v727_v29, %v2452_v30 }
 0x32b   :  { %v676_v42 = vsel %vm310_vm8, %v2581_v39, %v299_v45 }
 0x32c   :  { %v683_v46 = vmul.f32 %v676_v42, %v2452_v30  ;;  %737 = vrot.lane.b32.xlu0 %v733_v41, %s2218_s24 }
 0x32e   :  { %687 = vrot.lane.b32.xlu1 %v683_v46, %s2225_s1 }
 0x330   :  { %v2598_v50 = vpop.permute.xlu1 %672 }
 0x331   :  { %v677_v54 = vsel %vm310_vm8, %v2598_v50, %v2535_v33 }
 0x332   :  { %v2595_v49 = vpop.permute.xlu0 %697  ;;  %v684_v28 = vmul.f32 %v677_v54, %v2452_v30 }
 0x334   :  { %739 = vrot.lane.b32.xlu0 %v734_v48, %s2218_s24  ;;  %s2236_s24 = smov 48  }
 0x33a   :  { %v278_v45 = vpop.permute.xlu0 %277 }
 0x33b   :  { %v283_v57 = vadd.f32 %v278_v45, %v2602_v52 }
 0x33c   :  { %678 = vrot.lane.b32.xlu0 %v2435_v25, %s2225_s1 }
 0x342   :  { %v280_v55 = vpop.permute.xlu0 %279 }
 0x343   :  { %v284_v58 = vadd.f32 %v280_v55, %v2609_v56 }
 0x344   :  { %689 = vrot.lane.b32.xlu0 %v684_v28, %s2225_s1 }
 0x34a   :  { %v288_v59 = vpop.permute.xlu0 %287 }
 0x34b   :  { %v290_v60 = vadd.f32 %v288_v59, %v283_v57  ;;  %v291_v61 = vadd.f32 %v288_v59, %v284_v58 }
 0x34d   :  { %v2613_v62 = vpack.i.bf16 %v291_v61, %v290_v60 }
 0x352   :  { %v754_v0 = vpop.permute.xlu0 %753 }
 0x353   :  { %v756_v2 = vmul.f32 %v754_v0, %v2411_v20  ;;  %v757_v3 = vmul.f32 %v754_v0, %v2413_v21 }
 0x35a   :  { %v729_v33 = vpop.permute.xlu0 %728 }
 0x35b   :  { %v731_v9 = vmul.f32 %v729_v33, %v2406_v15  ;;  %v732_v10 = vmul.f32 %v729_v33, %v2419_v23 }
 0x36e   :  { %v763_v37 = vpop.permute.xlu2 %762 }
 0x36f   :  { %v2619_v5 = vadd.f32 %v763_v37, %v756_v2 }
 0x398   :  { %v765_v4 = vpop.permute.xlu1 %764 }
 0x399   :  { %v2621_v6 = vadd.f32 %v765_v4, %v757_v3 }
 0x39b   :  { %v2012_v7 = vpack.i.bf16 %v2621_v6, %v2619_v5 }
 0x39e   :  { %v738_v8 = vpop.permute.xlu0 %737 }
 0x39f   :  { %v743_v16 = vadd.f32 %v738_v8, %v731_v9  ;;  %v2632_v8 = vld [vmem:[%s3113_s11] sm:$0xff] }
 0x3a0   :  { %vm579_vm15 = vcmp.eq.f32.partialorder %v2632_v8, 0.0 }
 0x3a5   :  { %v490_v12 = vpop.f32.mrf.mxu0  ;;  %v509_v13 = vpop.f32.mrf.mxu1 }
 0x3a6   :  { %v740_v14 = vpop.permute.xlu0 %739  ;;  %v545_v32 = vmul.f32 %v490_v12, %v490_v12  ;;  %v546_v36 = vmul.f32 %v509_v13, %v509_v13 }
 0x3a7   :  { %v744_v17 = vadd.f32 %v740_v14, %v732_v10  ;;  %v2637_v10 = vld [vmem:[%s3113_s11 + $0x8] sm:$0xff]  ;;  %s1902_s11 = sld [smem:[#allocation5 + $0x1]] }
 0x3a8   :  { %vm580_vm1 = vcmp.eq.f32.partialorder %v2637_v10, 0.0 }
 0x3a9   :  { %v2627_v19 = vpack.i.bf16 %v744_v17, %v743_v16  ;;  %v525_v22 = vpop.f32.mrf.mxu2 }
 0x3aa   :  { %v547_v34 = vmul.f32 %v525_v22, %v525_v22  ;;  %v541_v35 = vpop.f32.mrf.mxu3 }
 0x3ab   :  { %v548_v40 = vmul.f32 %v541_v35, %v541_v35 }
 0x3ac   :  { %v549_v41 = vadd.f32 %v547_v34, %v545_v32 }
 0x3ad   :  { %v550_v42 = vadd.f32 %v548_v40, %v546_v36  ;;  %v492_v46 = vpop.f32.mrf.mxu0  ;;  %v511_v29 = vpop.f32.mrf.mxu1 }
 0x3ae   :  { %v551_v48 = vadd.f32 1e-08, %v549_v41  ;;  %v701_v46 = vsel %vm310_vm8, %v2615_v1, %v2443_v27  ;;  %v702_v29 = vsel %vm310_vm8, %v2595_v49, %v2482_v47  ;;  %v261_v27 = vmul.f32 %v2383_v63, %v2523_v31  ;;  %v679_v47 = vpop.permute.xlu0 %678 }
 0x3af   :  { %v552_v45 = vadd.f32 1e-08, %v550_v42  ;;  %v681_v31 = vmul.f32 %v679_v47, %v2493_v53 }
 0x3b0   :  { %2137 = vrsqrt.f32 %v551_v48  ;;  %vm560_vm11 = vcmp.eq.f32.partialorder %v551_v48, inf  ;;  %v563_v13 = vand.u32 2147483648, %v551_v48  ;;  %vm562_vm13 = vcmp.eq.f32.partialorder %v551_v48, 0.0 }
 0x3b1   :  { %2139 = vrsqrt.f32 %v552_v45  ;;  %v527_v54 = vpop.f32.mrf.mxu2  ;;  %vm572_vm12 = vcmp.eq.f32.partialorder %v552_v45, inf  ;;  %v575_v14 = vand.u32 2147483648, %v552_v45  ;;  %vm574_vm14 = vcmp.eq.f32.partialorder %v552_v45, 0.0 }
 0x3b2   :  { %v543_v55 = vpop.f32.mrf.mxu3  ;;  %v260_v54 = vmul.f32 %v2383_v63, %v2518_v26 }
 0x3b3   :  { %v791_v55 = vstv %s1902_s11  ;;  %s1909_s11 = sld [smem:[#allocation5 + $0x2]] }
 0x3b4   :  { %v792_v26 = vmul.f32 %v791_v55, %v2619_v5 }
 0x3b6   :  { %v2138_v28 = vpop.eup %2137 }
 0x3b7   :  { %v2140_v57 = vpop.eup %2139  ;;  %v554_v58 = vmul.f32 %v2138_v28, %v551_v48 }
 0x3b8   :  { %v566_v59 = vmul.f32 %v2140_v57, %v552_v45 }
 0x3b9   :  { %v555_v60 = vmul.f32 %v2138_v28, %v554_v58  ;;  %v690_v58 = vpop.permute.xlu0 %689 }
 0x3ba   :  { %v567_v61 = vmul.f32 %v2140_v57, %v566_v59  ;;  %v682_v59 = vmul.f32 %v679_v47, %v2477_v44 }
 0x3bb   :  { %v556_v0 = vmul.f32 0.5, %v555_v60 }
 0x3bc   :  { %v568_v33 = vmul.f32 0.5, %v567_v61  ;;  %v694_v60 = vadd.f32 %v690_v58, %v682_v59  ;;  %v688_v61 = vpop.permute.xlu1 %687 }
 0x3bd   :  { %v557_v37 = vsub.f32 1.5, %v556_v0  ;;  %v693_v0 = vadd.f32 %v688_v61, %v681_v31 }
 0x3be   :  { %v569_v2 = vsub.f32 1.5, %v568_v33 }
 0x3bf   :  { %v558_v3 = vmul.f32 %v2138_v28, %v557_v37  ;;  %v793_v28 = vmul.f32 %v791_v55, %v2621_v6  ;;  %v2022_v33 = vpack.i.bf16 %v694_v60, %v693_v0  ;;  %v704_v37 = vpop.permute.xlu2 %703 }
 0x3c0   :  { %v570_v4 = vmul.f32 %v2140_v57, %v569_v2 }
 0x3c1   :  { %v559_v9 = vmul.f32 %v558_v3, %v551_v48  ;;  %v2007_v57 = vpack.i.bf16 %v793_v28, %v792_v26 }
 0x3c2   :  { %v571_v12 = vmul.f32 %v570_v4, %v552_v45 }
 0x3c3   :  { %v561_v16 = vsel %vm560_vm11, %v551_v48, %v559_v9  ;;  %v708_v48 = vmul.f32 %v701_v46, %v2452_v30 }
 0x3c4   :  { %v573_v17 = vsel %vm572_vm12, %v552_v45, %v571_v12  ;;  %v564_v22 = vsel %vm562_vm13, %v563_v13, %v561_v16  ;;  %v709_v45 = vmul.f32 %v702_v29, %v2452_v30  ;;  %v2128_v29 = vld [vmem:[%s3108_s6 + $0x4] ss:$0 sm:$0xff]  ;;  %s2232_s6 = smov 76  }
 0x3c5   :  { %v576_v32 = vsel %vm574_vm14, %v575_v14, %v573_v17  ;;  %v577_v34 = vmul.f32 0.35355338, %v564_v22 }
 0x3c6   :  { %v578_v35 = vmul.f32 0.35355338, %v576_v32 }
 0x3c7   :  { %v581_v36 = vsel %vm579_vm15, -1e+09, %v577_v34  ;;  %v706_v34 = vmul.f32 %v704_v37, %v2399_v11 }
 0x3c8   :  { %v582_v40 = vsel %vm580_vm1, -1e+09, %v578_v35  ;;  %v583_v41 = vsel %vm428_vm9, %v581_v36, -inf  ;;  %v707_v35 = vmul.f32 %v704_v37, %v2421_v24 }
 0x3c9   :  { %v586_v42 = vsel %vm428_vm9, %v582_v40, -inf  ;;  %584 = vmax.xlane.f32.xlu1 %v583_v41 }
 0x3ca   :  { %587 = vmax.xlane.f32.xlu2 %v586_v42 }
 0x3e2   :  { %712 = vrot.lane.b32.xlu2 %v708_v48, %s2219_s0  ;;  %714 = vrot.lane.b32.xlu1 %v709_v45, %s2219_s0 }
 0x3ea   :  { %264 = vrot.lane.b32.xlu1 %v260_v54, %s2209_s23 }
 0x3f2   :  { %266 = vrot.lane.b32.xlu1 %v261_v27, %s2209_s23 }
 0x3fa   :  { %1998 = vrot.lane.b32.xlu1 %v2613_v62, %s2220_s26 }
 0x402   :  { %2003 = vrot.lane.b32.xlu1 %v2627_v19, %s2226_s25 }
 0x40a   :  { %2008 = vrot.lane.b32.xlu1 %v2007_v57, %s2208_s22 }
 0x412   :  { %2023 = vrot.lane.b32.xlu1 %v2022_v33, %s2227_s27 }
 0x43c   :  { %v585_v2 = vpop.xlane.xlu1 %584 }
 0x43d   :  { %v588_v3 = vpop.xlane.xlu2 %587  ;;  %v589_v4 = vsub.f32 %v581_v36, %v585_v2 }
 0x43e   :  { %v590_v9 = vsub.f32 %v582_v40, %v588_v3 }
 0x43f   :  { %v591_v12 = vmul.f32 1.442695, %v589_v4 }
 0x440   :  { %v593_v13 = vmul.f32 1.442695, %v590_v9 }
 0x441   :  { %2141 = vpow2.f32 %v591_v12 }
 0x442   :  { %2143 = vpow2.f32 %v593_v13 }
 0x445   :  { %v713_v32 = vpop.permute.xlu2 %712 }
 0x446   :  { %v718_v40 = vadd.f32 %v713_v32, %v706_v34 }
 0x447   :  { %v2673_v14 = vpop.eup %2141 }
 0x448   :  { %v2675_v16 = vpop.eup %2143  ;;  %v595_v17 = vsel %vm428_vm9, %v2673_v14, 0.0 }
 0x449   :  { %v598_v22 = vsel %vm428_vm9, %v2675_v16, 0.0  ;;  %596 = vadd.xlane.f32.xlu0 %v595_v17 }
 0x44a   :  { %599 = vadd.xlane.f32.xlu2 %v598_v22 }
 0x454   :  { %v715_v36 = vpop.permute.xlu1 %714 }
 0x455   :  { %v719_v41 = vadd.f32 %v715_v36, %v707_v35 }
 0x457   :  { %v2027_v42 = vpack.i.bf16 %v719_v41, %v718_v40 }
 0x459   :  { %2028 = vrot.lane.b32.xlu1 %v2027_v42, %s2209_s23 }
 0x45c   :  { %v265_v46 = vpop.permute.xlu1 %264 }
 0x45d   :  { %2013 = vrot.lane.b32.xlu0 %v2012_v7, %s2228_s28  ;;  %v270_v48 = vadd.f32 %v265_v46, %v2602_v52 }
 0x45f   :  { %v273_v27 = vadd.f32 %v2128_v29, %v270_v48 }
 0x461   :  { %1083 = vrot.lane.b32.xlu1 %v2419_v23, %s2229_s14 }
 0x462   :  { %2018 = vrot.lane.b32.xlu2 %v2627_v19, %s2207_s19  ;;  %s2233_s19 = smov 80  }
 0x464   :  { %v267_v45 = vpop.permute.xlu1 %266 }
 0x465   :  { %v271_v54 = vadd.f32 %v267_v45, %v2609_v56  ;;  %1081 = vrot.lane.b32.xlu0 %v2406_v15, %s2229_s14 }
 0x467   :  { %v274_v5 = vadd.f32 %v2128_v29, %v271_v54 }
 0x469   :  { %1031 = vrot.lane.b32.xlu1 %v2493_v53, %s2230_s5  ;;  %v2698_v6 = vpack.i.bf16 %v274_v5, %v273_v27 }
 0x46a   :  { %1108 = vrot.lane.b32.xlu2 %v2413_v21, %s2231_s4 }
 0x46c   :  { %v1999_v7 = vpop.permute.xlu1 %1998 }
 0x46d   :  { %v2001_v19 = vunpack.i.h.bf16 %v1999_v7  ;;  %v2000_v47 = vunpack.i.l.bf16 %v1999_v7  ;;  %1106 = vrot.lane.b32.xlu0 %v2411_v20, %s2231_s4 }
 0x46f   :  { %v613_v52 = vsel %vm428_vm9, %v273_v27, %v2000_v47  ;;  %v614_v56 = vsel %vm428_vm9, %v274_v5, %v2001_v19 }
 0x470   :  { %v615_v55 = vpack.c.bf16 %v613_v52, %v613_v52  ;;  %v616_v28 = vpack.c.bf16 %v614_v56, %v614_v56 }
 0x471   :  { %1058 = vrot.lane.b32.xlu1 %v2421_v24, %s2232_s6 }
 0x472   :  { %1056 = vrot.lane.b32.xlu2 %v2399_v11, %s2232_s6  ;;  %v624_v26 = vsel %vm622_vm2, %v615_v55, 0  ;;  %v643_v57 = vsel %vm622_vm2, %v616_v28, 0 }
 0x473   :  { %633 = vmatpush.bf16.msra.mxu0 %v624_v26  ;;  %652 = vmatpush.bf16.msra.mxu1 %v643_v57 }
 0x474   :  { %v2004_v58 = vpop.permute.xlu1 %2003 }
 0x475   :  { %1033 = vrot.lane.b32.xlu0 %v2477_v44, %s2230_s5  ;;  %v2006_v59 = vunpack.i.h.bf16 %v2004_v58  ;;  %v2005_v60 = vunpack.i.l.bf16 %v2004_v58 }
 0x479   :  { %1089 = vrot.lane.b32.xlu1 %v2435_v25, %s2233_s19 }
 0x47c   :  { %v2009_v31 = vpop.permute.xlu1 %2008 }
 0x47d   :  { %v2011_v61 = vunpack.i.h.bf16 %v2009_v31  ;;  %v2010_v0 = vunpack.i.l.bf16 %v2009_v31 }
 0x47f   :  { %v810_v33 = vsel %vm428_vm9, %v2005_v60, %v2010_v0  ;;  %v811_v37 = vsel %vm428_vm9, %v2006_v59, %v2011_v61 }
 0x480   :  { %v812_v2 = vpack.c.bf16 %v810_v33, %v810_v33  ;;  %v813_v3 = vpack.c.bf16 %v811_v37, %v811_v37 }
 0x481   :  { %1114 = vrot.lane.b32.xlu1 %v2435_v25, %s2234_s18 }
 0x482   :  { %v836_v4 = vsel %vm474_vm10, %v812_v2, 0  ;;  %v855_v9 = vsel %vm474_vm10, %v813_v3, 0 }
 0x483   :  { %845 = vmatpush.bf16.xpose.msra.mxu2 %v836_v4  ;;  %864 = vmatpush.bf16.xpose.msra.mxu3 %v855_v9 }
 0x484   :  { %v2024_v22 = vpop.permute.xlu1 %2023 }
 0x485   :  { %v2026_v41 = vunpack.i.h.bf16 %v2024_v22  ;;  %v2025_v42 = vunpack.i.l.bf16 %v2024_v22 }
 0x4bc   :  { %v597_v12 = vpop.xlane.xlu0 %596 }
 0x4bd   :  { %v600_v13 = vpop.xlane.xlu2 %599  ;;  %2145 = vrcp.f32 %v597_v12 }
 0x4be   :  { %2147 = vrcp.f32 %v600_v13 }
 0x4c3   :  { %v2146_v17 = vpop.eup %2145 }
 0x4c4   :  { %v2148_v32 = vpop.eup %2147  ;;  %v603_v34 = vmul.f32 %v2146_v17, %v2673_v14 }
 0x4c5   :  { %v604_v35 = vmul.f32 %v2148_v32, %v2675_v16  ;;  %v2019_v48 = vpop.permute.xlu2 %2018 }
 0x4c6   :  { %v617_v36 = vpack.c.bf16 %v603_v34, %v603_v34  ;;  %v2021_v16 = vunpack.i.h.bf16 %v2019_v48  ;;  %v2020_v7 = vunpack.i.l.bf16 %v2019_v48 }
 0x4c7   :  { %v618_v40 = vpack.c.bf16 %v604_v35, %v604_v35 }
 0x4c8   :  { %1900 = vmatmul.msk.bf16.vlgmr.msra.gmra.mxu0 %vm428_vm9, %v617_v36 }
 0x4c9   :  { %1901 = vmatmul.msk.bf16.vlgmr.msra.gmra.mxu1 %vm428_vm9, %v618_v40 }
 0x4cb   :  { %v2029_v25 = vpop.permute.xlu1 %2028 }
 0x4cc   :  { %v2031_v46 = vunpack.i.h.bf16 %v2029_v25  ;;  %v2030_v29 = vunpack.i.l.bf16 %v2029_v25 }
 0x4cd   :  { %v2751_v2 = vpop.permute.xlu2 %1108 }
 0x4ce   :  { %v787_v45 = vsel %vm428_vm9, %v2025_v42, %v2030_v29  ;;  %v788_v54 = vsel %vm428_vm9, %v2026_v41, %v2031_v46 }
 0x4cf   :  { %v789_v27 = vpack.c.bf16 %v787_v45, %v787_v45  ;;  %v790_v14 = vpack.c.bf16 %v788_v54, %v788_v54  ;;  %v2014_v5 = vpop.permute.xlu0 %2013 }
 0x4d0   :  { %v2016_v19 = vunpack.i.h.bf16 %v2014_v5  ;;  %v2015_v47 = vunpack.i.l.bf16 %v2014_v5 }
 0x4d1   :  { %1903 = vmatmul.msk.bf16.vlgmr.msra.gmra.mxu2 %vm474_vm10, %v789_v27  ;;  %1904 = vmatmul.msk.bf16.vlgmr.msra.gmra.mxu3 %vm474_vm10, %v790_v14 }
 0x4d2   :  { %v828_v52 = vsel %vm428_vm9, %v2015_v47, %v2020_v7  ;;  %v829_v56 = vsel %vm428_vm9, %v2016_v19, %v2021_v16 }
 0x4d3   :  { %v830_v55 = vpack.c.bf16 %v828_v52, %v828_v52  ;;  %v831_v28 = vpack.c.bf16 %v829_v56, %v829_v56  ;;  %v2735_v60 = vpop.permute.xlu1 %1083 }
 0x4d4   :  { %v1088_v61 = vsel %vm310_vm8, %v2735_v60, %v2586_v43  ;;  %v1113_v43 = vsel %vm310_vm8, %v2751_v2, %v2563_v18 }
 0x4d5   :  { %v871_v26 = vsel %vm474_vm10, %v830_v55, 0  ;;  %v887_v57 = vsel %vm474_vm10, %v831_v28, 0  ;;  %v1095_v0 = vmul.f32 %v1088_v61, %v2452_v30  ;;  %v1120_v3 = vmul.f32 %v1113_v43, %v2452_v30 }
 0x4d6   :  { %880 = vmatpush.bf16.xpose.msrb.mxu0 %v871_v26  ;;  %896 = vmatpush.bf16.xpose.msrb.mxu1 %v887_v57  ;;  %v1152_v57 = vstv %s1909_s11 }
 0x4d7   :  { %v2729_v58 = vpop.permute.xlu0 %1081 }
 0x4d8   :  { %v1087_v31 = vsel %vm310_vm8, %v2729_v58, %v2574_v38 }
 0x4d9   :  { %v1094_v59 = vmul.f32 %v1087_v31, %v2452_v30 }
 0x4db   :  { %1098 = vrot.lane.b32.xlu1 %v1094_v59, %s2233_s19  ;;  %v2758_v4 = vpop.permute.xlu1 %1031 }
 0x4dd   :  { %1905 = vmatmul.msk.bf16.vlgmr.msrb.gmra.mxu0 %vm474_vm10, %v789_v27  ;;  %1906 = vmatmul.msk.bf16.vlgmr.msrb.gmra.mxu1 %vm474_vm10, %v790_v14 }
 0x4df   :  { %v2744_v33 = vpop.permute.xlu0 %1106 }
 0x4e0   :  { %v1112_v38 = vsel %vm310_vm8, %v2744_v33, %v2539_v51  ;;  %v1037_v51 = vsel %vm310_vm8, %v2758_v4, %v2581_v39 }
 0x4e1   :  { %v1119_v37 = vmul.f32 %v1112_v38, %v2452_v30  ;;  %v1044_v9 = vmul.f32 %v1037_v51, %v2452_v30 }
 0x4e3   :  { %1100 = vrot.lane.b32.xlu1 %v1095_v0, %s2233_s19  ;;  %v2772_v17 = vpop.permute.xlu1 %1058 }
 0x4e4   :  { %v1063_v39 = vsel %vm310_vm8, %v2772_v17, %v2595_v49 }
 0x4e5   :  { %v1070_v22 = vmul.f32 %v1063_v39, %v2452_v30 }
 0x4e7   :  { %v2765_v12 = vpop.permute.xlu0 %1033 }
 0x4e8   :  { %v1038_v18 = vsel %vm310_vm8, %v2765_v12, %v2598_v50 }
 0x4e9   :  { %v1045_v13 = vmul.f32 %v1038_v18, %v2452_v30 }
 0x4eb   :  { %1123 = vrot.lane.b32.xlu1 %v1119_v37, %s2234_s18  ;;  %v1090_v50 = vpop.permute.xlu1 %1089 }
 0x4f3   :  { %1125 = vrot.lane.b32.xlu1 %v1120_v3, %s2234_s18  ;;  %v1115_v32 = vpop.permute.xlu1 %1114 }
 0x4f4   :  { %v1117_v52 = vmul.f32 %v1115_v32, %v2411_v20  ;;  %v1118_v28 = vmul.f32 %v1115_v32, %v2413_v21 }
 0x4fb   :  { %1048 = vrot.lane.b32.xlu1 %v1044_v9, %s2235_s20  ;;  %v1093_v9 = vmul.f32 %v1090_v50, %v2419_v23 }
 0x503   :  { %1050 = vrot.lane.b32.xlu1 %v1045_v13, %s2235_s20 }
 0x50b   :  { %1075 = vrot.lane.b32.xlu1 %v1070_v22, %s2236_s24  ;;  %v1092_v22 = vmul.f32 %v1090_v50, %v2406_v15 }
 0x513   :  { %2033 = vrot.lane.b32.xlu1 %v2698_v6, %s2227_s27 }
 0x51b   :  { %2038 = vrot.lane.b32.xlu1 %v2613_v62, %s2209_s23 }
 0x545   :  { %v2784_v34 = vpop.f32.mrf.mxu0 }
 0x546   :  { %658 = vst.msk [vmem:[#allocation2] sm:$0xff] %vm428_vm9, %v2784_v34  ;;  %v2788_v35 = vpop.f32.mrf.mxu1 }
 0x547   :  { %659 = vst.msk [vmem:[#allocation2 + $0x8] sm:$0xff] %vm428_vm9, %v2788_v35 }
 0x54d   :  { %v1099_v30 = vpop.permute.xlu1 %1098  ;;  %v637_v49 = vpop.f32.mrf.mxu0 }
 0x54e   :  { %v656_v36 = vpop.f32.mrf.mxu1 }
 0x554   :  { %v847_v40 = vpop.f32.mrf.mxu2  ;;  %v866_v25 = vpop.f32.mrf.mxu3 }
 0x555   :  { %v1101_v41 = vpop.permute.xlu1 %1100  ;;  %v902_v29 = vmul.f32 %v847_v40, %v847_v40  ;;  %v903_v48 = vmul.f32 %v866_v25, %v866_v25  ;;  %v1104_v25 = vadd.f32 %v1099_v30, %v1092_v22 }
 0x556   :  { %v1105_v32 = vadd.f32 %v1101_v41, %v1093_v9 }
 0x55a   :  { %v882_v42 = vpop.f32.mrf.mxu0  ;;  %v898_v46 = vpop.f32.mrf.mxu1 }
 0x55b   :  { %v904_v45 = vmul.f32 %v882_v42, %v882_v42  ;;  %v905_v54 = vmul.f32 %v898_v46, %v898_v46 }
 0x55c   :  { %v849_v27 = vpop.f32.mrf.mxu2  ;;  %v868_v14 = vpop.f32.mrf.mxu3 }
 0x55d   :  { %v906_v5 = vadd.f32 %v904_v45, %v902_v29  ;;  %v907_v16 = vadd.f32 %v905_v54, %v903_v48  ;;  %v1124_v7 = vpop.permute.xlu1 %1123  ;;  %v2047_v29 = vpack.i.bf16 %v1105_v32, %v1104_v25  ;;  %v2836_v25 = vld [vmem:[%s3112_s10] sm:$0xff]  ;;  %s2237_s10 = smov 88  }
 0x55e   :  { %v1129_v26 = vadd.f32 %v1124_v7, %v1117_v52 }
 0x55f   :  { %v908_v19 = vadd.f32 1e-08, %v906_v5  ;;  %v909_v47 = vadd.f32 1e-08, %v907_v16 }
 0x560   :  { %v2794_v38 = vmul.f32 %v1152_v57, %v1129_v26 }
 0x561   :  { %2149 = vrsqrt.f32 %v908_v19  ;;  %vm917_vm3 = vcmp.eq.f32.partialorder %v908_v19, inf  ;;  %v920_v14 = vand.u32 2147483648, %v908_v19  ;;  %vm929_vm4 = vcmp.eq.f32.partialorder %v909_v47, inf }
 0x562   :  { %2151 = vrsqrt.f32 %v909_v47  ;;  %v884_v56 = vpop.f32.mrf.mxu0  ;;  %v900_v55 = vpop.f32.mrf.mxu1  ;;  %v932_v5 = vand.u32 2147483648, %v909_v47  ;;  %vm919_vm5 = vcmp.eq.f32.partialorder %v908_v19, 0.0  ;;  %vm931_vm6 = vcmp.eq.f32.partialorder %v909_v47, 0.0 }
 0x565   :  { %v1126_v31 = vpop.permute.xlu1 %1125 }
 0x566   :  { %v1130_v59 = vadd.f32 %v1126_v31, %v1118_v28 }
 0x567   :  { %v2150_v61 = vpop.eup %2149 }
 0x568   :  { %v2152_v0 = vpop.eup %2151  ;;  %v2042_v37 = vpack.i.bf16 %v1130_v59, %v1129_v26  ;;  %v2796_v43 = vmul.f32 %v1152_v57, %v1130_v59  ;;  %v911_v3 = vmul.f32 %v2150_v61, %v908_v19  ;;  %v2815_v59 = vpop.permute.xlu2 %1056 }
 0x569   :  { %v923_v51 = vmul.f32 %v2152_v0, %v909_v47 }
 0x56a   :  { %2043 = vrot.lane.b32.xlu1 %v2042_v37, %s2235_s20  ;;  %v912_v18 = vmul.f32 %v2150_v61, %v911_v3  ;;  %v2057_v13 = vpack.i.bf16 %v2796_v43, %v2794_v38 }
 0x56b   :  { %v924_v39 = vmul.f32 %v2152_v0, %v923_v51  ;;  %v2820_v51 = vld [vmem:[%s3111_s9] sm:$0xff] }
 0x56c   :  { %v913_v49 = vmul.f32 0.5, %v912_v18 }
 0x56d   :  { %v2803_v36 = vpop.permute.xlu1 %1048  ;;  %v925_v40 = vmul.f32 0.5, %v924_v39  ;;  %v1062_v39 = vsel %vm310_vm8, %v2815_v59, %v2615_v1 }
 0x56e   :  { %v914_v42 = vsub.f32 1.5, %v913_v49 }
 0x56f   :  { %v926_v46 = vsub.f32 1.5, %v925_v40 }
 0x570   :  { %v915_v48 = vmul.f32 %v2150_v61, %v914_v42  ;;  %v1069_v42 = vmul.f32 %v2836_v25, %v1062_v39 }
 0x571   :  { %v927_v45 = vmul.f32 %v2152_v0, %v926_v46 }
 0x572   :  { %2048 = vrot.lane.b32.xlu1 %v2047_v29, %s2226_s25  ;;  %v916_v54 = vmul.f32 %v915_v48, %v908_v19 }
 0x573   :  { %v928_v27 = vmul.f32 %v927_v45, %v909_v47 }
 0x574   :  { %v918_v50 = vsel %vm917_vm3, %v908_v19, %v916_v54 }
 0x575   :  { %v2806_v41 = vpop.permute.xlu1 %1050  ;;  %v930_v16 = vsel %vm929_vm4, %v909_v47, %v928_v27  ;;  %v921_v30 = vsel %vm919_vm5, %v920_v14, %v918_v50 }
 0x576   :  { %v933_v7 = vsel %vm931_vm6, %v932_v5, %v930_v16  ;;  %v934_v52 = vmul.f32 0.35355338, %v921_v30 }
 0x577   :  { %v935_v56 = vmul.f32 0.35355338, %v933_v7 }
 0x578   :  { %v936_v55 = vsel %vm579_vm15, -1e+09, %v934_v52 }
 0x579   :  { %v937_v28 = vsel %vm580_vm1, -1e+09, %v935_v56  ;;  %v938_v26 = vsel %vm428_vm9, %v936_v55, -inf }
 0x57a   :  { %2053 = vrot.lane.b32.xlu1 %v2047_v29, %s2236_s24  ;;  %v941_v19 = vsel %vm428_vm9, %v937_v28, -inf  ;;  %939 = vmax.xlane.f32.xlu0 %v938_v26 }
 0x57b   :  { %942 = vmax.xlane.f32.xlu2 %v941_v19 }
 0x57d   :  { %v1076_v57 = vpop.permute.xlu1 %1075 }
 0x585   :  { %v2034_v47 = vpop.permute.xlu1 %2033 }
 0x586   :  { %v2036_v61 = vunpack.i.h.bf16 %v2034_v47  ;;  %v2035_v0 = vunpack.i.l.bf16 %v2034_v47 }
 0x58d   :  { %v2039_v31 = vpop.permute.xlu1 %2038 }
 0x58e   :  { %v2041_v37 = vunpack.i.h.bf16 %v2039_v31  ;;  %v2040_v3 = vunpack.i.l.bf16 %v2039_v31  ;;  %1064 = vrot.lane.b32.xlu0 %v2820_v51, %s2236_s24 }
 0x590   :  { %v974_v9 = vsel %vm428_vm9, %v2035_v0, %v2040_v3  ;;  %v975_v18 = vsel %vm428_vm9, %v2036_v61, %v2041_v37 }
 0x591   :  { %v976_v22 = vpack.c.bf16 %v974_v9, %v974_v9  ;;  %v977_v32 = vpack.c.bf16 %v975_v18, %v975_v18 }
 0x593   :  { %v984_v49 = vsel %vm622_vm2, %v976_v22, 0  ;;  %v1003_v40 = vsel %vm622_vm2, %v977_v32, 0  ;;  %1039 = vrot.lane.b32.xlu2 %v2820_v51, %s2235_s20 }
 0x594   :  { %993 = vmatpush.bf16.msrb.mxu2 %v984_v49  ;;  %1012 = vmatpush.bf16.msrb.mxu3 %v1003_v40 }
 0x596   :  { %1073 = vrot.lane.b32.xlu0 %v1069_v42, %s2236_s24 }
 0x5dc   :  { %v2044_v1 = vpop.permute.xlu1 %2043 }
 0x5dd   :  { %v2046_v29 = vunpack.i.h.bf16 %v2044_v1  ;;  %v2045_v48 = vunpack.i.l.bf16 %v2044_v1 }
 0x5e4   :  { %v2049_v46 = vpop.permute.xlu1 %2048 }
 0x5e5   :  { %v2051_v45 = vunpack.i.h.bf16 %v2049_v46  ;;  %v2050_v54 = vunpack.i.l.bf16 %v2049_v46 }
 0x5e7   :  { %v1189_v27 = vsel %vm428_vm9, %v2045_v48, %v2050_v54  ;;  %v1190_v14 = vsel %vm428_vm9, %v2046_v29, %v2051_v45 }
 0x5e8   :  { %v1191_v5 = vpack.c.bf16 %v1189_v27, %v1189_v27  ;;  %v1192_v50 = vpack.c.bf16 %v1190_v14, %v1190_v14 }
 0x5ea   :  { %v1232_v16 = vsel %vm474_vm10, %v1191_v5, 0  ;;  %v1248_v30 = vsel %vm474_vm10, %v1192_v50, 0 }
 0x5eb   :  { %1241 = vmatpush.bf16.xpose.msra.mxu2 %v1232_v16  ;;  %1257 = vmatpush.bf16.xpose.msra.mxu3 %v1248_v30 }
 0x5ed   :  { %v940_v7 = vpop.xlane.xlu0 %939 }
 0x5ee   :  { %v943_v52 = vpop.xlane.xlu2 %942  ;;  %v944_v56 = vsub.f32 %v936_v55, %v940_v7 }
 0x5ef   :  { %v945_v26 = vsub.f32 %v937_v28, %v943_v52 }
 0x5f0   :  { %v946_v19 = vmul.f32 1.442695, %v944_v56 }
 0x5f1   :  { %v948_v47 = vmul.f32 1.442695, %v945_v26 }
 0x5f2   :  { %2153 = vpow2.f32 %v946_v19 }
 0x5f3   :  { %2155 = vpow2.f32 %v948_v47 }
 0x5f6   :  { %v1040_v9 = vpop.permute.xlu2 %1039 }
 0x5f7   :  { %v1042_v18 = vmul.f32 %v1040_v9, %v2493_v53  ;;  %v1043_v39 = vmul.f32 %v1040_v9, %v2477_v44 }
 0x5f8   :  { %v2154_v31 = vpop.eup %2153 }
 0x5f9   :  { %v2156_v61 = vpop.eup %2155  ;;  %v950_v0 = vsel %vm428_vm9, %v2154_v31, 0.0  ;;  %v1054_v32 = vadd.f32 %v2803_v36, %v1042_v18  ;;  %v1055_v49 = vadd.f32 %v2806_v41, %v1043_v39 }
 0x5fa   :  { %v953_v37 = vsel %vm428_vm9, %v2156_v61, 0.0  ;;  %951 = vadd.xlane.f32.xlu2 %v950_v0 }
 0x5fb   :  { %954 = vadd.xlane.f32.xlu0 %v953_v37  ;;  %v2062_v46 = vpack.i.bf16 %v1055_v49, %v1054_v32 }
 0x600   :  { %v1065_v3 = vpop.permute.xlu0 %1064 }
 0x601   :  { %v1068_v55 = vmul.f32 %v1065_v3, %v2421_v24  ;;  %v1067_v28 = vmul.f32 %v1065_v3, %v2399_v11 }
 0x603   :  { %v1080_v40 = vadd.f32 %v1076_v57, %v1068_v55 }
 0x608   :  { %v1074_v22 = vpop.permute.xlu0 %1073 }
 0x609   :  { %v1079_v42 = vadd.f32 %v1074_v22, %v1067_v28 }
 0x60b   :  { %v2067_v1 = vpack.i.bf16 %v1080_v40, %v1079_v42 }
 0x60d   :  { %2068 = vrot.lane.b32.xlu1 %v2067_v1, %s2237_s10 }
 0x60f   :  { %2063 = vrot.lane.b32.xlu0 %v2062_v46, %s2234_s18 }
 0x612   :  { %2058 = vrot.lane.b32.xlu2 %v2057_v13, %s2228_s28  ;;  %v2054_v13 = vpop.permute.xlu1 %2053 }
 0x613   :  { %v2056_v57 = vunpack.i.h.bf16 %v2054_v13  ;;  %v2055_v45 = vunpack.i.l.bf16 %v2054_v13 }
 0x615   :  { %1471 = vrot.lane.b32.xlu1 %v2411_v20, %s2217_s21 }
 0x617   :  { %1448 = vrot.lane.b32.xlu0 %v2419_v23, %s2213_s30 }
 0x61a   :  { %1446 = vrot.lane.b32.xlu2 %v2406_v15, %s2213_s30 }
 0x61d   :  { %1473 = vrot.lane.b32.xlu1 %v2413_v21, %s2217_s21 }
 0x61f   :  { %1421 = vrot.lane.b32.xlu0 %v2399_v11, %s2212_s29 }
 0x622   :  { %1398 = vrot.lane.b32.xlu2 %v2477_v44, %s2215_s15 }
 0x625   :  { %1396 = vrot.lane.b32.xlu1 %v2493_v53, %s2215_s15 }
 0x627   :  { %1404 = vrot.lane.b32.xlu0 %v2820_v51, %s2228_s28 }
 0x62d   :  { %1423 = vrot.lane.b32.xlu1 %v2421_v24, %s2212_s29  ;;  %s1916_s29 = sld [smem:[#allocation5 + $0x3]] }
 0x635   :  { %1479 = vrot.lane.b32.xlu1 %v2820_v51, %s2227_s27 }
 0x63d   :  { %1454 = vrot.lane.b32.xlu1 %v2820_v51, %s2237_s10 }
 0x66d   :  { %v952_v38 = vpop.xlane.xlu2 %951 }
 0x66e   :  { %2157 = vrcp.f32 %v952_v38  ;;  %v955_v43 = vpop.xlane.xlu0 %954 }
 0x66f   :  { %2159 = vrcp.f32 %v955_v43 }
 0x674   :  { %v2158_v36 = vpop.eup %2157 }
 0x675   :  { %v2160_v41 = vpop.eup %2159  ;;  %v958_v29 = vmul.f32 %v2158_v36, %v2154_v31  ;;  %v2059_v48 = vpop.permute.xlu2 %2058 }
 0x676   :  { %v959_v54 = vmul.f32 %v2160_v41, %v2156_v61  ;;  %v2061_v27 = vunpack.i.h.bf16 %v2059_v48  ;;  %v2060_v14 = vunpack.i.l.bf16 %v2059_v48 }
 0x677   :  { %v978_v5 = vpack.c.bf16 %v958_v29, %v958_v29 }
 0x678   :  { %v979_v50 = vpack.c.bf16 %v959_v54, %v959_v54  ;;  %v1171_v16 = vsel %vm428_vm9, %v2055_v45, %v2060_v14  ;;  %v1172_v30 = vsel %vm428_vm9, %v2056_v57, %v2061_v27 }
 0x679   :  { %1907 = vmatmul.msk.bf16.vlgmr.msrb.gmra.mxu2 %vm428_vm9, %v978_v5  ;;  %v1173_v7 = vpack.c.bf16 %v1171_v16, %v1171_v16  ;;  %v1174_v52 = vpack.c.bf16 %v1172_v30, %v1172_v30 }
 0x67a   :  { %1908 = vmatmul.msk.bf16.vlgmr.msrb.gmra.mxu3 %vm428_vm9, %v979_v50 }
 0x67b   :  { %v1197_v56 = vsel %vm474_vm10, %v1173_v7, 0  ;;  %v1216_v26 = vsel %vm474_vm10, %v1174_v52, 0 }
 0x67c   :  { %1206 = vmatpush.bf16.xpose.msra.mxu0 %v1197_v56  ;;  %1225 = vmatpush.bf16.xpose.msra.mxu1 %v1216_v26 }
 0x67d   :  { %v1447_v46 = vpop.permute.xlu2 %1446 }
 0x67f   :  { %v2069_v19 = vpop.permute.xlu1 %2068 }
 0x680   :  { %v2071_v47 = vunpack.i.h.bf16 %v2069_v19  ;;  %v2070_v31 = vunpack.i.l.bf16 %v2069_v19 }
 0x681   :  { %v2064_v61 = vpop.permute.xlu0 %2063 }
 0x682   :  { %v2066_v0 = vunpack.i.h.bf16 %v2064_v61  ;;  %v2065_v37 = vunpack.i.l.bf16 %v2064_v61 }
 0x684   :  { %v1149_v3 = vsel %vm428_vm9, %v2066_v0, %v2071_v47  ;;  %v1148_v9 = vsel %vm428_vm9, %v2065_v37, %v2070_v31 }
 0x685   :  { %v1151_v18 = vpack.c.bf16 %v1149_v3, %v1149_v3  ;;  %v1150_v39 = vpack.c.bf16 %v1148_v9, %v1148_v9  ;;  %v1399_v36 = vpop.permute.xlu2 %1398 }
 0x686   :  { %v1403_v41 = vsel %vm310_vm8, %v1399_v36, %v2765_v12 }
 0x687   :  { %1910 = vmatmul.msk.bf16.vlgmr.msra.gmra.mxu0 %vm474_vm10, %v1150_v39  ;;  %1911 = vmatmul.msk.bf16.vlgmr.msra.gmra.mxu1 %vm474_vm10, %v1151_v18  ;;  %v1472_v55 = vpop.permute.xlu1 %1471 }
 0x688   :  { %v1477_v28 = vsel %vm310_vm8, %v1472_v55, %v2744_v33 }
 0x689   :  { %v1484_v22 = vmul.f32 %v2836_v25, %v1477_v28  ;;  %v1449_v32 = vpop.permute.xlu0 %1448  ;;  %1912 = vmatmul.msk.bf16.vlgmr.msra.gmra.mxu2 %vm474_vm10, %v1150_v39 }
 0x68a   :  { %v1453_v49 = vsel %vm310_vm8, %v1449_v32, %v2735_v60  ;;  %1913 = vmatmul.msk.bf16.vlgmr.msra.gmra.mxu3 %vm474_vm10, %v1151_v18  ;;  %v1452_v60 = vsel %vm310_vm8, %v1447_v46, %v2729_v58  ;;  %v1410_v58 = vmul.f32 %v2836_v25, %v1403_v41 }
 0x68b   :  { %v1460_v40 = vmul.f32 %v2836_v25, %v1453_v49  ;;  %1488 = vrot.lane.b32.xlu1 %v1484_v22, %s2227_s27  ;;  %v1459_v38 = vmul.f32 %v2836_v25, %v1452_v60 }
 0x68d   :  { %1465 = vrot.lane.b32.xlu2 %v1460_v40, %s2237_s10 }
 0x68f   :  { %v1474_v42 = vpop.permute.xlu1 %1473 }
 0x690   :  { %v1478_v33 = vsel %vm310_vm8, %v1474_v42, %v2751_v2 }
 0x691   :  { %v1485_v1 = vmul.f32 %v2836_v25, %v1478_v33 }
 0x693   :  { %1490 = vrot.lane.b32.xlu1 %v1485_v1, %s2227_s27 }
 0x697   :  { %v1397_v43 = vpop.permute.xlu1 %1396 }
 0x698   :  { %v1402_v13 = vsel %vm310_vm8, %v1397_v43, %v2758_v4 }
 0x699   :  { %v1409_v2 = vmul.f32 %v2836_v25, %v1402_v13 }
 0x69b   :  { %1463 = vrot.lane.b32.xlu1 %v1459_v38, %s2237_s10 }
 0x69f   :  { %v2918_v57 = vpop.permute.xlu1 %1423 }
 0x6a3   :  { %1429 = vrot.lane.b32.xlu1 %v2820_v51, %s2226_s25 }
 0x6a7   :  { %v2920_v29 = vpop.permute.xlu1 %1479 }
 0x6ab   :  { %1413 = vrot.lane.b32.xlu1 %v1409_v2, %s2228_s28 }
 0x6af   :  { %v1455_v51 = vpop.permute.xlu1 %1454 }
 0x6b0   :  { %v1457_v7 = vmul.f32 %v1455_v51, %v2406_v15  ;;  %v1458_v52 = vmul.f32 %v1455_v51, %v2419_v23 }
 0x6b3   :  { %1415 = vrot.lane.b32.xlu1 %v1410_v58, %s2228_s28 }
 0x6e7   :  { %v1466_v50 = vpop.permute.xlu2 %1465 }
 0x6e8   :  { %v1470_v37 = vadd.f32 %v1466_v50, %v1458_v52 }
 0x6fc   :  { %v2922_v48 = vpop.f32.mrf.mxu2 }
 0x6fd   :  { %v2924_v4 = vpop.f32.mrf.mxu3  ;;  %v2926_v45 = vpop.permute.xlu1 %1488 }
 0x704   :  { %v1208_v54 = vpop.f32.mrf.mxu0  ;;  %v1227_v27 = vpop.f32.mrf.mxu1 }
 0x705   :  { %v997_v14 = vpop.f32.mrf.mxu2  ;;  %v1016_v5 = vpop.f32.mrf.mxu3  ;;  %v1263_v19 = vmul.f32 %v1208_v54, %v1208_v54  ;;  %v1264_v47 = vmul.f32 %v1227_v27, %v1227_v27 }
 0x706   :  { %v2928_v12 = vpop.permute.xlu1 %1490 }
 0x70c   :  { %v1210_v16 = vpop.f32.mrf.mxu0  ;;  %v1229_v30 = vpop.f32.mrf.mxu1 }
 0x70d   :  { %v1243_v56 = vpop.f32.mrf.mxu2  ;;  %v1259_v26 = vpop.f32.mrf.mxu3 }
 0x70e   :  { %v1265_v31 = vmul.f32 %v1243_v56, %v1243_v56  ;;  %v1266_v61 = vmul.f32 %v1259_v26, %v1259_v26  ;;  %v1464_v0 = vpop.permute.xlu1 %1463  ;;  %v1422_v56 = vpop.permute.xlu0 %1421 }
 0x70f   :  { %v1469_v3 = vadd.f32 %v1464_v0, %v1457_v7  ;;  %v1427_v26 = vsel %vm310_vm8, %v1422_v56, %v2815_v59  ;;  %v1517_v0 = vstv %s1916_s29 }
 0x710   :  { %v1267_v9 = vadd.f32 %v1265_v31, %v1263_v19  ;;  %v1268_v18 = vadd.f32 %v1266_v61, %v1264_v47  ;;  %v1434_v19 = vmul.f32 %v2836_v25, %v1427_v26  ;;  %v1428_v47 = vsel %vm310_vm8, %v2918_v57, %v2772_v17 }
 0x711   :  { %v2932_v39 = vpack.i.bf16 %v1470_v37, %v1469_v3  ;;  %v1435_v31 = vmul.f32 %v2836_v25, %v1428_v47  ;;  %v1483_v61 = vmul.f32 %v2920_v29, %v2413_v21  ;;  %v1482_v17 = vmul.f32 %v2920_v29, %v2411_v20 }
 0x712   :  { %v1269_v55 = vadd.f32 1e-08, %v1267_v9  ;;  %v1270_v28 = vadd.f32 1e-08, %v1268_v18 }
 0x713   :  { %v1495_v57 = vadd.f32 %v2928_v12, %v1483_v61  ;;  %v1494_v25 = vadd.f32 %v2926_v45, %v1482_v17 }
 0x714   :  { %2161 = vrsqrt.f32 %v1269_v55  ;;  %vm1278_vm7 = vcmp.eq.f32.partialorder %v1269_v55, inf  ;;  %v1281_v41 = vand.u32 2147483648, %v1269_v55  ;;  %vm1290_vm11 = vcmp.eq.f32.partialorder %v1270_v28, inf }
 0x715   :  { %2163 = vrsqrt.f32 %v1270_v28  ;;  %v1245_v15 = vpop.f32.mrf.mxu2  ;;  %v1261_v22 = vpop.f32.mrf.mxu3  ;;  %v1293_v58 = vand.u32 2147483648, %v1270_v28  ;;  %vm1280_vm12 = vcmp.eq.f32.partialorder %v1269_v55, 0.0  ;;  %vm1292_vm13 = vcmp.eq.f32.partialorder %v1270_v28, 0.0 }
 0x716   :  { %v1430_v59 = vpop.permute.xlu1 %1429  ;;  %v1519_v37 = vmul.f32 %v1517_v0, %v1495_v57  ;;  %v1518_v3 = vmul.f32 %v1517_v0, %v1494_v25 }
 0x718   :  { %v2087_v18 = vpack.i.bf16 %v1519_v37, %v1518_v3 }
 0x71a   :  { %v2162_v23 = vpop.eup %2161 }
 0x71b   :  { %v2164_v32 = vpop.eup %2163  ;;  %v1272_v49 = vmul.f32 %v2162_v23, %v1269_v55 }
 0x71c   :  { %v1284_v40 = vmul.f32 %v2164_v32, %v1270_v28 }
 0x71d   :  { %v1273_v42 = vmul.f32 %v2162_v23, %v1272_v49 }
 0x71e   :  { %v1285_v33 = vmul.f32 %v2164_v32, %v1284_v40  ;;  %v1414_v9 = vpop.permute.xlu1 %1413 }
 0x71f   :  { %v1274_v1 = vmul.f32 0.5, %v1273_v42 }
 0x720   :  { %v1286_v46 = vmul.f32 0.5, %v1285_v33 }
 0x721   :  { %v1275_v60 = vsub.f32 1.5, %v1274_v1 }
 0x722   :  { %v1287_v38 = vsub.f32 1.5, %v1286_v46 }
 0x723   :  { %v1276_v43 = vmul.f32 %v2162_v23, %v1275_v60 }
 0x724   :  { %v1288_v13 = vmul.f32 %v2164_v32, %v1287_v38 }
 0x725   :  { %v1277_v2 = vmul.f32 %v1276_v43, %v1269_v55 }
 0x726   :  { %v1289_v36 = vmul.f32 %v1288_v13, %v1270_v28  ;;  %v1416_v21 = vpop.permute.xlu1 %1415 }
 0x727   :  { %v1279_v51 = vsel %vm1278_vm7, %v1269_v55, %v1277_v2  ;;  %v1405_v55 = vpop.permute.xlu0 %1404 }
 0x728   :  { %v1291_v54 = vsel %vm1290_vm11, %v1270_v28, %v1289_v36  ;;  %v1282_v27 = vsel %vm1280_vm12, %v1281_v41, %v1279_v51  ;;  %v2092_v28 = vpack.i.bf16 %v1495_v57, %v1494_v25  ;;  %v1408_v15 = vmul.f32 %v1405_v55, %v2477_v44 }
 0x729   :  { %v1294_v14 = vsel %vm1292_vm13, %v1293_v58, %v1291_v54  ;;  %v1295_v5 = vmul.f32 0.35355338, %v1282_v27  ;;  %v1407_v20 = vmul.f32 %v1405_v55, %v2493_v53  ;;  %v1432_v58 = vmul.f32 %v1430_v59, %v2399_v11 }
 0x72a   :  { %v1296_v50 = vmul.f32 0.35355338, %v1294_v14  ;;  %v1420_v29 = vadd.f32 %v1416_v21, %v1408_v15  ;;  %v1433_v27 = vmul.f32 %v1430_v59, %v2421_v24 }
 0x72b   :  { %v1297_v16 = vsel %vm579_vm15, -1e+09, %v1295_v5  ;;  %v1419_v45 = vadd.f32 %v1414_v9, %v1407_v20 }
 0x72c   :  { %v1298_v30 = vsel %vm580_vm1, -1e+09, %v1296_v50  ;;  %v1299_v7 = vsel %vm428_vm9, %v1297_v16, -inf }
 0x72d   :  { %v1302_v52 = vsel %vm428_vm9, %v1298_v30, -inf  ;;  %1300 = vmax.xlane.f32.xlu2 %v1299_v7  ;;  %v2102_v12 = vpack.i.bf16 %v1420_v29, %v1419_v45 }
 0x72e   :  { %1303 = vmax.xlane.f32.xlu0 %v1302_v52 }
 0x742   :  { %1438 = vrot.lane.b32.xlu0 %v1434_v19, %s2226_s25 }
 0x745   :  { %1440 = vrot.lane.b32.xlu2 %v1435_v31, %s2226_s25 }
 0x74d   :  { %2073 = vrot.lane.b32.xlu2 %v2698_v6, %s2234_s18 }
 0x755   :  { %2078 = vrot.lane.b32.xlu2 %v2613_v62, %s2237_s10 }
 0x75d   :  { %2083 = vrot.lane.b32.xlu2 %v2932_v39, %s2219_s0 }
 0x765   :  { %2088 = vrot.lane.b32.xlu2 %v2087_v18, %s2235_s20 }
 0x76d   :  { %2093 = vrot.lane.b32.xlu2 %v2092_v28, %s2225_s1 }
 0x775   :  { %2103 = vrot.lane.b32.xlu2 %v2102_v12, %s2220_s26 }
 0x7a0   :  { %v1301_v22 = vpop.xlane.xlu2 %1300 }
 0x7a1   :  { %v1304_v23 = vpop.xlane.xlu0 %1303  ;;  %v1305_v32 = vsub.f32 %v1297_v16, %v1301_v22 }
 0x7a2   :  { %v1306_v49 = vsub.f32 %v1298_v30, %v1304_v23 }
 0x7a3   :  { %v1307_v40 = vmul.f32 1.442695, %v1305_v32 }
 0x7a4   :  { %v1309_v42 = vmul.f32 1.442695, %v1306_v49 }
 0x7a5   :  { %2165 = vpow2.f32 %v1307_v40 }
 0x7a6   :  { %2167 = vpow2.f32 %v1309_v42 }
 0x7a8   :  { %v1441_v33 = vpop.permute.xlu2 %1440 }
 0x7a9   :  { %v1445_v16 = vadd.f32 %v1441_v33, %v1433_v27 }
 0x7ab   :  { %v2166_v1 = vpop.eup %2165 }
 0x7ac   :  { %v2168_v44 = vpop.eup %2167  ;;  %v1311_v46 = vsel %vm428_vm9, %v2166_v1, 0.0 }
 0x7ad   :  { %v1314_v53 = vsel %vm428_vm9, %v2168_v44, 0.0  ;;  %1312 = vadd.xlane.f32.xlu1 %v1311_v46 }
 0x7ae   :  { %1315 = vadd.xlane.f32.xlu0 %v1314_v53 }
 0x7b0   :  { %v2074_v60 = vpop.permute.xlu2 %2073 }
 0x7b1   :  { %v2076_v43 = vunpack.i.h.bf16 %v2074_v60  ;;  %v2075_v13 = vunpack.i.l.bf16 %v2074_v60 }
 0x7b4   :  { %v1439_v2 = vpop.permute.xlu0 %1438 }
 0x7b5   :  { %v1444_v14 = vadd.f32 %v1439_v2, %v1432_v58 }
 0x7b7   :  { %v2107_v52 = vpack.i.bf16 %v1445_v16, %v1444_v14 }
 0x7b8   :  { %v2079_v38 = vpop.permute.xlu2 %2078 }
 0x7b9   :  { %v2081_v36 = vunpack.i.h.bf16 %v2079_v38  ;;  %v2080_v41 = vunpack.i.l.bf16 %v2079_v38 }
 0x7bb   :  { %v1333_v51 = vsel %vm428_vm9, %v2075_v13, %v2080_v41  ;;  %v1334_v54 = vsel %vm428_vm9, %v2076_v43, %v2081_v36 }
 0x7bc   :  { %v1335_v5 = vpack.c.bf16 %v1333_v51, %v1333_v51  ;;  %v1336_v50 = vpack.c.bf16 %v1334_v54, %v1334_v54 }
 0x7be   :  { %v1343_v30 = vsel %vm622_vm2, %v1335_v5, 0  ;;  %v1362_v7 = vsel %vm622_vm2, %v1336_v50, 0 }
 0x7bf   :  { %1352 = vmatpush.bf16.msrb.mxu0 %v1343_v30  ;;  %1371 = vmatpush.bf16.msrb.mxu1 %v1362_v7 }
 0x7c0   :  { %v2084_v56 = vpop.permute.xlu2 %2083 }
 0x7c1   :  { %v2086_v26 = vunpack.i.h.bf16 %v2084_v56  ;;  %v2085_v24 = vunpack.i.l.bf16 %v2084_v56 }
 0x7c2   :  { %2108 = vrot.lane.b32.xlu0 %v2107_v52, %s2233_s19 }
 0x7c6   :  { %2098 = vrot.lane.b32.xlu1 %v2932_v39, %s2236_s24 }
 0x7c8   :  { %v2089_v11 = vpop.permute.xlu2 %2088 }
 0x7c9   :  { %v2091_v19 = vunpack.i.h.bf16 %v2089_v11  ;;  %v2090_v47 = vunpack.i.l.bf16 %v2089_v11 }
 0x7cb   :  { %v1536_v31 = vsel %vm428_vm9, %v2085_v24, %v2090_v47  ;;  %v1537_v59 = vsel %vm428_vm9, %v2086_v26, %v2091_v19 }
 0x7cc   :  { %v1538_v61 = vpack.c.bf16 %v1536_v31, %v1536_v31  ;;  %v1539_v17 = vpack.c.bf16 %v1537_v59, %v1537_v59 }
 0x7ce   :  { %v1562_v57 = vsel %vm474_vm10, %v1538_v61, 0  ;;  %v1581_v25 = vsel %vm474_vm10, %v1539_v17, 0 }
 0x7cf   :  { %1571 = vmatpush.bf16.xpose.msrb.mxu2 %v1562_v57  ;;  %1590 = vmatpush.bf16.xpose.msrb.mxu3 %v1581_v25 }
 0x7d0   :  { %v2094_v9 = vpop.permute.xlu2 %2093 }
 0x7d1   :  { %v2096_v33 = vunpack.i.h.bf16 %v2094_v9 }
 0x7d8   :  { %v2104_v15 = vpop.permute.xlu2 %2103 }
 0x7d9   :  { %v2106_v29 = vunpack.i.h.bf16 %v2104_v15  ;;  %v2105_v45 = vunpack.i.l.bf16 %v2104_v15 }
 0x820   :  { %v1313_v0 = vpop.xlane.xlu1 %1312 }
 0x821   :  { %v1316_v37 = vpop.xlane.xlu0 %1315  ;;  %2169 = vrcp.f32 %v1313_v0 }
 0x822   :  { %2171 = vrcp.f32 %v1316_v37 }
 0x827   :  { %v2170_v39 = vpop.eup %2169 }
 0x828   :  { %v2172_v3 = vpop.eup %2171  ;;  %v1319_v18 = vmul.f32 %v2170_v39, %v2166_v1  ;;  %v2095_v1 = vunpack.i.l.bf16 %v2094_v9 }
 0x829   :  { %v1320_v55 = vmul.f32 %v2172_v3, %v2168_v44 }
 0x82a   :  { %v1337_v28 = vpack.c.bf16 %v1319_v18, %v1319_v18 }
 0x82b   :  { %v1338_v21 = vpack.c.bf16 %v1320_v55, %v1320_v55 }
 0x82c   :  { %1914 = vmatmul.msk.bf16.vlgmr.msrb.gmra.mxu0 %vm428_vm9, %v1337_v28 }
 0x82d   :  { %1915 = vmatmul.msk.bf16.vlgmr.msrb.gmra.mxu1 %vm428_vm9, %v1338_v21 }
 0x834   :  { %v2109_v20 = vpop.permute.xlu0 %2108 }
 0x835   :  { %v2111_v12 = vunpack.i.h.bf16 %v2109_v20  ;;  %v2110_v22 = vunpack.i.l.bf16 %v2109_v20 }
 0x837   :  { %v1513_v23 = vsel %vm428_vm9, %v2105_v45, %v2110_v22  ;;  %v1514_v32 = vsel %vm428_vm9, %v2106_v29, %v2111_v12 }
 0x838   :  { %v1515_v49 = vpack.c.bf16 %v1513_v23, %v1513_v23  ;;  %v1516_v40 = vpack.c.bf16 %v1514_v32, %v1514_v32  ;;  %v2099_v42 = vpop.permute.xlu1 %2098 }
 0x839   :  { %v2101_v44 = vunpack.i.h.bf16 %v2099_v42  ;;  %v2100_v46 = vunpack.i.l.bf16 %v2099_v42 }
 0x83a   :  { %1917 = vmatmul.msk.bf16.vlgmr.msrb.gmra.mxu2 %vm474_vm10, %v1515_v49  ;;  %1918 = vmatmul.msk.bf16.vlgmr.msrb.gmra.mxu3 %vm474_vm10, %v1516_v40 }
 0x83b   :  { %v1554_v53 = vsel %vm428_vm9, %v2095_v1, %v2100_v46  ;;  %v1555_v60 = vsel %vm428_vm9, %v2096_v33, %v2101_v44 }
 0x83c   :  { %v1556_v38 = vpack.c.bf16 %v1554_v53, %v1554_v53  ;;  %v1557_v43 = vpack.c.bf16 %v1555_v60, %v1555_v60 }
 0x83e   :  { %v1597_v13 = vsel %vm474_vm10, %v1556_v38, 0  ;;  %v1613_v2 = vsel %vm474_vm10, %v1557_v43, 0 }
 0x83f   :  { %1606 = vmatpush.bf16.xpose.msra.mxu0 %v1597_v13  ;;  %1622 = vmatpush.bf16.xpose.msra.mxu1 %v1613_v2 }
 0x846   :  { %1919 = vmatmul.msk.bf16.vlgmr.msra.gmra.mxu0 %vm474_vm10, %v1515_v49  ;;  %1920 = vmatmul.msk.bf16.vlgmr.msra.gmra.mxu1 %vm474_vm10, %v1516_v40 }
 0x8a9   :  { %v2993_v36 = vpop.f32.mrf.mxu0 }
 0x8aa   :  { %v2995_v41 = vpop.f32.mrf.mxu1 }
 0x8b1   :  { %v1356_v58 = vpop.f32.mrf.mxu0 }
 0x8b2   :  { %v1375_v51 = vpop.f32.mrf.mxu1 }
 0x8bd   :  { %v1573_v54 = vpop.f32.mrf.mxu2  ;;  %v1592_v27 = vpop.f32.mrf.mxu3 }
 0x8be   :  { %v1628_v50 = vmul.f32 %v1573_v54, %v1573_v54  ;;  %v1629_v16 = vmul.f32 %v1592_v27, %v1592_v27 }
 0x8c3   :  { %v1608_v14 = vpop.f32.mrf.mxu0  ;;  %v1624_v5 = vpop.f32.mrf.mxu1 }
 0x8c4   :  { %v1630_v30 = vmul.f32 %v1608_v14, %v1608_v14  ;;  %v1631_v7 = vmul.f32 %v1624_v5, %v1624_v5 }
 0x8c5   :  { %v1575_v52 = vpop.f32.mrf.mxu2  ;;  %v1594_v56 = vpop.f32.mrf.mxu3 }
 0x8c6   :  { %v1632_v11 = vadd.f32 %v1630_v30, %v1628_v50  ;;  %v1633_v26 = vadd.f32 %v1631_v7, %v1629_v16 }
 0x8c8   :  { %v1634_v24 = vadd.f32 1e-08, %v1632_v11  ;;  %v1635_v19 = vadd.f32 1e-08, %v1633_v26 }
 0x8ca   :  { %2173 = vrsqrt.f32 %v1634_v24  ;;  %vm1643_vm8 = vcmp.eq.f32.partialorder %v1634_v24, inf  ;;  %v1646_v15 = vand.u32 2147483648, %v1634_v24  ;;  %vm1655_vm10 = vcmp.eq.f32.partialorder %v1635_v19, inf }
 0x8cb   :  { %2175 = vrsqrt.f32 %v1635_v19  ;;  %v1610_v47 = vpop.f32.mrf.mxu0  ;;  %v1626_v31 = vpop.f32.mrf.mxu1  ;;  %v1658_v20 = vand.u32 2147483648, %v1635_v19  ;;  %vm1645_vm14 = vcmp.eq.f32.partialorder %v1634_v24, 0.0  ;;  %vm1657_vm3 = vcmp.eq.f32.partialorder %v1635_v19, 0.0 }
 0x8d0   :  { %v2174_v59 = vpop.eup %2173 }
 0x8d1   :  { %v2176_v61 = vpop.eup %2175  ;;  %v1637_v17 = vmul.f32 %v2174_v59, %v1634_v24 }
 0x8d2   :  { %v1649_v57 = vmul.f32 %v2176_v61, %v1635_v19 }
 0x8d3   :  { %v1638_v25 = vmul.f32 %v2174_v59, %v1637_v17 }
 0x8d4   :  { %v1650_v0 = vmul.f32 %v2176_v61, %v1649_v57 }
 0x8d5   :  { %v1639_v37 = vmul.f32 0.5, %v1638_v25 }
 0x8d6   :  { %v1651_v39 = vmul.f32 0.5, %v1650_v0  ;;  %v1937_v0 = vld [vmem:[%s3109_s7] sm:$0xff] }
 0x8d7   :  { %v1640_v3 = vsub.f32 1.5, %v1639_v37 }
 0x8d8   :  { %v1652_v9 = vsub.f32 1.5, %v1651_v39 }
 0x8d9   :  { %v1641_v18 = vmul.f32 %v2174_v59, %v1640_v3 }
 0x8da   :  { %v1653_v55 = vmul.f32 %v2176_v61, %v1652_v9 }
 0x8db   :  { %v1642_v28 = vmul.f32 %v1641_v18, %v1634_v24 }
 0x8dc   :  { %v1654_v21 = vmul.f32 %v1653_v55, %v1635_v19 }
 0x8dd   :  { %v1644_v29 = vsel %vm1643_vm8, %v1634_v24, %v1642_v28 }
 0x8de   :  { %v1656_v45 = vsel %vm1655_vm10, %v1635_v19, %v1654_v21  ;;  %v1647_v12 = vsel %vm1645_vm14, %v1646_v15, %v1644_v29 }
 0x8df   :  { %v1659_v22 = vsel %vm1657_vm3, %v1658_v20, %v1656_v45  ;;  %v1660_v23 = vmul.f32 0.35355338, %v1647_v12 }
 0x8e0   :  { %v1661_v32 = vmul.f32 0.35355338, %v1659_v22 }
 0x8e1   :  { %v1662_v49 = vsel %vm579_vm15, -1e+09, %v1660_v23  ;;  %vm1026_vm15 = vcmask 130112  }
 0x8e2   :  { %v1663_v40 = vsel %vm580_vm1, -1e+09, %v1661_v32  ;;  %v1664_v42 = vsel %vm428_vm9, %v1662_v49, -inf  ;;  %vm1385_vm1 = vcmask 195712  }
 0x8e3   :  { %v1667_v33 = vsel %vm428_vm9, %v1663_v40, -inf  ;;  %1665 = vmax.xlane.f32.xlu2 %v1664_v42 }
 0x8e4   :  { %1668 = vmax.xlane.f32.xlu0 %v1667_v33 }
 0x8f8   :  { %2118 = vrot.lane.b32.xlu0 %v2613_v62, %s2233_s19 }
 0x900   :  { %1388 = vrot.lane.b32.xlu0 %v2993_v36, %s2225_s1 }
 0x956   :  { %v1666_v1 = vpop.xlane.xlu2 %1665 }
 0x957   :  { %v1669_v44 = vpop.xlane.xlu0 %1668  ;;  %v1670_v46 = vsub.f32 %v1662_v49, %v1666_v1 }
 0x958   :  { %v1671_v8 = vsub.f32 %v1663_v40, %v1669_v44  ;;  %v2130_v44 = vld [vmem:[%s3110_s8] ss:$0 sm:$0xff] }
 0x959   :  { %v1672_v53 = vmul.f32 1.442695, %v1670_v46 }
 0x95a   :  { %v1674_v60 = vmul.f32 1.442695, %v1671_v8 }
 0x95b   :  { %2177 = vpow2.f32 %v1672_v53 }
 0x95c   :  { %2179 = vpow2.f32 %v1674_v60 }
 0x961   :  { %v2178_v10 = vpop.eup %2177 }
 0x962   :  { %v2180_v38 = vpop.eup %2179  ;;  %v1676_v43 = vsel %vm428_vm9, %v2178_v10, 0.0 }
 0x963   :  { %v1679_v13 = vsel %vm428_vm9, %v2180_v38, 0.0  ;;  %1677 = vadd.xlane.f32.xlu1 %v1676_v43 }
 0x964   :  { %1680 = vadd.xlane.f32.xlu2 %v1679_v13 }
 0x97c   :  { %2113 = vrot.lane.b32.xlu2 %v2698_v6, %s2220_s26  ;;  %662 = vrot.lane.b32.xlu1 %v2784_v34, %s2227_s27  ;;  %v2119_v6 = vpop.permute.xlu0 %2118 }
 0x97d   :  { %v2121_v54 = vunpack.i.h.bf16 %v2119_v6  ;;  %v2120_v27 = vunpack.i.l.bf16 %v2119_v6 }
 0x984   :  { %664 = vrot.lane.b32.xlu2 %v2788_v35, %s2227_s27  ;;  %v1389_v31 = vpop.permute.xlu0 %1388 }
 0x98c   :  { %1390 = vrot.lane.b32.xlu2 %v2995_v41, %s2225_s1 }
 0x994   :  { %1020 = vrot.lane.b32.xlu2 %v2922_v48, %s2225_s1 }
 0x99c   :  { %1381 = vrot.lane.b32.xlu2 %v2995_v41, %s2235_s20 }
 0x9d6   :  { %v1678_v62 = vpop.xlane.xlu1 %1677 }
 0x9d7   :  { %v1681_v2 = vpop.xlane.xlu2 %1680  ;;  %2181 = vrcp.f32 %v1678_v62 }
 0x9d8   :  { %2183 = vrcp.f32 %v1681_v2 }
 0x9dd   :  { %v2182_v58 = vpop.eup %2181 }
 0x9de   :  { %v2184_v34 = vpop.eup %2183  ;;  %v1684_v16 = vmul.f32 %v2182_v58, %v2178_v10  ;;  %v2188_v58 = vld [vmem:[%s3104_s2 + $0x8] sm:$0xff] }
 0x9df   :  { %v2114_v51 = vpop.permute.xlu2 %2113  ;;  %v1685_v30 = vmul.f32 %v2184_v34, %v2180_v38 }
 0x9e0   :  { %v2116_v35 = vunpack.i.h.bf16 %v2114_v51  ;;  %v2115_v14 = vunpack.i.l.bf16 %v2114_v51  ;;  %v1702_v11 = vpack.c.bf16 %v1684_v16, %v1684_v16 }
 0x9e1   :  { %v1703_v26 = vpack.c.bf16 %v1685_v30, %v1685_v30 }
 0x9e2   :  { %v1698_v5 = vsel %vm428_vm9, %v2115_v14, %v2120_v27  ;;  %v1699_v50 = vsel %vm428_vm9, %v2116_v35, %v2121_v54  ;;  %v2189_v54 = vld [vmem:[%s3105_s3] sm:$0xff]  ;;  %v2190_v14 = vld [vmem:[%s3105_s3 + $0x8] sm:$0xff] }
 0x9e3   :  { %v1700_v7 = vpack.c.bf16 %v1698_v5, %v1698_v5  ;;  %v1701_v41 = vpack.c.bf16 %v1699_v50, %v1699_v50 }
 0x9e5   :  { %v1708_v52 = vsel %vm622_vm2, %v1700_v7, 0  ;;  %v1727_v56 = vsel %vm622_vm2, %v1701_v41, 0 }
 0x9e6   :  { %1717 = vmatpush.bf16.msra.mxu2 %v1708_v52  ;;  %1736 = vmatpush.bf16.msra.mxu3 %v1727_v56 }
 0x9e7   :  { %v665_v24 = vpop.permute.xlu2 %664 }
 0x9e8   :  { %669 = vst.msk [vmem:[#allocation3 + $0x8] sm:$0xff] %vm428_vm9, %v665_v24 }
 0x9e9   :  { %1030 = vst.msk [vmem:[#allocation3 + $0x8] sm:$0xff] %vm1026_vm15, %v2924_v4  ;;  %1921 = vmatmul.msk.bf16.vlgmr.msra.gmra.mxu2 %vm428_vm9, %v1702_v11  ;;  %1922 = vmatmul.msk.bf16.vlgmr.msra.gmra.mxu3 %vm428_vm9, %v1703_v26 }
 0x9ee   :  { %v663_v19 = vpop.permute.xlu1 %662 }
 0x9ef   :  { %668 = vst.msk [vmem:[#allocation3] sm:$0xff] %vm428_vm9, %v663_v19  ;;  %v1391_v47 = vpop.permute.xlu2 %1390  ;;  %vm1750_vm9 = vcmask 261312  }
 0x9f0   :  { %1029 = vst.msk [vmem:[#allocation3] sm:$0xff] %vm1026_vm15, %v2922_v48  ;;  %v1938_v48 = vld [vmem:[%s3109_s7 + $0x8] sm:$0xff] }
 0x9f1   :  { %1395 = vst.msk [vmem:[#allocation3 + $0x8] sm:$0xff] %vm1385_vm1, %v1391_v47  ;;  %1809 = vmatpush.bf16.msrb.mxu1 %v1938_v48  ;;  %1789 = vmatpush.bf16.msrb.mxu0 %v1938_v48 }
 0x9f2   :  { %1394 = vst.msk [vmem:[#allocation3] sm:$0xff] %vm1385_vm1, %v1389_v31 }
 0x9f5   :  { %1810 = vmatpush.bf16.msrb.mxu1 %v1937_v0  ;;  %1790 = vmatpush.bf16.msrb.mxu0 %v1937_v0 }
 0x9f7   :  { %v1021_v59 = vpop.permute.xlu2 %1020 }
 0x9f8   :  { %1027 = vst.msk [vmem:[#allocation2] sm:$0xff] %vm1026_vm15, %v1021_v59 }
 0x9ff   :  { %v1382_v55 = vpop.permute.xlu2 %1381 }
 0xa6c   :  { %v1719_v61 = vpop.f32.mrf.mxu2  ;;  %v1738_v17 = vpop.f32.mrf.mxu3 }
 0xa6d   :  { %1755 = vrot.lane.b32.xlu1 %v1738_v17, %s2235_s20  ;;  %1753 = vrot.lane.b32.xlu0 %v1719_v61, %s2235_s20 }
 0xa74   :  { %v1721_v57 = vpop.f32.mrf.mxu2  ;;  %v1740_v25 = vpop.f32.mrf.mxu3 }
 0xa75   :  { %1379 = vrot.lane.b32.xlu1 %v2993_v36, %s2235_s20  ;;  %1022 = vrot.lane.b32.xlu0 %v2924_v4, %s2225_s1  ;;  %v2129_v4 = vld [vmem:[%s3110_s8 + $0x1] ss:$0 sm:$0xff] }
 0xa7d   :  { %1746 = vrot.lane.b32.xlu1 %v1738_v17, %s2228_s28  ;;  %1744 = vrot.lane.b32.xlu0 %v1719_v61, %s2228_s28 }
 0xa85   :  { %1846 = vrot.lane.b32.xlu1 %v2129_v4, %s2208_s22 }
 0xadf   :  { %v1756_v36 = vpop.permute.xlu1 %1755  ;;  %v1754_v37 = vpop.permute.xlu0 %1753 }
 0xae0   :  { %1760 = vst.msk [vmem:[#allocation3 + $0x8] sm:$0xff] %vm1750_vm9, %v1756_v36 }
 0xae1   :  { %1759 = vst.msk [vmem:[#allocation3] sm:$0xff] %vm1750_vm9, %v1754_v37 }
 0xae7   :  { %v1380_v39 = vpop.permute.xlu1 %1379  ;;  %v1023_v3 = vpop.permute.xlu0 %1022  ;;  %v1798_v9 = vld [vmem:[#allocation3 + $0x8] sm:$0xff] }
 0xae8   :  { %1386 = vst.msk [vmem:[#allocation2] sm:$0xff] %vm1385_vm1, %v1380_v39  ;;  %v1797_v18 = vld [vmem:[#allocation3] sm:$0xff] }
 0xae9   :  { %1028 = vst.msk [vmem:[#allocation2 + $0x8] sm:$0xff] %vm1026_vm15, %v1023_v3  ;;  %v1799_v28 = vpack.c.bf16 %v1798_v9, %v1797_v18 }
 0xaea   :  { %1387 = vst.msk [vmem:[#allocation2 + $0x8] sm:$0xff] %vm1385_vm1, %v1382_v55 }
 0xaeb   :  { %1932 = vmatmul.msk.bf16.vlgmr.msrb.gmra.mxu1 %vm70_vm0, %v1799_v28 }
 0xaef   :  { %v1747_v21 = vpop.permute.xlu1 %1746  ;;  %v1745_v15 = vpop.permute.xlu0 %1744 }
 0xaf0   :  { %1752 = vst.msk [vmem:[#allocation2 + $0x8] sm:$0xff] %vm1750_vm9, %v1747_v21 }
 0xaf1   :  { %1751 = vst.msk [vmem:[#allocation2] sm:$0xff] %vm1750_vm9, %v1745_v15 }
 0xaf7   :  { %v1766_v20 = vld [vmem:[#allocation2 + $0x8] sm:$0xff]  ;;  %v1847_v42 = vpop.permute.xlu1 %1846 }
 0xaf8   :  { %v1765_v29 = vld [vmem:[#allocation2] sm:$0xff] }
 0xaf9   :  { %v1767_v45 = vpack.c.bf16 %v1766_v20, %v1765_v29 }
 0xafb   :  { %1931 = vmatmul.msk.bf16.vlgmr.msrb.gmra.mxu0 %vm70_vm0, %v1767_v45 }
 0xb68   :  { %v1812_v12 = vpop.f32.mrf.mxu1 }
 0xb69   :  { %1835 = vrot.lane.b32.xlu2 %v1812_v12, %s2208_s22  ;;  %v1817_v22 = vmul.f32 %v1812_v12, %v2383_v63 }
 0xb70   :  { %v1814_v23 = vpop.f32.mrf.mxu1 }
 0xb71   :  { %1821 = vrot.lane.b32.xlu2 %v1817_v22, %s2209_s23  ;;  %1837 = vrot.lane.b32.xlu0 %v1814_v23, %s2208_s22  ;;  %v1818_v32 = vmul.f32 %v1814_v23, %v2383_v63  ;;  %v2187_v63 = vld [vmem:[%s3104_s2] sm:$0xff] }
 0xb78   :  { %v1792_v49 = vpop.f32.mrf.mxu0 }
 0xb79   :  { %1823 = vrot.lane.b32.xlu0 %v1818_v32, %s2209_s23 }
 0xb80   :  { %v1794_v10 = vpop.f32.mrf.mxu0 }
 0xbc3   :  { %v1836_v40 = vpop.permute.xlu2 %1835 }
 0xbc4   :  { %v1841_v33 = vadd.f32 %v1836_v40, %v1792_v49 }
 0xbc6   :  { %v1849_v1 = vadd.f32 %v1847_v42, %v1841_v33 }
 0xbc8   :  { %1857 = vrot.lane.b32.xlu1 %v1849_v1, %s2209_s23 }
 0xbcb   :  { %v1822_v46 = vpop.permute.xlu2 %1821 }
 0xbcc   :  { %v1827_v8 = vadd.f32 %v1822_v46, %v1792_v49 }
 0xbce   :  { %v1831_v53 = vadd.f32 %v2130_v44, %v1827_v8 }
 0xbd0   :  { %v1851_v60 = vadd.f32 %v2187_v63, %v1831_v53 }
 0xbd2   :  { %1853 = vst.msk [vmem:[%s3114_s12] sm:$0xff] %vm70_vm0, %v1851_v60 }
 0xbe3   :  { %v1838_v38 = vpop.permute.xlu0 %1837 }
 0xbe4   :  { %v1842_v43 = vadd.f32 %v1838_v38, %v1794_v10 }
 0xbe6   :  { %v1850_v13 = vadd.f32 %v1847_v42, %v1842_v43 }
 0xbe8   :  { %1859 = vrot.lane.b32.xlu2 %v1850_v13, %s2209_s23 }
 0xbeb   :  { %v1824_v62 = vpop.permute.xlu0 %1823 }
 0xbec   :  { %v1828_v2 = vadd.f32 %v1824_v62, %v1794_v10 }
 0xbee   :  { %v1832_v6 = vadd.f32 %v2130_v44, %v1828_v2 }
 0xbf0   :  { %v1852_v51 = vadd.f32 %v2188_v58, %v1832_v6 }
 0xbf2   :  { %1854 = vst.msk [vmem:[%s3114_s12 + $0x8] sm:$0xff] %vm70_vm0, %v1852_v51 }
 0xc3a   :  { %v1858_v34 = vpop.permute.xlu1 %1857 }
 0xc3b   :  { %v1863_v27 = vadd.f32 %v2189_v54, %v1858_v34 }
 0xc3d   :  { %1865 = vst.msk [vmem:[%s3115_s13] sm:$0xff] %vm70_vm0, %v1863_v27 }
 0xc42   :  { %v1860_v35 = vpop.permute.xlu2 %1859 }
 0xc43   :  { %v1864_v5 = vadd.f32 %v2190_v14, %v1860_v35 }
 0xc45   :  { %1866 = vst.msk [vmem:[%s3115_s13 + $0x8] sm:$0xff] %vm70_vm0, %v1864_v5 }
 0xc46   :  { %1875 = vsyncpa [#allocation6], 1 }

</bundles_post_ra>
